<compile_context>
chip_gen: v5e
topology: v5e:2x2
jax: 0.10.0
libtpu: 0.0.40
codegen_flags: <defaults>
</compile_context>

<pallas_src>
import math
from functools import partial

import jax
import jax.numpy as jnp
from jax.experimental import pallas as pl
from jax.experimental.pallas import tpu as pltpu

LN_EPS = 1e-12      # config.layer_norm_eps (and DEB LayerNorm eps)
LANE = 128          # lane width: classifier output padded to this
FFN_CHUNK = 512     # default intermediate-dim chunk for the FFN loop


# ---------------------------------------------------------------------------
# in-kernel math helpers (traced inside the Pallas kernel)
# ---------------------------------------------------------------------------
def _layernorm(x, g, b, eps=LN_EPS):
    mu = jnp.mean(x, axis=-1, keepdims=True)
    var = jnp.mean((x - mu) ** 2, axis=-1, keepdims=True)
    return (x - mu) * jax.lax.rsqrt(var + eps) * g + b


def _gelu_tanh(x):
    # tanh-form GELU: transcendental runs on the EUP slot instead of a long
    # VALU erf polynomial.  |diff| vs exact erf GELU < ~1e-3.
    c = 0.7978845608028654  # sqrt(2/pi)
    return 0.5 * x * (1.0 + jnp.tanh(c * (x + 0.044715 * x * x * x)))


def _vmem_limit_bytes():
    """~75% of physical VMEM: ~96 MiB on v5e/v6e (128 MiB), ~48 MiB on v7x."""
    cap = None
    try:
        cap = pltpu.get_tpu_info().vmem_capacity_bytes
    except Exception:
        cap = None
    if not cap:
        cap = 128 * 1024 * 1024
    return min(int(cap) * 3 // 4, 112 * 1024 * 1024)


# ---------------------------------------------------------------------------
# Pallas kernel: one BertLayer (attention + FFN + DeepExplanationBERT gating),
# TB batch rows per grid step.  Static flags select fused-embedding-LN,
# hidden-state output (non-last layers) and classifier logits (last layer).
# ---------------------------------------------------------------------------
def _bert_layer_kernel(nh, i_chunk, do_input_ln, emit_h, do_pred,
                       h_ref, mask_ref, ilg_ref, ilb_ref,
                       wq_ref, bq_ref, wk_ref, bk_ref, wv_ref, bv_ref,
                       wo_ref, bo_ref, ln1g_ref, ln1b_ref,
                       wi_ref, bi_ref, wd_ref, bd_ref,
                       ww_ref, ln2g_ref, ln2b_ref, wp_ref, bp_ref,
                       *out_refs):
    TB, S, H = h_ref.shape
    dh = H // nh
    M = TB * S

    x3 = h_ref[...].astype(jnp.float32)                 # [TB, S, H]
    if do_input_ln:                                      # fused embedding LN (layer 0)
        x3 = _layernorm(x3, ilg_ref[...], ilb_ref[...])

    x2 = x3.reshape(M, H)
    xb = x2.astype(jnp.bfloat16)

    # ----- BertSelfAttention: Q/K/V projections as dense [M,H]x[H,H] matmuls
    # (1/sqrt(dh) is pre-folded into wq host-side) -----
    q2 = jnp.dot(xb, wq_ref[...], preferred_element_type=jnp.float32) + bq_ref[...]
    k2 = jnp.dot(xb, wk_ref[...], preferred_element_type=jnp.float32) + bk_ref[...]
    v2 = jnp.dot(xb, wv_ref[...], preferred_element_type=jnp.float32) + bv_ref[...]
    qb2 = q2.astype(jnp.bfloat16)
    kb2 = k2.astype(jnp.bfloat16)
    vb2 = v2.astype(jnp.bfloat16)

    add_mask = mask_ref[...]                             # [TB, 1, S]
    wo_all = wo_ref[...]                                 # [H, H] bf16, VMEM-resident

    # Per-head attention; the head-concat is folded into the output projection
    # by accumulating ctx_h @ wo[rows-of-head-h].  Live scores/probs are bounded
    # to a single head ([TB, S, S]) instead of all heads at once.
    attn2 = jnp.zeros((M, H), jnp.float32)
    for head in range(nh):
        sl = slice(head * dh, (head + 1) * dh)
        qh = qb2[:, sl].reshape(TB, S, dh)
        kh = kb2[:, sl].reshape(TB, S, dh)
        vh = vb2[:, sl].reshape(TB, S, dh)
        s_h = jnp.einsum('bqd,bkd->bqk', qh, kh,
                         preferred_element_type=jnp.float32)        # [TB, S, S]
        s_h = s_h + add_mask                                        # mask over keys
        s_h = s_h - jnp.max(s_h, axis=-1, keepdims=True)
        p_h = jnp.exp(s_h)
        p_h = p_h * pl.reciprocal(jnp.sum(p_h, axis=-1, keepdims=True), approx=True)
        c_h = jnp.einsum('bqk,bkd->bqd', p_h.astype(jnp.bfloat16), vh,
                         preferred_element_type=jnp.float32)        # [TB, S, dh]
        attn2 = attn2 + jnp.dot(c_h.reshape(M, dh).astype(jnp.bfloat16),
                                wo_all[sl, :],
                                preferred_element_type=jnp.float32)

    # ----- BertSelfOutput: dense(+accumulated above) + residual + LayerNorm -----
    attn2 = attn2 + bo_ref[...]
    attn3 = _layernorm(attn2.reshape(TB, S, H) + x3, ln1g_ref[...], ln1b_ref[...])
    attn_b2 = attn3.reshape(M, H).astype(jnp.bfloat16)

    # ----- BertIntermediate + DEB dense, chunked over the intermediate dim -----
    I = wi_ref.shape[1]
    n_chunks = (I + i_chunk - 1) // i_chunk
    x_next2 = jnp.zeros((M, H), jnp.float32)
    for c in range(n_chunks):
        c0 = c * i_chunk
        c1 = min(I, c0 + i_chunk)
        inter_c = _gelu_tanh(
            jnp.dot(attn_b2, wi_ref[:, c0:c1], preferred_element_type=jnp.float32)
            + bi_ref[:, c0:c1])
        x_next2 = x_next2 + jnp.dot(inter_c.astype(jnp.bfloat16), wd_ref[c0:c1, :],
                                    preferred_element_type=jnp.float32)
    x_next2 = x_next2 + bd_ref[...]
    x_next3 = x_next2.reshape(TB, S, H)

    # ----- DeepExplanationBERT gating -----
    x_sq = jnp.mean(attn3, axis=1)                       # [TB, H] mean over seq
    xn_sq = jnp.mean(x_next3, axis=1)                    # [TB, H]
    comb = jnp.maximum(x_sq + xn_sq, 0.0)                # relu
    a = jnp.dot(comb.astype(jnp.bfloat16), ww_ref[...],
                preferred_element_type=jnp.float32)      # [TB, H]

    if emit_h and do_pred:
        out_ref, pred_ref = out_refs
    elif emit_h:
        (out_ref,) = out_refs
        pred_ref = None
    else:
        (pred_ref,) = out_refs
        out_ref = None

    if emit_h:
        gate = pl.reciprocal(1.0 + jnp.exp(-a), approx=True)   # sigmoid on the EUP
        x_att = _layernorm((attn3 + x_next3) * gate[:, None, :],
                           ln2g_ref[...], ln2b_ref[...])
        out_ref[...] = x_att.astype(out_ref.dtype)             # bf16 hidden state

    if do_pred:
        # BertClassificationHead: logits = a @ W^T + b
        # (wp is pre-transposed and lane-padded to 128 host-side).
        pred_ref[...] = (jnp.dot(a.astype(jnp.bfloat16), wp_ref[...],
                                 preferred_element_type=jnp.float32)
                         + bp_ref[...])


# ---------------------------------------------------------------------------
# wrappers (glue)
# ---------------------------------------------------------------------------
def _bert_layer_call(h, add_mask3, in_ln_g, in_ln_b, lp, *, num_heads, batch_tile,
                     fuse_input_ln, emit_h, do_pred, i_chunk, single_buffer_weights):
    B, S, H = h.shape
    TB = batch_tile
    assert B % TB == 0, "batch_tile must divide the batch size"
    Lpad = lp["wp"].shape[1]

    kernel = partial(_bert_layer_kernel, num_heads, i_chunk,
                     fuse_input_ln, emit_h, do_pred)

    def wspec(arr):
        # whole-array block, constant index -> weight stays VMEM-resident;
        # single-buffered (no re-fetch ever needed) to halve weight VMEM.
        shape = arr.shape
        zeros = (0,) * len(shape)
        if single_buffer_weights:
            return pl.BlockSpec(shape, lambda b: zeros,
                                pipeline_mode=pl.Buffered(1))
        return pl.BlockSpec(shape, lambda b: zeros)

    weight_args = (in_ln_g, in_ln_b,
                   lp["wq"], lp["bq"], lp["wk"], lp["bk"], lp["wv"], lp["bv"],
                   lp["wo"], lp["bo"], lp["ln1g"], lp["ln1b"],
                   lp["wi"], lp["bi"], lp["wd"], lp["bd"],
                   lp["ww"], lp["ln2g"], lp["ln2b"], lp["wp"], lp["bp"])

    in_specs = [pl.BlockSpec((TB, S, H), lambda b: (b, 0, 0)),   # hidden (bf16)
                pl.BlockSpec((TB, 1, S), lambda b: (b, 0, 0))]   # additive mask
    in_specs += [wspec(w) for w in weight_args]

    out_specs = []
    out_shape = []
    if emit_h:
        out_specs.append(pl.BlockSpec((TB, S, H), lambda b: (b, 0, 0)))
        out_shape.append(jax.ShapeDtypeStruct((B, S, H), jnp.bfloat16))
    if do_pred:
        out_specs.append(pl.BlockSpec((TB, Lpad), lambda b: (b, 0)))
        out_shape.append(jax.ShapeDtypeStruct((B, Lpad), jnp.float32))

    return pl.pallas_call(
        kernel,
        grid=(B // TB,),
        in_specs=in_specs,
        out_specs=tuple(out_specs),
        out_shape=tuple(out_shape),
        compiler_params=pltpu.CompilerParams(
            dimension_semantics=("parallel",),        # shards batch across TCs
            vmem_limit_bytes=_vmem_limit_bytes()),
    )(h, add_mask3, *weight_args)


def bert_layer(h, add_mask3, in_ln_g, in_ln_b, lp, **kw):
    try:
        return _bert_layer_call(h, add_mask3, in_ln_g, in_ln_b, lp,
                                single_buffer_weights=True, **kw)
    except Exception:
        # Fallback if this jax/Mosaic version rejects pipeline_mode=pl.Buffered(1);
        # weights then use the default double-buffering.
        return _bert_layer_call(h, add_mask3, in_ln_g, in_ln_b, lp,
                                single_buffer_weights=False, **kw)


def custom_bert_forward(params, input_ids, attention_mask=None, *, num_heads=4,
                        batch_tile=None, ffn_chunk=FFN_CHUNK):
    B, S = input_ids.shape
    if attention_mask is None:
        attention_mask = jnp.ones((B, S), jnp.float32)
    # (1 - mask) * -10000, shaped [B, 1, S]; broadcast over heads/queries in-kernel
    add_mask3 = ((1.0 - attention_mask.astype(jnp.float32)) * -10000.0)[:, None, :]

    if batch_tile is None:
        batch_tile = next(d for d in (8, 4, 2, 1) if B % d == 0)

    # BertEmbeddings (embedding lookups are gathers -> plain JAX glue);
    # the embedding LayerNorm is fused into the first layer kernel and the
    # activation stream is carried in bf16 between layers.
    pos_ids = jnp.arange(S)
    emb = (params["word_emb"][input_ids]
           + params["pos_emb"][pos_ids][None, :, :]
           + params["tok_emb"][0][None, None, :])        # token_type_ids = zeros
    h = emb.astype(jnp.bfloat16)

    n_layers = len(params["layers"])
    pred = None
    for li, lp in enumerate(params["layers"]):
        last = (li == n_layers - 1)
        I = lp["wi"].shape[1]
        outs = bert_layer(h, add_mask3,
                          params["emb_ln_g"], params["emb_ln_b"], lp,
                          num_heads=num_heads, batch_tile=batch_tile,
                          fuse_input_ln=(li == 0),
                          emit_h=not last,           # last layer's hidden is unused
                          do_pred=last,              # only the last layer's logits
                          i_chunk=min(I, ffn_chunk))
        if last:
            pred = outs[0]
        else:
            h = outs[0]
    # eval mode: return deep_preds[-1]; slice back from the lane-padded width.
    return pred[:, :params["num_labels"]]


# ---------------------------------------------------------------------------
# parameter init + one-time host-side prep (fold scale, cast to bf16, pad head)
# ---------------------------------------------------------------------------
def init_params(key, vocab, max_pos, type_vocab, H, I, L, n_layers):
    keys = jax.random.split(key, 3 + n_layers)

    def lin(k, din, dout):
        return jax.random.normal(k, (din, dout), jnp.float32) * 0.02

    word = jax.random.normal(keys[0], (vocab, H), jnp.float32) * 0.02
    word = word.at[0].set(0.0)  # padding_idx = 0
    pos = jax.random.normal(keys[1], (max_pos, H), jnp.float32) * 0.02
    tok = jax.random.normal(keys[2], (type_vocab, H), jnp.float32) * 0.02

    params = dict(word_emb=word, pos_emb=pos, tok_emb=tok,
                  emb_ln_g=jnp.ones((1, H), jnp.float32),
                  emb_ln_b=jnp.zeros((1, H), jnp.float32),
                  layers=[])
    for li in range(n_layers):
        lk = jax.random.split(keys[3 + li], 8)
        layer = dict(
            wq=lin(lk[0], H, H), bq=jnp.zeros((1, H), jnp.float32),
            wk=lin(lk[1], H, H), bk=jnp.zeros((1, H), jnp.float32),
            wv=lin(lk[2], H, H), bv=jnp.zeros((1, H), jnp.float32),
            wo=lin(lk[3], H, H), bo=jnp.zeros((1, H), jnp.float32),
            ln1g=jnp.ones((1, H), jnp.float32), ln1b=jnp.zeros((1, H), jnp.float32),
            wi=lin(lk[4], H, I), bi=jnp.zeros((1, I), jnp.float32),
            wd=lin(lk[5], I, H), bd=jnp.zeros((1, H), jnp.float32),
            ww=lin(lk[6], H, H),
            ln2g=jnp.ones((1, H), jnp.float32), ln2b=jnp.zeros((1, H), jnp.float32),
            wp=lin(lk[7], H, L), bp=jnp.zeros((1, L), jnp.float32),  # classifier
        )
        params["layers"].append(layer)
    return params


def prepare_params(params, num_heads):
    """Host-side prep: fold 1/sqrt(dh) into wq, cast matmul weights to bf16,
    pad the classification head to a lane-dense 128-wide output."""
    H = params["word_emb"].shape[1]
    scale = 1.0 / math.sqrt(H // num_heads)
    out = dict(params)
    out["num_labels"] = params["layers"][0]["wp"].shape[1]
    new_layers = []
    for lp in params["layers"]:
        nlp = dict(lp)
        nlp["wq"] = (lp["wq"] * scale).astype(jnp.bfloat16)
        for name in ("wk", "wv", "wo", "wi", "wd", "ww"):
            nlp[name] = lp[name].astype(jnp.bfloat16)
        L = lp["wp"].shape[1]
        Lpad = ((L + LANE - 1) // LANE) * LANE
        nlp["wp"] = (jnp.zeros((H, Lpad), jnp.float32)
                     .at[:, :L].set(lp["wp"])).astype(jnp.bfloat16)
        nlp["bp"] = jnp.zeros((1, Lpad), jnp.float32).at[:, :L].set(lp["bp"])
        new_layers.append(nlp)
    out["layers"] = new_layers
    return out


if __name__ == "__main__":
    # NOTE: deliberately tiny demo config (sub-(8,128) tiles) — it exercises
    # correctness/lowering only; benchmark at S>=128, H>=256 before tuning.
    B, S, H, NH, I, L = 2, 8, 32, 4, 64, 3
    VOCAB, MAXPOS, TYPEV, NLAYERS = 50, 16, 2, 2

    key = jax.random.PRNGKey(0)
    pkey, ikey = jax.random.split(key)
    params = prepare_params(
        init_params(pkey, VOCAB, MAXPOS, TYPEV, H, I, L, NLAYERS), NH)
    input_ids = jax.random.randint(ikey, (B, S), 0, VOCAB)

    # ffn_chunk=32 so the demo also exercises the multi-chunk FFN path (I=64).
    out = custom_bert_forward(params, input_ids, num_heads=NH, ffn_chunk=32)
    out = jax.block_until_ready(out)
    assert out.shape == (B, L) and out.dtype == jnp.float32
    print("KERNEL_OK")
</pallas_src>

<mosaic_0001>
module attributes {stable_mosaic.version = 11 : i64} {
  func.func @_bert_layer_kernel(%arg0: i32, %arg1: memref<2x8x32xbf16, #tpu.memory_space<vmem>>, %arg2: memref<2x1x8xf32, #tpu.memory_space<vmem>>, %arg3: memref<1x32xf32, #tpu.memory_space<vmem>>, %arg4: memref<1x32xf32, #tpu.memory_space<vmem>>, %arg5: memref<32x32xbf16, #tpu.memory_space<vmem>>, %arg6: memref<1x32xf32, #tpu.memory_space<vmem>>, %arg7: memref<32x32xbf16, #tpu.memory_space<vmem>>, %arg8: memref<1x32xf32, #tpu.memory_space<vmem>>, %arg9: memref<32x32xbf16, #tpu.memory_space<vmem>>, %arg10: memref<1x32xf32, #tpu.memory_space<vmem>>, %arg11: memref<32x32xbf16, #tpu.memory_space<vmem>>, %arg12: memref<1x32xf32, #tpu.memory_space<vmem>>, %arg13: memref<1x32xf32, #tpu.memory_space<vmem>>, %arg14: memref<1x32xf32, #tpu.memory_space<vmem>>, %arg15: memref<32x64xbf16, #tpu.memory_space<vmem>>, %arg16: memref<1x64xf32, #tpu.memory_space<vmem>>, %arg17: memref<64x32xbf16, #tpu.memory_space<vmem>>, %arg18: memref<1x32xf32, #tpu.memory_space<vmem>>, %arg19: memref<32x32xbf16, #tpu.memory_space<vmem>>, %arg20: memref<1x32xf32, #tpu.memory_space<vmem>>, %arg21: memref<1x32xf32, #tpu.memory_space<vmem>>, %arg22: memref<32x128xbf16, #tpu.memory_space<vmem>>, %arg23: memref<1x128xf32, #tpu.memory_space<vmem>>, %arg24: memref<2x8x32xbf16, #tpu.memory_space<vmem>>) attributes {dimension_semantics = [#tpu.dimension_semantics<parallel>], iteration_bounds = array<i64: 1>, scalar_prefetch = 0 : i64, scratch_operands = 0 : i64, tpu.core_type = #tpu.core_type<tc>, window_params = [{transform_indices = @transform_0, window_bounds = array<i64: 2, 8, 32>}, {transform_indices = @transform_1, window_bounds = array<i64: 2, 1, 8>}, {pipeline_mode = #tpu.pipeline_mode<synchronous>, transform_indices = @transform_2, window_bounds = array<i64: 1, 32>}, {pipeline_mode = #tpu.pipeline_mode<synchronous>, transform_indices = @transform_3, window_bounds = array<i64: 1, 32>}, {pipeline_mode = #tpu.pipeline_mode<synchronous>, transform_indices = @transform_4, window_bounds = array<i64: 32, 32>}, {pipeline_mode = #tpu.pipeline_mode<synchronous>, transform_indices = @transform_5, window_bounds = array<i64: 1, 32>}, {pipeline_mode = #tpu.pipeline_mode<synchronous>, transform_indices = @transform_6, window_bounds = array<i64: 32, 32>}, {pipeline_mode = #tpu.pipeline_mode<synchronous>, transform_indices = @transform_7, window_bounds = array<i64: 1, 32>}, {pipeline_mode = #tpu.pipeline_mode<synchronous>, transform_indices = @transform_8, window_bounds = array<i64: 32, 32>}, {pipeline_mode = #tpu.pipeline_mode<synchronous>, transform_indices = @transform_9, window_bounds = array<i64: 1, 32>}, {pipeline_mode = #tpu.pipeline_mode<synchronous>, transform_indices = @transform_10, window_bounds = array<i64: 32, 32>}, {pipeline_mode = #tpu.pipeline_mode<synchronous>, transform_indices = @transform_11, window_bounds = array<i64: 1, 32>}, {pipeline_mode = #tpu.pipeline_mode<synchronous>, transform_indices = @transform_12, window_bounds = array<i64: 1, 32>}, {pipeline_mode = #tpu.pipeline_mode<synchronous>, transform_indices = @transform_13, window_bounds = array<i64: 1, 32>}, {pipeline_mode = #tpu.pipeline_mode<synchronous>, transform_indices = @transform_14, window_bounds = array<i64: 32, 64>}, {pipeline_mode = #tpu.pipeline_mode<synchronous>, transform_indices = @transform_15, window_bounds = array<i64: 1, 64>}, {pipeline_mode = #tpu.pipeline_mode<synchronous>, transform_indices = @transform_16, window_bounds = array<i64: 64, 32>}, {pipeline_mode = #tpu.pipeline_mode<synchronous>, transform_indices = @transform_17, window_bounds = array<i64: 1, 32>}, {pipeline_mode = #tpu.pipeline_mode<synchronous>, transform_indices = @transform_18, window_bounds = array<i64: 32, 32>}, {pipeline_mode = #tpu.pipeline_mode<synchronous>, transform_indices = @transform_19, window_bounds = array<i64: 1, 32>}, {pipeline_mode = #tpu.pipeline_mode<synchronous>, transform_indices = @transform_20, window_bounds = array<i64: 1, 32>}, {pipeline_mode = #tpu.pipeline_mode<synchronous>, transform_indices = @transform_21, window_bounds = array<i64: 32, 128>}, {pipeline_mode = #tpu.pipeline_mode<synchronous>, transform_indices = @transform_22, window_bounds = array<i64: 1, 128>}, {transform_indices = @transform_23, window_bounds = array<i64: 2, 8, 32>}]} {
    %c0 = arith.constant 0 : index
    %c0_0 = arith.constant 0 : index
    %c0_1 = arith.constant 0 : index
    %0 = vector.load %arg1[%c0, %c0_0, %c0_1] : memref<2x8x32xbf16, #tpu.memory_space<vmem>>, vector<2x8x32xbf16>
    %1 = arith.extf %0 : vector<2x8x32xbf16> to vector<2x8x32xf32>
    %c0_2 = arith.constant 0 : index
    %c0_3 = arith.constant 0 : index
    %2 = vector.load %arg3[%c0_2, %c0_3] : memref<1x32xf32, #tpu.memory_space<vmem>>, vector<1x32xf32>
    %c0_4 = arith.constant 0 : index
    %c0_5 = arith.constant 0 : index
    %3 = vector.load %arg4[%c0_4, %c0_5] : memref<1x32xf32, #tpu.memory_space<vmem>>, vector<1x32xf32>
    %cst = arith.constant dense<0.000000e+00> : vector<2x8xf32>
    %4 = vector.multi_reduction <add>, %1, %cst [2] : vector<2x8x32xf32> to vector<2x8xf32>
    %5 = vector.shape_cast %4 : vector<2x8xf32> to vector<2x8x1xf32>
    %cst_6 = arith.constant 3.200000e+01 : f32
    %6 = vector.broadcast %cst_6 : f32 to vector<2x8x1xf32>
    %7 = arith.divf %5, %6 : vector<2x8x1xf32>
    %8 = vector.broadcast %7 : vector<2x8x1xf32> to vector<2x8x32xf32>
    %9 = arith.subf %1, %8 : vector<2x8x32xf32>
    %10 = arith.mulf %9, %9 : vector<2x8x32xf32>
    %cst_7 = arith.constant dense<0.000000e+00> : vector<2x8xf32>
    %11 = vector.multi_reduction <add>, %10, %cst_7 [2] : vector<2x8x32xf32> to vector<2x8xf32>
    %12 = vector.shape_cast %11 : vector<2x8xf32> to vector<2x8x1xf32>
    %cst_8 = arith.constant 3.200000e+01 : f32
    %13 = vector.broadcast %cst_8 : f32 to vector<2x8x1xf32>
    %14 = arith.divf %12, %13 : vector<2x8x1xf32>
    %15 = vector.broadcast %7 : vector<2x8x1xf32> to vector<2x8x32xf32>
    %16 = arith.subf %1, %15 : vector<2x8x32xf32>
    %cst_9 = arith.constant 9.99999996E-13 : f32
    %17 = vector.broadcast %cst_9 : f32 to vector<2x8x1xf32>
    %18 = arith.addf %14, %17 : vector<2x8x1xf32>
    %19 = math.rsqrt %18 : vector<2x8x1xf32>
    %20 = vector.broadcast %19 : vector<2x8x1xf32> to vector<2x8x32xf32>
    %21 = arith.mulf %16, %20 : vector<2x8x32xf32>
    %22 = vector.shape_cast %2 : vector<1x32xf32> to vector<1x1x32xf32>
    %23 = vector.broadcast %22 : vector<1x1x32xf32> to vector<2x8x32xf32>
    %24 = arith.mulf %21, %23 : vector<2x8x32xf32>
    %25 = vector.shape_cast %3 : vector<1x32xf32> to vector<1x1x32xf32>
    %26 = vector.broadcast %25 : vector<1x1x32xf32> to vector<2x8x32xf32>
    %27 = arith.addf %24, %26 : vector<2x8x32xf32>
    %28 = vector.shape_cast %27 : vector<2x8x32xf32> to vector<16x32xf32>
    %29 = arith.truncf %28 : vector<16x32xf32> to vector<16x32xbf16>
    %c0_10 = arith.constant 0 : index
    %c0_11 = arith.constant 0 : index
    %30 = vector.load %arg5[%c0_10, %c0_11] : memref<32x32xbf16, #tpu.memory_space<vmem>>, vector<32x32xbf16>
    %cst_12 = arith.constant dense<0.000000e+00> : vector<16x32xf32>
    %31 = tpu.matmul %29, %30, %cst_12 {dimension_numbers = #tpu.dot_dimension_numbers<[1], [0], [0], [1], [0, 0, 1, 1], [], []>} : vector<16x32xbf16>, vector<32x32xbf16>, vector<16x32xf32> -> vector<16x32xf32>
    %c0_13 = arith.constant 0 : index
    %c0_14 = arith.constant 0 : index
    %32 = vector.load %arg6[%c0_13, %c0_14] : memref<1x32xf32, #tpu.memory_space<vmem>>, vector<1x32xf32>
    %33 = vector.broadcast %32 : vector<1x32xf32> to vector<16x32xf32>
    %34 = arith.addf %31, %33 : vector<16x32xf32>
    %c0_15 = arith.constant 0 : index
    %c0_16 = arith.constant 0 : index
    %35 = vector.load %arg7[%c0_15, %c0_16] : memref<32x32xbf16, #tpu.memory_space<vmem>>, vector<32x32xbf16>
    %cst_17 = arith.constant dense<0.000000e+00> : vector<16x32xf32>
    %36 = tpu.matmul %29, %35, %cst_17 {dimension_numbers = #tpu.dot_dimension_numbers<[1], [0], [0], [1], [0, 0, 1, 1], [], []>} : vector<16x32xbf16>, vector<32x32xbf16>, vector<16x32xf32> -> vector<16x32xf32>
    %c0_18 = arith.constant 0 : index
    %c0_19 = arith.constant 0 : index
    %37 = vector.load %arg8[%c0_18, %c0_19] : memref<1x32xf32, #tpu.memory_space<vmem>>, vector<1x32xf32>
    %38 = vector.broadcast %37 : vector<1x32xf32> to vector<16x32xf32>
    %39 = arith.addf %36, %38 : vector<16x32xf32>
    %c0_20 = arith.constant 0 : index
    %c0_21 = arith.constant 0 : index
    %40 = vector.load %arg9[%c0_20, %c0_21] : memref<32x32xbf16, #tpu.memory_space<vmem>>, vector<32x32xbf16>
    %cst_22 = arith.constant dense<0.000000e+00> : vector<16x32xf32>
    %41 = tpu.matmul %29, %40, %cst_22 {dimension_numbers = #tpu.dot_dimension_numbers<[1], [0], [0], [1], [0, 0, 1, 1], [], []>} : vector<16x32xbf16>, vector<32x32xbf16>, vector<16x32xf32> -> vector<16x32xf32>
    %c0_23 = arith.constant 0 : index
    %c0_24 = arith.constant 0 : index
    %42 = vector.load %arg10[%c0_23, %c0_24] : memref<1x32xf32, #tpu.memory_space<vmem>>, vector<1x32xf32>
    %43 = vector.broadcast %42 : vector<1x32xf32> to vector<16x32xf32>
    %44 = arith.addf %41, %43 : vector<16x32xf32>
    %45 = arith.truncf %34 : vector<16x32xf32> to vector<16x32xbf16>
    %46 = arith.truncf %39 : vector<16x32xf32> to vector<16x32xbf16>
    %47 = arith.truncf %44 : vector<16x32xf32> to vector<16x32xbf16>
    %c0_25 = arith.constant 0 : index
    %c0_26 = arith.constant 0 : index
    %c0_27 = arith.constant 0 : index
    %48 = vector.load %arg2[%c0_25, %c0_26, %c0_27] : memref<2x1x8xf32, #tpu.memory_space<vmem>>, vector<2x1x8xf32>
    %c0_28 = arith.constant 0 : index
    %c0_29 = arith.constant 0 : index
    %49 = vector.load %arg11[%c0_28, %c0_29] : memref<32x32xbf16, #tpu.memory_space<vmem>>, vector<32x32xbf16>
    %cst_30 = arith.constant 0.000000e+00 : f32
    %50 = vector.broadcast %cst_30 : f32 to vector<16x32xf32>
    %51 = vector.extract_strided_slice %45 {offsets = [0, 0], sizes = [16, 8], strides = [1, 1]} : vector<16x32xbf16> to vector<16x8xbf16>
    %52 = vector.shape_cast %51 : vector<16x8xbf16> to vector<2x8x8xbf16>
    %53 = vector.extract_strided_slice %46 {offsets = [0, 0], sizes = [16, 8], strides = [1, 1]} : vector<16x32xbf16> to vector<16x8xbf16>
    %54 = vector.shape_cast %53 : vector<16x8xbf16> to vector<2x8x8xbf16>
    %55 = vector.extract_strided_slice %47 {offsets = [0, 0], sizes = [16, 8], strides = [1, 1]} : vector<16x32xbf16> to vector<16x8xbf16>
    %56 = vector.shape_cast %55 : vector<16x8xbf16> to vector<2x8x8xbf16>
    "tpu.trace_start"() <{level = 10 : i32, message = "bqd,bkd->bqk"}> : () -> ()
    %cst_31 = arith.constant dense<0.000000e+00> : vector<2x8x8xf32>
    %57 = tpu.matmul %52, %54, %cst_31 {dimension_numbers = #tpu.dot_dimension_numbers<[2], [2], [1], [1], [0, 0, 0, 1, 1, 1], [0], [0]>} : vector<2x8x8xbf16>, vector<2x8x8xbf16>, vector<2x8x8xf32> -> vector<2x8x8xf32>
    "tpu.trace_stop"() : () -> ()
    %58 = vector.broadcast %48 : vector<2x1x8xf32> to vector<2x8x8xf32>
    %59 = arith.addf %57, %58 : vector<2x8x8xf32>
    %cst_32 = arith.constant dense<0xFF800000> : vector<2x8xf32>
    %60 = vector.multi_reduction <maximumf>, %59, %cst_32 [2] : vector<2x8x8xf32> to vector<2x8xf32>
    %61 = vector.shape_cast %60 : vector<2x8xf32> to vector<2x8x1xf32>
    %62 = vector.broadcast %61 : vector<2x8x1xf32> to vector<2x8x8xf32>
    %63 = arith.subf %59, %62 : vector<2x8x8xf32>
    %64 = math.exp %63 : vector<2x8x8xf32>
    %cst_33 = arith.constant dense<0.000000e+00> : vector<2x8xf32>
    %65 = vector.multi_reduction <add>, %64, %cst_33 [2] : vector<2x8x8xf32> to vector<2x8xf32>
    %66 = vector.shape_cast %65 : vector<2x8xf32> to vector<2x8x1xf32>
    %67 = tpu.reciprocal %66 {approx = true} : vector<2x8x1xf32> -> vector<2x8x1xf32>
    %68 = vector.broadcast %67 : vector<2x8x1xf32> to vector<2x8x8xf32>
    %69 = arith.mulf %64, %68 : vector<2x8x8xf32>
    %70 = arith.truncf %69 : vector<2x8x8xf32> to vector<2x8x8xbf16>
    "tpu.trace_start"() <{level = 10 : i32, message = "bqk,bkd->bqd"}> : () -> ()
    %cst_34 = arith.constant dense<0.000000e+00> : vector<2x8x8xf32>
    %71 = tpu.matmul %70, %56, %cst_34 {dimension_numbers = #tpu.dot_dimension_numbers<[2], [1], [1], [2], [0, 0, 0, 1, 1, 2], [0], [0]>} : vector<2x8x8xbf16>, vector<2x8x8xbf16>, vector<2x8x8xf32> -> vector<2x8x8xf32>
    "tpu.trace_stop"() : () -> ()
    %72 = vector.shape_cast %71 : vector<2x8x8xf32> to vector<16x8xf32>
    %73 = arith.truncf %72 : vector<16x8xf32> to vector<16x8xbf16>
    %74 = vector.extract_strided_slice %49 {offsets = [0, 0], sizes = [8, 32], strides = [1, 1]} : vector<32x32xbf16> to vector<8x32xbf16>
    %cst_35 = arith.constant dense<0.000000e+00> : vector<16x32xf32>
    %75 = tpu.matmul %73, %74, %cst_35 {dimension_numbers = #tpu.dot_dimension_numbers<[1], [0], [0], [1], [0, 0, 1, 1], [], []>} : vector<16x8xbf16>, vector<8x32xbf16>, vector<16x32xf32> -> vector<16x32xf32>
    %76 = arith.addf %50, %75 : vector<16x32xf32>
    %77 = vector.extract_strided_slice %45 {offsets = [0, 8], sizes = [16, 8], strides = [1, 1]} : vector<16x32xbf16> to vector<16x8xbf16>
    %78 = vector.shape_cast %77 : vector<16x8xbf16> to vector<2x8x8xbf16>
    %79 = vector.extract_strided_slice %46 {offsets = [0, 8], sizes = [16, 8], strides = [1, 1]} : vector<16x32xbf16> to vector<16x8xbf16>
    %80 = vector.shape_cast %79 : vector<16x8xbf16> to vector<2x8x8xbf16>
    %81 = vector.extract_strided_slice %47 {offsets = [0, 8], sizes = [16, 8], strides = [1, 1]} : vector<16x32xbf16> to vector<16x8xbf16>
    %82 = vector.shape_cast %81 : vector<16x8xbf16> to vector<2x8x8xbf16>
    "tpu.trace_start"() <{level = 10 : i32, message = "bqd,bkd->bqk"}> : () -> ()
    %cst_36 = arith.constant dense<0.000000e+00> : vector<2x8x8xf32>
    %83 = tpu.matmul %78, %80, %cst_36 {dimension_numbers = #tpu.dot_dimension_numbers<[2], [2], [1], [1], [0, 0, 0, 1, 1, 1], [0], [0]>} : vector<2x8x8xbf16>, vector<2x8x8xbf16>, vector<2x8x8xf32> -> vector<2x8x8xf32>
    "tpu.trace_stop"() : () -> ()
    %84 = vector.broadcast %48 : vector<2x1x8xf32> to vector<2x8x8xf32>
    %85 = arith.addf %83, %84 : vector<2x8x8xf32>
    %cst_37 = arith.constant dense<0xFF800000> : vector<2x8xf32>
    %86 = vector.multi_reduction <maximumf>, %85, %cst_37 [2] : vector<2x8x8xf32> to vector<2x8xf32>
    %87 = vector.shape_cast %86 : vector<2x8xf32> to vector<2x8x1xf32>
    %88 = vector.broadcast %87 : vector<2x8x1xf32> to vector<2x8x8xf32>
    %89 = arith.subf %85, %88 : vector<2x8x8xf32>
    %90 = math.exp %89 : vector<2x8x8xf32>
    %cst_38 = arith.constant dense<0.000000e+00> : vector<2x8xf32>
    %91 = vector.multi_reduction <add>, %90, %cst_38 [2] : vector<2x8x8xf32> to vector<2x8xf32>
    %92 = vector.shape_cast %91 : vector<2x8xf32> to vector<2x8x1xf32>
    %93 = tpu.reciprocal %92 {approx = true} : vector<2x8x1xf32> -> vector<2x8x1xf32>
    %94 = vector.broadcast %93 : vector<2x8x1xf32> to vector<2x8x8xf32>
    %95 = arith.mulf %90, %94 : vector<2x8x8xf32>
    %96 = arith.truncf %95 : vector<2x8x8xf32> to vector<2x8x8xbf16>
    "tpu.trace_start"() <{level = 10 : i32, message = "bqk,bkd->bqd"}> : () -> ()
    %cst_39 = arith.constant dense<0.000000e+00> : vector<2x8x8xf32>
    %97 = tpu.matmul %96, %82, %cst_39 {dimension_numbers = #tpu.dot_dimension_numbers<[2], [1], [1], [2], [0, 0, 0, 1, 1, 2], [0], [0]>} : vector<2x8x8xbf16>, vector<2x8x8xbf16>, vector<2x8x8xf32> -> vector<2x8x8xf32>
    "tpu.trace_stop"() : () -> ()
    %98 = vector.shape_cast %97 : vector<2x8x8xf32> to vector<16x8xf32>
    %99 = arith.truncf %98 : vector<16x8xf32> to vector<16x8xbf16>
    %100 = vector.extract_strided_slice %49 {offsets = [8, 0], sizes = [8, 32], strides = [1, 1]} : vector<32x32xbf16> to vector<8x32xbf16>
    %cst_40 = arith.constant dense<0.000000e+00> : vector<16x32xf32>
    %101 = tpu.matmul %99, %100, %cst_40 {dimension_numbers = #tpu.dot_dimension_numbers<[1], [0], [0], [1], [0, 0, 1, 1], [], []>} : vector<16x8xbf16>, vector<8x32xbf16>, vector<16x32xf32> -> vector<16x32xf32>
    %102 = arith.addf %76, %101 : vector<16x32xf32>
    %103 = vector.extract_strided_slice %45 {offsets = [0, 16], sizes = [16, 8], strides = [1, 1]} : vector<16x32xbf16> to vector<16x8xbf16>
    %104 = vector.shape_cast %103 : vector<16x8xbf16> to vector<2x8x8xbf16>
    %105 = vector.extract_strided_slice %46 {offsets = [0, 16], sizes = [16, 8], strides = [1, 1]} : vector<16x32xbf16> to vector<16x8xbf16>
    %106 = vector.shape_cast %105 : vector<16x8xbf16> to vector<2x8x8xbf16>
    %107 = vector.extract_strided_slice %47 {offsets = [0, 16], sizes = [16, 8], strides = [1, 1]} : vector<16x32xbf16> to vector<16x8xbf16>
    %108 = vector.shape_cast %107 : vector<16x8xbf16> to vector<2x8x8xbf16>
    "tpu.trace_start"() <{level = 10 : i32, message = "bqd,bkd->bqk"}> : () -> ()
    %cst_41 = arith.constant dense<0.000000e+00> : vector<2x8x8xf32>
    %109 = tpu.matmul %104, %106, %cst_41 {dimension_numbers = #tpu.dot_dimension_numbers<[2], [2], [1], [1], [0, 0, 0, 1, 1, 1], [0], [0]>} : vector<2x8x8xbf16>, vector<2x8x8xbf16>, vector<2x8x8xf32> -> vector<2x8x8xf32>
    "tpu.trace_stop"() : () -> ()
    %110 = vector.broadcast %48 : vector<2x1x8xf32> to vector<2x8x8xf32>
    %111 = arith.addf %109, %110 : vector<2x8x8xf32>
    %cst_42 = arith.constant dense<0xFF800000> : vector<2x8xf32>
    %112 = vector.multi_reduction <maximumf>, %111, %cst_42 [2] : vector<2x8x8xf32> to vector<2x8xf32>
    %113 = vector.shape_cast %112 : vector<2x8xf32> to vector<2x8x1xf32>
    %114 = vector.broadcast %113 : vector<2x8x1xf32> to vector<2x8x8xf32>
    %115 = arith.subf %111, %114 : vector<2x8x8xf32>
    %116 = math.exp %115 : vector<2x8x8xf32>
    %cst_43 = arith.constant dense<0.000000e+00> : vector<2x8xf32>
    %117 = vector.multi_reduction <add>, %116, %cst_43 [2] : vector<2x8x8xf32> to vector<2x8xf32>
    %118 = vector.shape_cast %117 : vector<2x8xf32> to vector<2x8x1xf32>
    %119 = tpu.reciprocal %118 {approx = true} : vector<2x8x1xf32> -> vector<2x8x1xf32>
    %120 = vector.broadcast %119 : vector<2x8x1xf32> to vector<2x8x8xf32>
    %121 = arith.mulf %116, %120 : vector<2x8x8xf32>
    %122 = arith.truncf %121 : vector<2x8x8xf32> to vector<2x8x8xbf16>
    "tpu.trace_start"() <{level = 10 : i32, message = "bqk,bkd->bqd"}> : () -> ()
    %cst_44 = arith.constant dense<0.000000e+00> : vector<2x8x8xf32>
    %123 = tpu.matmul %122, %108, %cst_44 {dimension_numbers = #tpu.dot_dimension_numbers<[2], [1], [1], [2], [0, 0, 0, 1, 1, 2], [0], [0]>} : vector<2x8x8xbf16>, vector<2x8x8xbf16>, vector<2x8x8xf32> -> vector<2x8x8xf32>
    "tpu.trace_stop"() : () -> ()
    %124 = vector.shape_cast %123 : vector<2x8x8xf32> to vector<16x8xf32>
    %125 = arith.truncf %124 : vector<16x8xf32> to vector<16x8xbf16>
    %126 = vector.extract_strided_slice %49 {offsets = [16, 0], sizes = [8, 32], strides = [1, 1]} : vector<32x32xbf16> to vector<8x32xbf16>
    %cst_45 = arith.constant dense<0.000000e+00> : vector<16x32xf32>
    %127 = tpu.matmul %125, %126, %cst_45 {dimension_numbers = #tpu.dot_dimension_numbers<[1], [0], [0], [1], [0, 0, 1, 1], [], []>} : vector<16x8xbf16>, vector<8x32xbf16>, vector<16x32xf32> -> vector<16x32xf32>
    %128 = arith.addf %102, %127 : vector<16x32xf32>
    %129 = vector.extract_strided_slice %45 {offsets = [0, 24], sizes = [16, 8], strides = [1, 1]} : vector<16x32xbf16> to vector<16x8xbf16>
    %130 = vector.shape_cast %129 : vector<16x8xbf16> to vector<2x8x8xbf16>
    %131 = vector.extract_strided_slice %46 {offsets = [0, 24], sizes = [16, 8], strides = [1, 1]} : vector<16x32xbf16> to vector<16x8xbf16>
    %132 = vector.shape_cast %131 : vector<16x8xbf16> to vector<2x8x8xbf16>
    %133 = vector.extract_strided_slice %47 {offsets = [0, 24], sizes = [16, 8], strides = [1, 1]} : vector<16x32xbf16> to vector<16x8xbf16>
    %134 = vector.shape_cast %133 : vector<16x8xbf16> to vector<2x8x8xbf16>
    "tpu.trace_start"() <{level = 10 : i32, message = "bqd,bkd->bqk"}> : () -> ()
    %cst_46 = arith.constant dense<0.000000e+00> : vector<2x8x8xf32>
    %135 = tpu.matmul %130, %132, %cst_46 {dimension_numbers = #tpu.dot_dimension_numbers<[2], [2], [1], [1], [0, 0, 0, 1, 1, 1], [0], [0]>} : vector<2x8x8xbf16>, vector<2x8x8xbf16>, vector<2x8x8xf32> -> vector<2x8x8xf32>
    "tpu.trace_stop"() : () -> ()
    %136 = vector.broadcast %48 : vector<2x1x8xf32> to vector<2x8x8xf32>
    %137 = arith.addf %135, %136 : vector<2x8x8xf32>
    %cst_47 = arith.constant dense<0xFF800000> : vector<2x8xf32>
    %138 = vector.multi_reduction <maximumf>, %137, %cst_47 [2] : vector<2x8x8xf32> to vector<2x8xf32>
    %139 = vector.shape_cast %138 : vector<2x8xf32> to vector<2x8x1xf32>
    %140 = vector.broadcast %139 : vector<2x8x1xf32> to vector<2x8x8xf32>
    %141 = arith.subf %137, %140 : vector<2x8x8xf32>
    %142 = math.exp %141 : vector<2x8x8xf32>
    %cst_48 = arith.constant dense<0.000000e+00> : vector<2x8xf32>
    %143 = vector.multi_reduction <add>, %142, %cst_48 [2] : vector<2x8x8xf32> to vector<2x8xf32>
    %144 = vector.shape_cast %143 : vector<2x8xf32> to vector<2x8x1xf32>
    %145 = tpu.reciprocal %144 {approx = true} : vector<2x8x1xf32> -> vector<2x8x1xf32>
    %146 = vector.broadcast %145 : vector<2x8x1xf32> to vector<2x8x8xf32>
    %147 = arith.mulf %142, %146 : vector<2x8x8xf32>
    %148 = arith.truncf %147 : vector<2x8x8xf32> to vector<2x8x8xbf16>
    "tpu.trace_start"() <{level = 10 : i32, message = "bqk,bkd->bqd"}> : () -> ()
    %cst_49 = arith.constant dense<0.000000e+00> : vector<2x8x8xf32>
    %149 = tpu.matmul %148, %134, %cst_49 {dimension_numbers = #tpu.dot_dimension_numbers<[2], [1], [1], [2], [0, 0, 0, 1, 1, 2], [0], [0]>} : vector<2x8x8xbf16>, vector<2x8x8xbf16>, vector<2x8x8xf32> -> vector<2x8x8xf32>
    "tpu.trace_stop"() : () -> ()
    %150 = vector.shape_cast %149 : vector<2x8x8xf32> to vector<16x8xf32>
    %151 = arith.truncf %150 : vector<16x8xf32> to vector<16x8xbf16>
    %152 = vector.extract_strided_slice %49 {offsets = [24, 0], sizes = [8, 32], strides = [1, 1]} : vector<32x32xbf16> to vector<8x32xbf16>
    %cst_50 = arith.constant dense<0.000000e+00> : vector<16x32xf32>
    %153 = tpu.matmul %151, %152, %cst_50 {dimension_numbers = #tpu.dot_dimension_numbers<[1], [0], [0], [1], [0, 0, 1, 1], [], []>} : vector<16x8xbf16>, vector<8x32xbf16>, vector<16x32xf32> -> vector<16x32xf32>
    %154 = arith.addf %128, %153 : vector<16x32xf32>
    %c0_51 = arith.constant 0 : index
    %c0_52 = arith.constant 0 : index
    %155 = vector.load %arg12[%c0_51, %c0_52] : memref<1x32xf32, #tpu.memory_space<vmem>>, vector<1x32xf32>
    %156 = vector.broadcast %155 : vector<1x32xf32> to vector<16x32xf32>
    %157 = arith.addf %154, %156 : vector<16x32xf32>
    %158 = vector.shape_cast %157 : vector<16x32xf32> to vector<2x8x32xf32>
    %159 = arith.addf %158, %27 : vector<2x8x32xf32>
    %c0_53 = arith.constant 0 : index
    %c0_54 = arith.constant 0 : index
    %160 = vector.load %arg13[%c0_53, %c0_54] : memref<1x32xf32, #tpu.memory_space<vmem>>, vector<1x32xf32>
    %c0_55 = arith.constant 0 : index
    %c0_56 = arith.constant 0 : index
    %161 = vector.load %arg14[%c0_55, %c0_56] : memref<1x32xf32, #tpu.memory_space<vmem>>, vector<1x32xf32>
    %cst_57 = arith.constant dense<0.000000e+00> : vector<2x8xf32>
    %162 = vector.multi_reduction <add>, %159, %cst_57 [2] : vector<2x8x32xf32> to vector<2x8xf32>
    %163 = vector.shape_cast %162 : vector<2x8xf32> to vector<2x8x1xf32>
    %cst_58 = arith.constant 3.200000e+01 : f32
    %164 = vector.broadcast %cst_58 : f32 to vector<2x8x1xf32>
    %165 = arith.divf %163, %164 : vector<2x8x1xf32>
    %166 = vector.broadcast %165 : vector<2x8x1xf32> to vector<2x8x32xf32>
    %167 = arith.subf %159, %166 : vector<2x8x32xf32>
    %168 = arith.mulf %167, %167 : vector<2x8x32xf32>
    %cst_59 = arith.constant dense<0.000000e+00> : vector<2x8xf32>
    %169 = vector.multi_reduction <add>, %168, %cst_59 [2] : vector<2x8x32xf32> to vector<2x8xf32>
    %170 = vector.shape_cast %169 : vector<2x8xf32> to vector<2x8x1xf32>
    %cst_60 = arith.constant 3.200000e+01 : f32
    %171 = vector.broadcast %cst_60 : f32 to vector<2x8x1xf32>
    %172 = arith.divf %170, %171 : vector<2x8x1xf32>
    %173 = vector.broadcast %165 : vector<2x8x1xf32> to vector<2x8x32xf32>
    %174 = arith.subf %159, %173 : vector<2x8x32xf32>
    %cst_61 = arith.constant 9.99999996E-13 : f32
    %175 = vector.broadcast %cst_61 : f32 to vector<2x8x1xf32>
    %176 = arith.addf %172, %175 : vector<2x8x1xf32>
    %177 = math.rsqrt %176 : vector<2x8x1xf32>
    %178 = vector.broadcast %177 : vector<2x8x1xf32> to vector<2x8x32xf32>
    %179 = arith.mulf %174, %178 : vector<2x8x32xf32>
    %180 = vector.shape_cast %160 : vector<1x32xf32> to vector<1x1x32xf32>
    %181 = vector.broadcast %180 : vector<1x1x32xf32> to vector<2x8x32xf32>
    %182 = arith.mulf %179, %181 : vector<2x8x32xf32>
    %183 = vector.shape_cast %161 : vector<1x32xf32> to vector<1x1x32xf32>
    %184 = vector.broadcast %183 : vector<1x1x32xf32> to vector<2x8x32xf32>
    %185 = arith.addf %182, %184 : vector<2x8x32xf32>
    %186 = vector.shape_cast %185 : vector<2x8x32xf32> to vector<16x32xf32>
    %187 = arith.truncf %186 : vector<16x32xf32> to vector<16x32xbf16>
    %cst_62 = arith.constant 0.000000e+00 : f32
    %188 = vector.broadcast %cst_62 : f32 to vector<16x32xf32>
    %c0_63 = arith.constant 0 : index
    %c0_64 = arith.constant 0 : index
    %189 = vector.load %arg15[%c0_63, %c0_64] : memref<32x64xbf16, #tpu.memory_space<vmem>>, vector<32x32xbf16>
    %cst_65 = arith.constant dense<0.000000e+00> : vector<16x32xf32>
    %190 = tpu.matmul %187, %189, %cst_65 {dimension_numbers = #tpu.dot_dimension_numbers<[1], [0], [0], [1], [0, 0, 1, 1], [], []>} : vector<16x32xbf16>, vector<32x32xbf16>, vector<16x32xf32> -> vector<16x32xf32>
    %c0_66 = arith.constant 0 : index
    %c0_67 = arith.constant 0 : index
    %191 = vector.load %arg16[%c0_66, %c0_67] : memref<1x64xf32, #tpu.memory_space<vmem>>, vector<1x32xf32>
    %192 = vector.broadcast %191 : vector<1x32xf32> to vector<16x32xf32>
    %193 = arith.addf %190, %192 : vector<16x32xf32>
    %cst_68 = arith.constant 5.000000e-01 : f32
    %194 = vector.broadcast %cst_68 : f32 to vector<16x32xf32>
    %195 = arith.mulf %194, %193 : vector<16x32xf32>
    %cst_69 = arith.constant 4.471500e-02 : f32
    %196 = vector.broadcast %cst_69 : f32 to vector<16x32xf32>
    %197 = arith.mulf %196, %193 : vector<16x32xf32>
    %198 = arith.mulf %197, %193 : vector<16x32xf32>
    %199 = arith.mulf %198, %193 : vector<16x32xf32>
    %200 = arith.addf %193, %199 : vector<16x32xf32>
    %cst_70 = arith.constant 0.797884583 : f32
    %201 = vector.broadcast %cst_70 : f32 to vector<16x32xf32>
    %202 = arith.mulf %201, %200 : vector<16x32xf32>
    %203 = math.tanh %202 : vector<16x32xf32>
    %cst_71 = arith.constant 1.000000e+00 : f32
    %204 = vector.broadcast %cst_71 : f32 to vector<16x32xf32>
    %205 = arith.addf %204, %203 : vector<16x32xf32>
    %206 = arith.mulf %195, %205 : vector<16x32xf32>
    %207 = arith.truncf %206 : vector<16x32xf32> to vector<16x32xbf16>
    %c0_72 = arith.constant 0 : index
    %c0_73 = arith.constant 0 : index
    %208 = vector.load %arg17[%c0_72, %c0_73] : memref<64x32xbf16, #tpu.memory_space<vmem>>, vector<32x32xbf16>
    %cst_74 = arith.constant dense<0.000000e+00> : vector<16x32xf32>
    %209 = tpu.matmul %207, %208, %cst_74 {dimension_numbers = #tpu.dot_dimension_numbers<[1], [0], [0], [1], [0, 0, 1, 1], [], []>} : vector<16x32xbf16>, vector<32x32xbf16>, vector<16x32xf32> -> vector<16x32xf32>
    %210 = arith.addf %188, %209 : vector<16x32xf32>
    %c0_75 = arith.constant 0 : index
    %c32 = arith.constant 32 : index
    %211 = vector.load %arg15[%c0_75, %c32] : memref<32x64xbf16, #tpu.memory_space<vmem>>, vector<32x32xbf16>
    %cst_76 = arith.constant dense<0.000000e+00> : vector<16x32xf32>
    %212 = tpu.matmul %187, %211, %cst_76 {dimension_numbers = #tpu.dot_dimension_numbers<[1], [0], [0], [1], [0, 0, 1, 1], [], []>} : vector<16x32xbf16>, vector<32x32xbf16>, vector<16x32xf32> -> vector<16x32xf32>
    %c0_77 = arith.constant 0 : index
    %c32_78 = arith.constant 32 : index
    %213 = vector.load %arg16[%c0_77, %c32_78] : memref<1x64xf32, #tpu.memory_space<vmem>>, vector<1x32xf32>
    %214 = vector.broadcast %213 : vector<1x32xf32> to vector<16x32xf32>
    %215 = arith.addf %212, %214 : vector<16x32xf32>
    %cst_79 = arith.constant 5.000000e-01 : f32
    %216 = vector.broadcast %cst_79 : f32 to vector<16x32xf32>
    %217 = arith.mulf %216, %215 : vector<16x32xf32>
    %cst_80 = arith.constant 4.471500e-02 : f32
    %218 = vector.broadcast %cst_80 : f32 to vector<16x32xf32>
    %219 = arith.mulf %218, %215 : vector<16x32xf32>
    %220 = arith.mulf %219, %215 : vector<16x32xf32>
    %221 = arith.mulf %220, %215 : vector<16x32xf32>
    %222 = arith.addf %215, %221 : vector<16x32xf32>
    %cst_81 = arith.constant 0.797884583 : f32
    %223 = vector.broadcast %cst_81 : f32 to vector<16x32xf32>
    %224 = arith.mulf %223, %222 : vector<16x32xf32>
    %225 = math.tanh %224 : vector<16x32xf32>
    %cst_82 = arith.constant 1.000000e+00 : f32
    %226 = vector.broadcast %cst_82 : f32 to vector<16x32xf32>
    %227 = arith.addf %226, %225 : vector<16x32xf32>
    %228 = arith.mulf %217, %227 : vector<16x32xf32>
    %229 = arith.truncf %228 : vector<16x32xf32> to vector<16x32xbf16>
    %c32_83 = arith.constant 32 : index
    %c0_84 = arith.constant 0 : index
    %230 = vector.load %arg17[%c32_83, %c0_84] : memref<64x32xbf16, #tpu.memory_space<vmem>>, vector<32x32xbf16>
    %cst_85 = arith.constant dense<0.000000e+00> : vector<16x32xf32>
    %231 = tpu.matmul %229, %230, %cst_85 {dimension_numbers = #tpu.dot_dimension_numbers<[1], [0], [0], [1], [0, 0, 1, 1], [], []>} : vector<16x32xbf16>, vector<32x32xbf16>, vector<16x32xf32> -> vector<16x32xf32>
    %232 = arith.addf %210, %231 : vector<16x32xf32>
    %c0_86 = arith.constant 0 : index
    %c0_87 = arith.constant 0 : index
    %233 = vector.load %arg18[%c0_86, %c0_87] : memref<1x32xf32, #tpu.memory_space<vmem>>, vector<1x32xf32>
    %234 = vector.broadcast %233 : vector<1x32xf32> to vector<16x32xf32>
    %235 = arith.addf %232, %234 : vector<16x32xf32>
    %236 = vector.shape_cast %235 : vector<16x32xf32> to vector<2x8x32xf32>
    %cst_88 = arith.constant dense<0.000000e+00> : vector<2x32xf32>
    %237 = vector.multi_reduction <add>, %185, %cst_88 [1] : vector<2x8x32xf32> to vector<2x32xf32>
    %cst_89 = arith.constant 8.000000e+00 : f32
    %238 = vector.broadcast %cst_89 : f32 to vector<2x32xf32>
    %239 = arith.divf %237, %238 : vector<2x32xf32>
    %cst_90 = arith.constant dense<0.000000e+00> : vector<2x32xf32>
    %240 = vector.multi_reduction <add>, %236, %cst_90 [1] : vector<2x8x32xf32> to vector<2x32xf32>
    %cst_91 = arith.constant 8.000000e+00 : f32
    %241 = vector.broadcast %cst_91 : f32 to vector<2x32xf32>
    %242 = arith.divf %240, %241 : vector<2x32xf32>
    %243 = arith.addf %239, %242 : vector<2x32xf32>
    %cst_92 = arith.constant 0.000000e+00 : f32
    %244 = vector.broadcast %cst_92 : f32 to vector<2x32xf32>
    %245 = arith.maximumf %243, %244 : vector<2x32xf32>
    %246 = arith.truncf %245 : vector<2x32xf32> to vector<2x32xbf16>
    %c0_93 = arith.constant 0 : index
    %c0_94 = arith.constant 0 : index
    %247 = vector.load %arg19[%c0_93, %c0_94] : memref<32x32xbf16, #tpu.memory_space<vmem>>, vector<32x32xbf16>
    %cst_95 = arith.constant dense<0.000000e+00> : vector<2x32xf32>
    %248 = tpu.matmul %246, %247, %cst_95 {dimension_numbers = #tpu.dot_dimension_numbers<[1], [0], [0], [1], [0, 0, 1, 1], [], []>} : vector<2x32xbf16>, vector<32x32xbf16>, vector<2x32xf32> -> vector<2x32xf32>
    %cst_96 = arith.constant 0.000000e+00 : f32
    %249 = vector.broadcast %cst_96 : f32 to vector<2x32xf32>
    %250 = arith.subf %249, %248 : vector<2x32xf32>
    %251 = math.exp %250 : vector<2x32xf32>
    %cst_97 = arith.constant 1.000000e+00 : f32
    %252 = vector.broadcast %cst_97 : f32 to vector<2x32xf32>
    %253 = arith.addf %252, %251 : vector<2x32xf32>
    %254 = tpu.reciprocal %253 {approx = true} : vector<2x32xf32> -> vector<2x32xf32>
    %255 = arith.addf %185, %236 : vector<2x8x32xf32>
    %256 = vector.shape_cast %254 : vector<2x32xf32> to vector<2x1x32xf32>
    %257 = vector.broadcast %256 : vector<2x1x32xf32> to vector<2x8x32xf32>
    %258 = arith.mulf %255, %257 : vector<2x8x32xf32>
    %c0_98 = arith.constant 0 : index
    %c0_99 = arith.constant 0 : index
    %259 = vector.load %arg20[%c0_98, %c0_99] : memref<1x32xf32, #tpu.memory_space<vmem>>, vector<1x32xf32>
    %c0_100 = arith.constant 0 : index
    %c0_101 = arith.constant 0 : index
    %260 = vector.load %arg21[%c0_100, %c0_101] : memref<1x32xf32, #tpu.memory_space<vmem>>, vector<1x32xf32>
    %cst_102 = arith.constant dense<0.000000e+00> : vector<2x8xf32>
    %261 = vector.multi_reduction <add>, %258, %cst_102 [2] : vector<2x8x32xf32> to vector<2x8xf32>
    %262 = vector.shape_cast %261 : vector<2x8xf32> to vector<2x8x1xf32>
    %cst_103 = arith.constant 3.200000e+01 : f32
    %263 = vector.broadcast %cst_103 : f32 to vector<2x8x1xf32>
    %264 = arith.divf %262, %263 : vector<2x8x1xf32>
    %265 = vector.broadcast %264 : vector<2x8x1xf32> to vector<2x8x32xf32>
    %266 = arith.subf %258, %265 : vector<2x8x32xf32>
    %267 = arith.mulf %266, %266 : vector<2x8x32xf32>
    %cst_104 = arith.constant dense<0.000000e+00> : vector<2x8xf32>
    %268 = vector.multi_reduction <add>, %267, %cst_104 [2] : vector<2x8x32xf32> to vector<2x8xf32>
    %269 = vector.shape_cast %268 : vector<2x8xf32> to vector<2x8x1xf32>
    %cst_105 = arith.constant 3.200000e+01 : f32
    %270 = vector.broadcast %cst_105 : f32 to vector<2x8x1xf32>
    %271 = arith.divf %269, %270 : vector<2x8x1xf32>
    %272 = vector.broadcast %264 : vector<2x8x1xf32> to vector<2x8x32xf32>
    %273 = arith.subf %258, %272 : vector<2x8x32xf32>
    %cst_106 = arith.constant 9.99999996E-13 : f32
    %274 = vector.broadcast %cst_106 : f32 to vector<2x8x1xf32>
    %275 = arith.addf %271, %274 : vector<2x8x1xf32>
    %276 = math.rsqrt %275 : vector<2x8x1xf32>
    %277 = vector.broadcast %276 : vector<2x8x1xf32> to vector<2x8x32xf32>
    %278 = arith.mulf %273, %277 : vector<2x8x32xf32>
    %279 = vector.shape_cast %259 : vector<1x32xf32> to vector<1x1x32xf32>
    %280 = vector.broadcast %279 : vector<1x1x32xf32> to vector<2x8x32xf32>
    %281 = arith.mulf %278, %280 : vector<2x8x32xf32>
    %282 = vector.shape_cast %260 : vector<1x32xf32> to vector<1x1x32xf32>
    %283 = vector.broadcast %282 : vector<1x1x32xf32> to vector<2x8x32xf32>
    %284 = arith.addf %281, %283 : vector<2x8x32xf32>
    %285 = arith.truncf %284 : vector<2x8x32xf32> to vector<2x8x32xbf16>
    %c0_107 = arith.constant 0 : index
    %c0_108 = arith.constant 0 : index
    %c0_109 = arith.constant 0 : index
    %286 = vector.load %arg24[%c0_107, %c0_108, %c0_109] : memref<2x8x32xbf16, #tpu.memory_space<vmem>>, vector<2x8x32xbf16>
    tpu.vector_store %arg24[%c0_107, %c0_108, %c0_109], %285 {strides = array<i32>} : memref<2x8x32xbf16, #tpu.memory_space<vmem>>, vector<2x8x32xbf16>,
    return
  }
  func.func @transform_0(%arg0: i32) -> (i32, i32, i32) {
    %c0_i32 = arith.constant 0 : i32
    %c0_i32_0 = arith.constant 0 : i32
    %c0_i32_1 = arith.constant 0 : i32
    return %arg0, %c0_i32, %c0_i32_0 : i32, i32, i32
  }
  func.func @transform_1(%arg0: i32) -> (i32, i32, i32) {
    %c0_i32 = arith.constant 0 : i32
    %c0_i32_0 = arith.constant 0 : i32
    %c0_i32_1 = arith.constant 0 : i32
    return %arg0, %c0_i32, %c0_i32_0 : i32, i32, i32
  }
  func.func @transform_2(%arg0: i32) -> (i32, i32) {
    %c0_i32 = arith.constant 0 : i32
    %c0_i32_0 = arith.constant 0 : i32
    %c0_i32_1 = arith.constant 0 : i32
    return %c0_i32, %c0_i32_0 : i32, i32
  }
  func.func @transform_3(%arg0: i32) -> (i32, i32) {
    %c0_i32 = arith.constant 0 : i32
    %c0_i32_0 = arith.constant 0 : i32
    %c0_i32_1 = arith.constant 0 : i32
    return %c0_i32, %c0_i32_0 : i32, i32
  }
  func.func @transform_4(%arg0: i32) -> (i32, i32) {
    %c0_i32 = arith.constant 0 : i32
    %c0_i32_0 = arith.constant 0 : i32
    %c0_i32_1 = arith.constant 0 : i32
    return %c0_i32, %c0_i32_0 : i32, i32
  }
  func.func @transform_5(%arg0: i32) -> (i32, i32) {
    %c0_i32 = arith.constant 0 : i32
    %c0_i32_0 = arith.constant 0 : i32
    %c0_i32_1 = arith.constant 0 : i32
    return %c0_i32, %c0_i32_0 : i32, i32
  }
  func.func @transform_6(%arg0: i32) -> (i32, i32) {
    %c0_i32 = arith.constant 0 : i32
    %c0_i32_0 = arith.constant 0 : i32
    %c0_i32_1 = arith.constant 0 : i32
    return %c0_i32, %c0_i32_0 : i32, i32
  }
  func.func @transform_7(%arg0: i32) -> (i32, i32) {
    %c0_i32 = arith.constant 0 : i32
    %c0_i32_0 = arith.constant 0 : i32
    %c0_i32_1 = arith.constant 0 : i32
    return %c0_i32, %c0_i32_0 : i32, i32
  }
  func.func @transform_8(%arg0: i32) -> (i32, i32) {
    %c0_i32 = arith.constant 0 : i32
    %c0_i32_0 = arith.constant 0 : i32
    %c0_i32_1 = arith.constant 0 : i32
    return %c0_i32, %c0_i32_0 : i32, i32
  }
  func.func @transform_9(%arg0: i32) -> (i32, i32) {
    %c0_i32 = arith.constant 0 : i32
    %c0_i32_0 = arith.constant 0 : i32
    %c0_i32_1 = arith.constant 0 : i32
    return %c0_i32, %c0_i32_0 : i32, i32
  }
  func.func @transform_10(%arg0: i32) -> (i32, i32) {
    %c0_i32 = arith.constant 0 : i32
    %c0_i32_0 = arith.constant 0 : i32
    %c0_i32_1 = arith.constant 0 : i32
    return %c0_i32, %c0_i32_0 : i32, i32
  }
  func.func @transform_11(%arg0: i32) -> (i32, i32) {
    %c0_i32 = arith.constant 0 : i32
    %c0_i32_0 = arith.constant 0 : i32
    %c0_i32_1 = arith.constant 0 : i32
    return %c0_i32, %c0_i32_0 : i32, i32
  }
  func.func @transform_12(%arg0: i32) -> (i32, i32) {
    %c0_i32 = arith.constant 0 : i32
    %c0_i32_0 = arith.constant 0 : i32
    %c0_i32_1 = arith.constant 0 : i32
    return %c0_i32, %c0_i32_0 : i32, i32
  }
  func.func @transform_13(%arg0: i32) -> (i32, i32) {
    %c0_i32 = arith.constant 0 : i32
    %c0_i32_0 = arith.constant 0 : i32
    %c0_i32_1 = arith.constant 0 : i32
    return %c0_i32, %c0_i32_0 : i32, i32
  }
  func.func @transform_14(%arg0: i32) -> (i32, i32) {
    %c0_i32 = arith.constant 0 : i32
    %c0_i32_0 = arith.constant 0 : i32
    %c0_i32_1 = arith.constant 0 : i32
    return %c0_i32, %c0_i32_0 : i32, i32
  }
  func.func @transform_15(%arg0: i32) -> (i32, i32) {
    %c0_i32 = arith.constant 0 : i32
    %c0_i32_0 = arith.constant 0 : i32
    %c0_i32_1 = arith.constant 0 : i32
    return %c0_i32, %c0_i32_0 : i32, i32
  }
  func.func @transform_16(%arg0: i32) -> (i32, i32) {
    %c0_i32 = arith.constant 0 : i32
    %c0_i32_0 = arith.constant 0 : i32
    %c0_i32_1 = arith.constant 0 : i32
    return %c0_i32, %c0_i32_0 : i32, i32
  }
  func.func @transform_17(%arg0: i32) -> (i32, i32) {
    %c0_i32 = arith.constant 0 : i32
    %c0_i32_0 = arith.constant 0 : i32
    %c0_i32_1 = arith.constant 0 : i32
    return %c0_i32, %c0_i32_0 : i32, i32
  }
  func.func @transform_18(%arg0: i32) -> (i32, i32) {
    %c0_i32 = arith.constant 0 : i32
    %c0_i32_0 = arith.constant 0 : i32
    %c0_i32_1 = arith.constant 0 : i32
    return %c0_i32, %c0_i32_0 : i32, i32
  }
  func.func @transform_19(%arg0: i32) -> (i32, i32) {
    %c0_i32 = arith.constant 0 : i32
    %c0_i32_0 = arith.constant 0 : i32
    %c0_i32_1 = arith.constant 0 : i32
    return %c0_i32, %c0_i32_0 : i32, i32
  }
  func.func @transform_20(%arg0: i32) -> (i32, i32) {
    %c0_i32 = arith.constant 0 : i32
    %c0_i32_0 = arith.constant 0 : i32
    %c0_i32_1 = arith.constant 0 : i32
    return %c0_i32, %c0_i32_0 : i32, i32
  }
  func.func @transform_21(%arg0: i32) -> (i32, i32) {
    %c0_i32 = arith.constant 0 : i32
    %c0_i32_0 = arith.constant 0 : i32
    %c0_i32_1 = arith.constant 0 : i32
    return %c0_i32, %c0_i32_0 : i32, i32
  }
  func.func @transform_22(%arg0: i32) -> (i32, i32) {
    %c0_i32 = arith.constant 0 : i32
    %c0_i32_0 = arith.constant 0 : i32
    %c0_i32_1 = arith.constant 0 : i32
    return %c0_i32, %c0_i32_0 : i32, i32
  }
  func.func @transform_23(%arg0: i32) -> (i32, i32, i32) {
    %c0_i32 = arith.constant 0 : i32
    %c0_i32_0 = arith.constant 0 : i32
    %c0_i32_1 = arith.constant 0 : i32
    return %arg0, %c0_i32, %c0_i32_0 : i32, i32, i32
  }
}

module attributes {stable_mosaic.version = 11 : i64} {
  func.func @_bert_layer_kernel(%arg0: i32, %arg1: memref<2x8x32xbf16, #tpu.memory_space<vmem>>, %arg2: memref<2x1x8xf32, #tpu.memory_space<vmem>>, %arg3: memref<1x32xf32, #tpu.memory_space<vmem>>, %arg4: memref<1x32xf32, #tpu.memory_space<vmem>>, %arg5: memref<32x32xbf16, #tpu.memory_space<vmem>>, %arg6: memref<1x32xf32, #tpu.memory_space<vmem>>, %arg7: memref<32x32xbf16, #tpu.memory_space<vmem>>, %arg8: memref<1x32xf32, #tpu.memory_space<vmem>>, %arg9: memref<32x32xbf16, #tpu.memory_space<vmem>>, %arg10: memref<1x32xf32, #tpu.memory_space<vmem>>, %arg11: memref<32x32xbf16, #tpu.memory_space<vmem>>, %arg12: memref<1x32xf32, #tpu.memory_space<vmem>>, %arg13: memref<1x32xf32, #tpu.memory_space<vmem>>, %arg14: memref<1x32xf32, #tpu.memory_space<vmem>>, %arg15: memref<32x64xbf16, #tpu.memory_space<vmem>>, %arg16: memref<1x64xf32, #tpu.memory_space<vmem>>, %arg17: memref<64x32xbf16, #tpu.memory_space<vmem>>, %arg18: memref<1x32xf32, #tpu.memory_space<vmem>>, %arg19: memref<32x32xbf16, #tpu.memory_space<vmem>>, %arg20: memref<1x32xf32, #tpu.memory_space<vmem>>, %arg21: memref<1x32xf32, #tpu.memory_space<vmem>>, %arg22: memref<32x128xbf16, #tpu.memory_space<vmem>>, %arg23: memref<1x128xf32, #tpu.memory_space<vmem>>, %arg24: memref<2x8x32xbf16, #tpu.memory_space<vmem>>) attributes {dimension_semantics = [#tpu.dimension_semantics<parallel>], iteration_bounds = array<i64: 1>, scalar_prefetch = 0 : i64, scratch_operands = 0 : i64, tpu.core_type = #tpu.core_type<tc>, window_params = [{transform_indices = @transform_0, window_bounds = array<i64: 2, 8, 32>}, {transform_indices = @transform_1, window_bounds = array<i64: 2, 1, 8>}, {pipeline_mode = #tpu.pipeline_mode<synchronous>, transform_indices = @transform_2, window_bounds = array<i64: 1, 32>}, {pipeline_mode = #tpu.pipeline_mode<synchronous>, transform_indices = @transform_3, window_bounds = array<i64: 1, 32>}, {pipeline_mode = #tpu.pipeline_mode<synchronous>, transform_indices = @transform_4, window_bounds = array<i64: 32, 32>}, {pipeline_mode = #tpu.pipeline_mode<synchronous>, transform_indices = @transform_5, window_bounds = array<i64: 1, 32>}, {pipeline_mode = #tpu.pipeline_mode<synchronous>, transform_indices = @transform_6, window_bounds = array<i64: 32, 32>}, {pipeline_mode = #tpu.pipeline_mode<synchronous>, transform_indices = @transform_7, window_bounds = array<i64: 1, 32>}, {pipeline_mode = #tpu.pipeline_mode<synchronous>, transform_indices = @transform_8, window_bounds = array<i64: 32, 32>}, {pipeline_mode = #tpu.pipeline_mode<synchronous>, transform_indices = @transform_9, window_bounds = array<i64: 1, 32>}, {pipeline_mode = #tpu.pipeline_mode<synchronous>, transform_indices = @transform_10, window_bounds = array<i64: 32, 32>}, {pipeline_mode = #tpu.pipeline_mode<synchronous>, transform_indices = @transform_11, window_bounds = array<i64: 1, 32>}, {pipeline_mode = #tpu.pipeline_mode<synchronous>, transform_indices = @transform_12, window_bounds = array<i64: 1, 32>}, {pipeline_mode = #tpu.pipeline_mode<synchronous>, transform_indices = @transform_13, window_bounds = array<i64: 1, 32>}, {pipeline_mode = #tpu.pipeline_mode<synchronous>, transform_indices = @transform_14, window_bounds = array<i64: 32, 64>}, {pipeline_mode = #tpu.pipeline_mode<synchronous>, transform_indices = @transform_15, window_bounds = array<i64: 1, 64>}, {pipeline_mode = #tpu.pipeline_mode<synchronous>, transform_indices = @transform_16, window_bounds = array<i64: 64, 32>}, {pipeline_mode = #tpu.pipeline_mode<synchronous>, transform_indices = @transform_17, window_bounds = array<i64: 1, 32>}, {pipeline_mode = #tpu.pipeline_mode<synchronous>, transform_indices = @transform_18, window_bounds = array<i64: 32, 32>}, {pipeline_mode = #tpu.pipeline_mode<synchronous>, transform_indices = @transform_19, window_bounds = array<i64: 1, 32>}, {pipeline_mode = #tpu.pipeline_mode<synchronous>, transform_indices = @transform_20, window_bounds = array<i64: 1, 32>}, {pipeline_mode = #tpu.pipeline_mode<synchronous>, transform_indices = @transform_21, window_bounds = array<i64: 32, 128>}, {pipeline_mode = #tpu.pipeline_mode<synchronous>, transform_indices = @transform_22, window_bounds = array<i64: 1, 128>}, {transform_indices = @transform_23, window_bounds = array<i64: 2, 8, 32>}]} {
    %c0 = arith.constant 0 : index
    %c0_0 = arith.constant 0 : index
    %c0_1 = arith.constant 0 : index
    %0 = vector.load %arg1[%c0, %c0_0, %c0_1] : memref<2x8x32xbf16, #tpu.memory_space<vmem>>, vector<2x8x32xbf16>
    %1 = arith.extf %0 : vector<2x8x32xbf16> to vector<2x8x32xf32>
    %c0_2 = arith.constant 0 : index
    %c0_3 = arith.constant 0 : index
    %2 = vector.load %arg3[%c0_2, %c0_3] : memref<1x32xf32, #tpu.memory_space<vmem>>, vector<1x32xf32>
    %c0_4 = arith.constant 0 : index
    %c0_5 = arith.constant 0 : index
    %3 = vector.load %arg4[%c0_4, %c0_5] : memref<1x32xf32, #tpu.memory_space<vmem>>, vector<1x32xf32>
    %cst = arith.constant dense<0.000000e+00> : vector<2x8xf32>
    %4 = vector.multi_reduction <add>, %1, %cst [2] : vector<2x8x32xf32> to vector<2x8xf32>
    %5 = vector.shape_cast %4 : vector<2x8xf32> to vector<2x8x1xf32>
    %cst_6 = arith.constant 3.200000e+01 : f32
    %6 = vector.broadcast %cst_6 : f32 to vector<2x8x1xf32>
    %7 = arith.divf %5, %6 : vector<2x8x1xf32>
    %8 = vector.broadcast %7 : vector<2x8x1xf32> to vector<2x8x32xf32>
    %9 = arith.subf %1, %8 : vector<2x8x32xf32>
    %10 = arith.mulf %9, %9 : vector<2x8x32xf32>
    %cst_7 = arith.constant dense<0.000000e+00> : vector<2x8xf32>
    %11 = vector.multi_reduction <add>, %10, %cst_7 [2] : vector<2x8x32xf32> to vector<2x8xf32>
    %12 = vector.shape_cast %11 : vector<2x8xf32> to vector<2x8x1xf32>
    %cst_8 = arith.constant 3.200000e+01 : f32
    %13 = vector.broadcast %cst_8 : f32 to vector<2x8x1xf32>
    %14 = arith.divf %12, %13 : vector<2x8x1xf32>
    %15 = vector.broadcast %7 : vector<2x8x1xf32> to vector<2x8x32xf32>
    %16 = arith.subf %1, %15 : vector<2x8x32xf32>
    %cst_9 = arith.constant 9.99999996E-13 : f32
    %17 = vector.broadcast %cst_9 : f32 to vector<2x8x1xf32>
    %18 = arith.addf %14, %17 : vector<2x8x1xf32>
    %19 = math.rsqrt %18 : vector<2x8x1xf32>
    %20 = vector.broadcast %19 : vector<2x8x1xf32> to vector<2x8x32xf32>
    %21 = arith.mulf %16, %20 : vector<2x8x32xf32>
    %22 = vector.shape_cast %2 : vector<1x32xf32> to vector<1x1x32xf32>
    %23 = vector.broadcast %22 : vector<1x1x32xf32> to vector<2x8x32xf32>
    %24 = arith.mulf %21, %23 : vector<2x8x32xf32>
    %25 = vector.shape_cast %3 : vector<1x32xf32> to vector<1x1x32xf32>
    %26 = vector.broadcast %25 : vector<1x1x32xf32> to vector<2x8x32xf32>
    %27 = arith.addf %24, %26 : vector<2x8x32xf32>
    %28 = vector.shape_cast %27 : vector<2x8x32xf32> to vector<16x32xf32>
    %29 = arith.truncf %28 : vector<16x32xf32> to vector<16x32xbf16>
    %c0_10 = arith.constant 0 : index
    %c0_11 = arith.constant 0 : index
    %30 = vector.load %arg5[%c0_10, %c0_11] : memref<32x32xbf16, #tpu.memory_space<vmem>>, vector<32x32xbf16>
    %cst_12 = arith.constant dense<0.000000e+00> : vector<16x32xf32>
    %31 = tpu.matmul %29, %30, %cst_12 {dimension_numbers = #tpu.dot_dimension_numbers<[1], [0], [0], [1], [0, 0, 1, 1], [], []>} : vector<16x32xbf16>, vector<32x32xbf16>, vector<16x32xf32> -> vector<16x32xf32>
    %c0_13 = arith.constant 0 : index
    %c0_14 = arith.constant 0 : index
    %32 = vector.load %arg6[%c0_13, %c0_14] : memref<1x32xf32, #tpu.memory_space<vmem>>, vector<1x32xf32>
    %33 = vector.broadcast %32 : vector<1x32xf32> to vector<16x32xf32>
    %34 = arith.addf %31, %33 : vector<16x32xf32>
    %c0_15 = arith.constant 0 : index
    %c0_16 = arith.constant 0 : index
    %35 = vector.load %arg7[%c0_15, %c0_16] : memref<32x32xbf16, #tpu.memory_space<vmem>>, vector<32x32xbf16>
    %cst_17 = arith.constant dense<0.000000e+00> : vector<16x32xf32>
    %36 = tpu.matmul %29, %35, %cst_17 {dimension_numbers = #tpu.dot_dimension_numbers<[1], [0], [0], [1], [0, 0, 1, 1], [], []>} : vector<16x32xbf16>, vector<32x32xbf16>, vector<16x32xf32> -> vector<16x32xf32>
    %c0_18 = arith.constant 0 : index
    %c0_19 = arith.constant 0 : index
    %37 = vector.load %arg8[%c0_18, %c0_19] : memref<1x32xf32, #tpu.memory_space<vmem>>, vector<1x32xf32>
    %38 = vector.broadcast %37 : vector<1x32xf32> to vector<16x32xf32>
    %39 = arith.addf %36, %38 : vector<16x32xf32>
    %c0_20 = arith.constant 0 : index
    %c0_21 = arith.constant 0 : index
    %40 = vector.load %arg9[%c0_20, %c0_21] : memref<32x32xbf16, #tpu.memory_space<vmem>>, vector<32x32xbf16>
    %cst_22 = arith.constant dense<0.000000e+00> : vector<16x32xf32>
    %41 = tpu.matmul %29, %40, %cst_22 {dimension_numbers = #tpu.dot_dimension_numbers<[1], [0], [0], [1], [0, 0, 1, 1], [], []>} : vector<16x32xbf16>, vector<32x32xbf16>, vector<16x32xf32> -> vector<16x32xf32>
    %c0_23 = arith.constant 0 : index
    %c0_24 = arith.constant 0 : index
    %42 = vector.load %arg10[%c0_23, %c0_24] : memref<1x32xf32, #tpu.memory_space<vmem>>, vector<1x32xf32>
    %43 = vector.broadcast %42 : vector<1x32xf32> to vector<16x32xf32>
    %44 = arith.addf %41, %43 : vector<16x32xf32>
    %45 = arith.truncf %34 : vector<16x32xf32> to vector<16x32xbf16>
    %46 = arith.truncf %39 : vector<16x32xf32> to vector<16x32xbf16>
    %47 = arith.truncf %44 : vector<16x32xf32> to vector<16x32xbf16>
    %c0_25 = arith.constant 0 : index
    %c0_26 = arith.constant 0 : index
    %c0_27 = arith.constant 0 : index
    %48 = vector.load %arg2[%c0_25, %c0_26, %c0_27] : memref<2x1x8xf32, #tpu.memory_space<vmem>>, vector<2x1x8xf32>
    %c0_28 = arith.constant 0 : index
    %c0_29 = arith.constant 0 : index
    %49 = vector.load %arg11[%c0_28, %c0_29] : memref<32x32xbf16, #tpu.memory_space<vmem>>, vector<32x32xbf16>
    %cst_30 = arith.constant 0.000000e+00 : f32
    %50 = vector.broadcast %cst_30 : f32 to vector<16x32xf32>
    %51 = vector.extract_strided_slice %45 {offsets = [0, 0], sizes = [16, 8], strides = [1, 1]} : vector<16x32xbf16> to vector<16x8xbf16>
    %52 = vector.shape_cast %51 : vector<16x8xbf16> to vector<2x8x8xbf16>
    %53 = vector.extract_strided_slice %46 {offsets = [0, 0], sizes = [16, 8], strides = [1, 1]} : vector<16x32xbf16> to vector<16x8xbf16>
    %54 = vector.shape_cast %53 : vector<16x8xbf16> to vector<2x8x8xbf16>
    %55 = vector.extract_strided_slice %47 {offsets = [0, 0], sizes = [16, 8], strides = [1, 1]} : vector<16x32xbf16> to vector<16x8xbf16>
    %56 = vector.shape_cast %55 : vector<16x8xbf16> to vector<2x8x8xbf16>
    "tpu.trace_start"() <{level = 10 : i32, message = "bqd,bkd->bqk"}> : () -> ()
    %cst_31 = arith.constant dense<0.000000e+00> : vector<2x8x8xf32>
    %57 = tpu.matmul %52, %54, %cst_31 {dimension_numbers = #tpu.dot_dimension_numbers<[2], [2], [1], [1], [0, 0, 0, 1, 1, 1], [0], [0]>} : vector<2x8x8xbf16>, vector<2x8x8xbf16>, vector<2x8x8xf32> -> vector<2x8x8xf32>
    "tpu.trace_stop"() : () -> ()
    %58 = vector.broadcast %48 : vector<2x1x8xf32> to vector<2x8x8xf32>
    %59 = arith.addf %57, %58 : vector<2x8x8xf32>
    %cst_32 = arith.constant dense<0xFF800000> : vector<2x8xf32>
    %60 = vector.multi_reduction <maximumf>, %59, %cst_32 [2] : vector<2x8x8xf32> to vector<2x8xf32>
    %61 = vector.shape_cast %60 : vector<2x8xf32> to vector<2x8x1xf32>
    %62 = vector.broadcast %61 : vector<2x8x1xf32> to vector<2x8x8xf32>
    %63 = arith.subf %59, %62 : vector<2x8x8xf32>
    %64 = math.exp %63 : vector<2x8x8xf32>
    %cst_33 = arith.constant dense<0.000000e+00> : vector<2x8xf32>
    %65 = vector.multi_reduction <add>, %64, %cst_33 [2] : vector<2x8x8xf32> to vector<2x8xf32>
    %66 = vector.shape_cast %65 : vector<2x8xf32> to vector<2x8x1xf32>
    %67 = tpu.reciprocal %66 {approx = true} : vector<2x8x1xf32> -> vector<2x8x1xf32>
    %68 = vector.broadcast %67 : vector<2x8x1xf32> to vector<2x8x8xf32>
    %69 = arith.mulf %64, %68 : vector<2x8x8xf32>
    %70 = arith.truncf %69 : vector<2x8x8xf32> to vector<2x8x8xbf16>
    "tpu.trace_start"() <{level = 10 : i32, message = "bqk,bkd->bqd"}> : () -> ()
    %cst_34 = arith.constant dense<0.000000e+00> : vector<2x8x8xf32>
    %71 = tpu.matmul %70, %56, %cst_34 {dimension_numbers = #tpu.dot_dimension_numbers<[2], [1], [1], [2], [0, 0, 0, 1, 1, 2], [0], [0]>} : vector<2x8x8xbf16>, vector<2x8x8xbf16>, vector<2x8x8xf32> -> vector<2x8x8xf32>
    "tpu.trace_stop"() : () -> ()
    %72 = vector.shape_cast %71 : vector<2x8x8xf32> to vector<16x8xf32>
    %73 = arith.truncf %72 : vector<16x8xf32> to vector<16x8xbf16>
    %74 = vector.extract_strided_slice %49 {offsets = [0, 0], sizes = [8, 32], strides = [1, 1]} : vector<32x32xbf16> to vector<8x32xbf16>
    %cst_35 = arith.constant dense<0.000000e+00> : vector<16x32xf32>
    %75 = tpu.matmul %73, %74, %cst_35 {dimension_numbers = #tpu.dot_dimension_numbers<[1], [0], [0], [1], [0, 0, 1, 1], [], []>} : vector<16x8xbf16>, vector<8x32xbf16>, vector<16x32xf32> -> vector<16x32xf32>
    %76 = arith.addf %50, %75 : vector<16x32xf32>
    %77 = vector.extract_strided_slice %45 {offsets = [0, 8], sizes = [16, 8], strides = [1, 1]} : vector<16x32xbf16> to vector<16x8xbf16>
    %78 = vector.shape_cast %77 : vector<16x8xbf16> to vector<2x8x8xbf16>
    %79 = vector.extract_strided_slice %46 {offsets = [0, 8], sizes = [16, 8], strides = [1, 1]} : vector<16x32xbf16> to vector<16x8xbf16>
    %80 = vector.shape_cast %79 : vector<16x8xbf16> to vector<2x8x8xbf16>
    %81 = vector.extract_strided_slice %47 {offsets = [0, 8], sizes = [16, 8], strides = [1, 1]} : vector<16x32xbf16> to vector<16x8xbf16>
    %82 = vector.shape_cast %81 : vector<16x8xbf16> to vector<2x8x8xbf16>
    "tpu.trace_start"() <{level = 10 : i32, message = "bqd,bkd->bqk"}> : () -> ()
    %cst_36 = arith.constant dense<0.000000e+00> : vector<2x8x8xf32>
    %83 = tpu.matmul %78, %80, %cst_36 {dimension_numbers = #tpu.dot_dimension_numbers<[2], [2], [1], [1], [0, 0, 0, 1, 1, 1], [0], [0]>} : vector<2x8x8xbf16>, vector<2x8x8xbf16>, vector<2x8x8xf32> -> vector<2x8x8xf32>
    "tpu.trace_stop"() : () -> ()
    %84 = vector.broadcast %48 : vector<2x1x8xf32> to vector<2x8x8xf32>
    %85 = arith.addf %83, %84 : vector<2x8x8xf32>
    %cst_37 = arith.constant dense<0xFF800000> : vector<2x8xf32>
    %86 = vector.multi_reduction <maximumf>, %85, %cst_37 [2] : vector<2x8x8xf32> to vector<2x8xf32>
    %87 = vector.shape_cast %86 : vector<2x8xf32> to vector<2x8x1xf32>
    %88 = vector.broadcast %87 : vector<2x8x1xf32> to vector<2x8x8xf32>
    %89 = arith.subf %85, %88 : vector<2x8x8xf32>
    %90 = math.exp %89 : vector<2x8x8xf32>
    %cst_38 = arith.constant dense<0.000000e+00> : vector<2x8xf32>
    %91 = vector.multi_reduction <add>, %90, %cst_38 [2] : vector<2x8x8xf32> to vector<2x8xf32>
    %92 = vector.shape_cast %91 : vector<2x8xf32> to vector<2x8x1xf32>
    %93 = tpu.reciprocal %92 {approx = true} : vector<2x8x1xf32> -> vector<2x8x1xf32>
    %94 = vector.broadcast %93 : vector<2x8x1xf32> to vector<2x8x8xf32>
    %95 = arith.mulf %90, %94 : vector<2x8x8xf32>
    %96 = arith.truncf %95 : vector<2x8x8xf32> to vector<2x8x8xbf16>
    "tpu.trace_start"() <{level = 10 : i32, message = "bqk,bkd->bqd"}> : () -> ()
    %cst_39 = arith.constant dense<0.000000e+00> : vector<2x8x8xf32>
    %97 = tpu.matmul %96, %82, %cst_39 {dimension_numbers = #tpu.dot_dimension_numbers<[2], [1], [1], [2], [0, 0, 0, 1, 1, 2], [0], [0]>} : vector<2x8x8xbf16>, vector<2x8x8xbf16>, vector<2x8x8xf32> -> vector<2x8x8xf32>
    "tpu.trace_stop"() : () -> ()
    %98 = vector.shape_cast %97 : vector<2x8x8xf32> to vector<16x8xf32>
    %99 = arith.truncf %98 : vector<16x8xf32> to vector<16x8xbf16>
    %100 = vector.extract_strided_slice %49 {offsets = [8, 0], sizes = [8, 32], strides = [1, 1]} : vector<32x32xbf16> to vector<8x32xbf16>
    %cst_40 = arith.constant dense<0.000000e+00> : vector<16x32xf32>
    %101 = tpu.matmul %99, %100, %cst_40 {dimension_numbers = #tpu.dot_dimension_numbers<[1], [0], [0], [1], [0, 0, 1, 1], [], []>} : vector<16x8xbf16>, vector<8x32xbf16>, vector<16x32xf32> -> vector<16x32xf32>
    %102 = arith.addf %76, %101 : vector<16x32xf32>
    %103 = vector.extract_strided_slice %45 {offsets = [0, 16], sizes = [16, 8], strides = [1, 1]} : vector<16x32xbf16> to vector<16x8xbf16>
    %104 = vector.shape_cast %103 : vector<16x8xbf16> to vector<2x8x8xbf16>
    %105 = vector.extract_strided_slice %46 {offsets = [0, 16], sizes = [16, 8], strides = [1, 1]} : vector<16x32xbf16> to vector<16x8xbf16>
    %106 = vector.shape_cast %105 : vector<16x8xbf16> to vector<2x8x8xbf16>
    %107 = vector.extract_strided_slice %47 {offsets = [0, 16], sizes = [16, 8], strides = [1, 1]} : vector<16x32xbf16> to vector<16x8xbf16>
    %108 = vector.shape_cast %107 : vector<16x8xbf16> to vector<2x8x8xbf16>
    "tpu.trace_start"() <{level = 10 : i32, message = "bqd,bkd->bqk"}> : () -> ()
    %cst_41 = arith.constant dense<0.000000e+00> : vector<2x8x8xf32>
    %109 = tpu.matmul %104, %106, %cst_41 {dimension_numbers = #tpu.dot_dimension_numbers<[2], [2], [1], [1], [0, 0, 0, 1, 1, 1], [0], [0]>} : vector<2x8x8xbf16>, vector<2x8x8xbf16>, vector<2x8x8xf32> -> vector<2x8x8xf32>
    "tpu.trace_stop"() : () -> ()
    %110 = vector.broadcast %48 : vector<2x1x8xf32> to vector<2x8x8xf32>
    %111 = arith.addf %109, %110 : vector<2x8x8xf32>
    %cst_42 = arith.constant dense<0xFF800000> : vector<2x8xf32>
    %112 = vector.multi_reduction <maximumf>, %111, %cst_42 [2] : vector<2x8x8xf32> to vector<2x8xf32>
    %113 = vector.shape_cast %112 : vector<2x8xf32> to vector<2x8x1xf32>
    %114 = vector.broadcast %113 : vector<2x8x1xf32> to vector<2x8x8xf32>
    %115 = arith.subf %111, %114 : vector<2x8x8xf32>
    %116 = math.exp %115 : vector<2x8x8xf32>
    %cst_43 = arith.constant dense<0.000000e+00> : vector<2x8xf32>
    %117 = vector.multi_reduction <add>, %116, %cst_43 [2] : vector<2x8x8xf32> to vector<2x8xf32>
    %118 = vector.shape_cast %117 : vector<2x8xf32> to vector<2x8x1xf32>
    %119 = tpu.reciprocal %118 {approx = true} : vector<2x8x1xf32> -> vector<2x8x1xf32>
    %120 = vector.broadcast %119 : vector<2x8x1xf32> to vector<2x8x8xf32>
    %121 = arith.mulf %116, %120 : vector<2x8x8xf32>
    %122 = arith.truncf %121 : vector<2x8x8xf32> to vector<2x8x8xbf16>
    "tpu.trace_start"() <{level = 10 : i32, message = "bqk,bkd->bqd"}> : () -> ()
    %cst_44 = arith.constant dense<0.000000e+00> : vector<2x8x8xf32>
    %123 = tpu.matmul %122, %108, %cst_44 {dimension_numbers = #tpu.dot_dimension_numbers<[2], [1], [1], [2], [0, 0, 0, 1, 1, 2], [0], [0]>} : vector<2x8x8xbf16>, vector<2x8x8xbf16>, vector<2x8x8xf32> -> vector<2x8x8xf32>
    "tpu.trace_stop"() : () -> ()
    %124 = vector.shape_cast %123 : vector<2x8x8xf32> to vector<16x8xf32>
    %125 = arith.truncf %124 : vector<16x8xf32> to vector<16x8xbf16>
    %126 = vector.extract_strided_slice %49 {offsets = [16, 0], sizes = [8, 32], strides = [1, 1]} : vector<32x32xbf16> to vector<8x32xbf16>
    %cst_45 = arith.constant dense<0.000000e+00> : vector<16x32xf32>
    %127 = tpu.matmul %125, %126, %cst_45 {dimension_numbers = #tpu.dot_dimension_numbers<[1], [0], [0], [1], [0, 0, 1, 1], [], []>} : vector<16x8xbf16>, vector<8x32xbf16>, vector<16x32xf32> -> vector<16x32xf32>
    %128 = arith.addf %102, %127 : vector<16x32xf32>
    %129 = vector.extract_strided_slice %45 {offsets = [0, 24], sizes = [16, 8], strides = [1, 1]} : vector<16x32xbf16> to vector<16x8xbf16>
    %130 = vector.shape_cast %129 : vector<16x8xbf16> to vector<2x8x8xbf16>
    %131 = vector.extract_strided_slice %46 {offsets = [0, 24], sizes = [16, 8], strides = [1, 1]} : vector<16x32xbf16> to vector<16x8xbf16>
    %132 = vector.shape_cast %131 : vector<16x8xbf16> to vector<2x8x8xbf16>
    %133 = vector.extract_strided_slice %47 {offsets = [0, 24], sizes = [16, 8], strides = [1, 1]} : vector<16x32xbf16> to vector<16x8xbf16>
    %134 = vector.shape_cast %133 : vector<16x8xbf16> to vector<2x8x8xbf16>
    "tpu.trace_start"() <{level = 10 : i32, message = "bqd,bkd->bqk"}> : () -> ()
    %cst_46 = arith.constant dense<0.000000e+00> : vector<2x8x8xf32>
    %135 = tpu.matmul %130, %132, %cst_46 {dimension_numbers = #tpu.dot_dimension_numbers<[2], [2], [1], [1], [0, 0, 0, 1, 1, 1], [0], [0]>} : vector<2x8x8xbf16>, vector<2x8x8xbf16>, vector<2x8x8xf32> -> vector<2x8x8xf32>
    "tpu.trace_stop"() : () -> ()
    %136 = vector.broadcast %48 : vector<2x1x8xf32> to vector<2x8x8xf32>
    %137 = arith.addf %135, %136 : vector<2x8x8xf32>
    %cst_47 = arith.constant dense<0xFF800000> : vector<2x8xf32>
    %138 = vector.multi_reduction <maximumf>, %137, %cst_47 [2] : vector<2x8x8xf32> to vector<2x8xf32>
    %139 = vector.shape_cast %138 : vector<2x8xf32> to vector<2x8x1xf32>
    %140 = vector.broadcast %139 : vector<2x8x1xf32> to vector<2x8x8xf32>
    %141 = arith.subf %137, %140 : vector<2x8x8xf32>
    %142 = math.exp %141 : vector<2x8x8xf32>
    %cst_48 = arith.constant dense<0.000000e+00> : vector<2x8xf32>
    %143 = vector.multi_reduction <add>, %142, %cst_48 [2] : vector<2x8x8xf32> to vector<2x8xf32>
    %144 = vector.shape_cast %143 : vector<2x8xf32> to vector<2x8x1xf32>
    %145 = tpu.reciprocal %144 {approx = true} : vector<2x8x1xf32> -> vector<2x8x1xf32>
    %146 = vector.broadcast %145 : vector<2x8x1xf32> to vector<2x8x8xf32>
    %147 = arith.mulf %142, %146 : vector<2x8x8xf32>
    %148 = arith.truncf %147 : vector<2x8x8xf32> to vector<2x8x8xbf16>
    "tpu.trace_start"() <{level = 10 : i32, message = "bqk,bkd->bqd"}> : () -> ()
    %cst_49 = arith.constant dense<0.000000e+00> : vector<2x8x8xf32>
    %149 = tpu.matmul %148, %134, %cst_49 {dimension_numbers = #tpu.dot_dimension_numbers<[2], [1], [1], [2], [0, 0, 0, 1, 1, 2], [0], [0]>} : vector<2x8x8xbf16>, vector<2x8x8xbf16>, vector<2x8x8xf32> -> vector<2x8x8xf32>
    "tpu.trace_stop"() : () -> ()
    %150 = vector.shape_cast %149 : vector<2x8x8xf32> to vector<16x8xf32>
    %151 = arith.truncf %150 : vector<16x8xf32> to vector<16x8xbf16>
    %152 = vector.extract_strided_slice %49 {offsets = [24, 0], sizes = [8, 32], strides = [1, 1]} : vector<32x32xbf16> to vector<8x32xbf16>
    %cst_50 = arith.constant dense<0.000000e+00> : vector<16x32xf32>
    %153 = tpu.matmul %151, %152, %cst_50 {dimension_numbers = #tpu.dot_dimension_numbers<[1], [0], [0], [1], [0, 0, 1, 1], [], []>} : vector<16x8xbf16>, vector<8x32xbf16>, vector<16x32xf32> -> vector<16x32xf32>
    %154 = arith.addf %128, %153 : vector<16x32xf32>
    %c0_51 = arith.constant 0 : index
    %c0_52 = arith.constant 0 : index
    %155 = vector.load %arg12[%c0_51, %c0_52] : memref<1x32xf32, #tpu.memory_space<vmem>>, vector<1x32xf32>
    %156 = vector.broadcast %155 : vector<1x32xf32> to vector<16x32xf32>
    %157 = arith.addf %154, %156 : vector<16x32xf32>
    %158 = vector.shape_cast %157 : vector<16x32xf32> to vector<2x8x32xf32>
    %159 = arith.addf %158, %27 : vector<2x8x32xf32>
    %c0_53 = arith.constant 0 : index
    %c0_54 = arith.constant 0 : index
    %160 = vector.load %arg13[%c0_53, %c0_54] : memref<1x32xf32, #tpu.memory_space<vmem>>, vector<1x32xf32>
    %c0_55 = arith.constant 0 : index
    %c0_56 = arith.constant 0 : index
    %161 = vector.load %arg14[%c0_55, %c0_56] : memref<1x32xf32, #tpu.memory_space<vmem>>, vector<1x32xf32>
    %cst_57 = arith.constant dense<0.000000e+00> : vector<2x8xf32>
    %162 = vector.multi_reduction <add>, %159, %cst_57 [2] : vector<2x8x32xf32> to vector<2x8xf32>
    %163 = vector.shape_cast %162 : vector<2x8xf32> to vector<2x8x1xf32>
    %cst_58 = arith.constant 3.200000e+01 : f32
    %164 = vector.broadcast %cst_58 : f32 to vector<2x8x1xf32>
    %165 = arith.divf %163, %164 : vector<2x8x1xf32>
    %166 = vector.broadcast %165 : vector<2x8x1xf32> to vector<2x8x32xf32>
    %167 = arith.subf %159, %166 : vector<2x8x32xf32>
    %168 = arith.mulf %167, %167 : vector<2x8x32xf32>
    %cst_59 = arith.constant dense<0.000000e+00> : vector<2x8xf32>
    %169 = vector.multi_reduction <add>, %168, %cst_59 [2] : vector<2x8x32xf32> to vector<2x8xf32>
    %170 = vector.shape_cast %169 : vector<2x8xf32> to vector<2x8x1xf32>
    %cst_60 = arith.constant 3.200000e+01 : f32
    %171 = vector.broadcast %cst_60 : f32 to vector<2x8x1xf32>
    %172 = arith.divf %170, %171 : vector<2x8x1xf32>
    %173 = vector.broadcast %165 : vector<2x8x1xf32> to vector<2x8x32xf32>
    %174 = arith.subf %159, %173 : vector<2x8x32xf32>
    %cst_61 = arith.constant 9.99999996E-13 : f32
    %175 = vector.broadcast %cst_61 : f32 to vector<2x8x1xf32>
    %176 = arith.addf %172, %175 : vector<2x8x1xf32>
    %177 = math.rsqrt %176 : vector<2x8x1xf32>
    %178 = vector.broadcast %177 : vector<2x8x1xf32> to vector<2x8x32xf32>
    %179 = arith.mulf %174, %178 : vector<2x8x32xf32>
    %180 = vector.shape_cast %160 : vector<1x32xf32> to vector<1x1x32xf32>
    %181 = vector.broadcast %180 : vector<1x1x32xf32> to vector<2x8x32xf32>
    %182 = arith.mulf %179, %181 : vector<2x8x32xf32>
    %183 = vector.shape_cast %161 : vector<1x32xf32> to vector<1x1x32xf32>
    %184 = vector.broadcast %183 : vector<1x1x32xf32> to vector<2x8x32xf32>
    %185 = arith.addf %182, %184 : vector<2x8x32xf32>
    %186 = vector.shape_cast %185 : vector<2x8x32xf32> to vector<16x32xf32>
    %187 = arith.truncf %186 : vector<16x32xf32> to vector<16x32xbf16>
    %cst_62 = arith.constant 0.000000e+00 : f32
    %188 = vector.broadcast %cst_62 : f32 to vector<16x32xf32>
    %c0_63 = arith.constant 0 : index
    %c0_64 = arith.constant 0 : index
    %189 = vector.load %arg15[%c0_63, %c0_64] : memref<32x64xbf16, #tpu.memory_space<vmem>>, vector<32x32xbf16>
    %cst_65 = arith.constant dense<0.000000e+00> : vector<16x32xf32>
    %190 = tpu.matmul %187, %189, %cst_65 {dimension_numbers = #tpu.dot_dimension_numbers<[1], [0], [0], [1], [0, 0, 1, 1], [], []>} : vector<16x32xbf16>, vector<32x32xbf16>, vector<16x32xf32> -> vector<16x32xf32>
    %c0_66 = arith.constant 0 : index
    %c0_67 = arith.constant 0 : index
    %191 = vector.load %arg16[%c0_66, %c0_67] : memref<1x64xf32, #tpu.memory_space<vmem>>, vector<1x32xf32>
    %192 = vector.broadcast %191 : vector<1x32xf32> to vector<16x32xf32>
    %193 = arith.addf %190, %192 : vector<16x32xf32>
    %cst_68 = arith.constant 5.000000e-01 : f32
    %194 = vector.broadcast %cst_68 : f32 to vector<16x32xf32>
    %195 = arith.mulf %194, %193 : vector<16x32xf32>
    %cst_69 = arith.constant 4.471500e-02 : f32
    %196 = vector.broadcast %cst_69 : f32 to vector<16x32xf32>
    %197 = arith.mulf %196, %193 : vector<16x32xf32>
    %198 = arith.mulf %197, %193 : vector<16x32xf32>
    %199 = arith.mulf %198, %193 : vector<16x32xf32>
    %200 = arith.addf %193, %199 : vector<16x32xf32>
    %cst_70 = arith.constant 0.797884583 : f32
    %201 = vector.broadcast %cst_70 : f32 to vector<16x32xf32>
    %202 = arith.mulf %201, %200 : vector<16x32xf32>
    %203 = math.tanh %202 : vector<16x32xf32>
    %cst_71 = arith.constant 1.000000e+00 : f32
    %204 = vector.broadcast %cst_71 : f32 to vector<16x32xf32>
    %205 = arith.addf %204, %203 : vector<16x32xf32>
    %206 = arith.mulf %195, %205 : vector<16x32xf32>
    %207 = arith.truncf %206 : vector<16x32xf32> to vector<16x32xbf16>
    %c0_72 = arith.constant 0 : index
    %c0_73 = arith.constant 0 : index
    %208 = vector.load %arg17[%c0_72, %c0_73] : memref<64x32xbf16, #tpu.memory_space<vmem>>, vector<32x32xbf16>
    %cst_74 = arith.constant dense<0.000000e+00> : vector<16x32xf32>
    %209 = tpu.matmul %207, %208, %cst_74 {dimension_numbers = #tpu.dot_dimension_numbers<[1], [0], [0], [1], [0, 0, 1, 1], [], []>} : vector<16x32xbf16>, vector<32x32xbf16>, vector<16x32xf32> -> vector<16x32xf32>
    %210 = arith.addf %188, %209 : vector<16x32xf32>
    %c0_75 = arith.constant 0 : index
    %c32 = arith.constant 32 : index
    %211 = vector.load %arg15[%c0_75, %c32] : memref<32x64xbf16, #tpu.memory_space<vmem>>, vector<32x32xbf16>
    %cst_76 = arith.constant dense<0.000000e+00> : vector<16x32xf32>
    %212 = tpu.matmul %187, %211, %cst_76 {dimension_numbers = #tpu.dot_dimension_numbers<[1], [0], [0], [1], [0, 0, 1, 1], [], []>} : vector<16x32xbf16>, vector<32x32xbf16>, vector<16x32xf32> -> vector<16x32xf32>
    %c0_77 = arith.constant 0 : index
    %c32_78 = arith.constant 32 : index
    %213 = vector.load %arg16[%c0_77, %c32_78] : memref<1x64xf32, #tpu.memory_space<vmem>>, vector<1x32xf32>
    %214 = vector.broadcast %213 : vector<1x32xf32> to vector<16x32xf32>
    %215 = arith.addf %212, %214 : vector<16x32xf32>
    %cst_79 = arith.constant 5.000000e-01 : f32
    %216 = vector.broadcast %cst_79 : f32 to vector<16x32xf32>
    %217 = arith.mulf %216, %215 : vector<16x32xf32>
    %cst_80 = arith.constant 4.471500e-02 : f32
    %218 = vector.broadcast %cst_80 : f32 to vector<16x32xf32>
    %219 = arith.mulf %218, %215 : vector<16x32xf32>
    %220 = arith.mulf %219, %215 : vector<16x32xf32>
    %221 = arith.mulf %220, %215 : vector<16x32xf32>
    %222 = arith.addf %215, %221 : vector<16x32xf32>
    %cst_81 = arith.constant 0.797884583 : f32
    %223 = vector.broadcast %cst_81 : f32 to vector<16x32xf32>
    %224 = arith.mulf %223, %222 : vector<16x32xf32>
    %225 = math.tanh %224 : vector<16x32xf32>
    %cst_82 = arith.constant 1.000000e+00 : f32
    %226 = vector.broadcast %cst_82 : f32 to vector<16x32xf32>
    %227 = arith.addf %226, %225 : vector<16x32xf32>
    %228 = arith.mulf %217, %227 : vector<16x32xf32>
    %229 = arith.truncf %228 : vector<16x32xf32> to vector<16x32xbf16>
    %c32_83 = arith.constant 32 : index
    %c0_84 = arith.constant 0 : index
    %230 = vector.load %arg17[%c32_83, %c0_84] : memref<64x32xbf16, #tpu.memory_space<vmem>>, vector<32x32xbf16>
    %cst_85 = arith.constant dense<0.000000e+00> : vector<16x32xf32>
    %231 = tpu.matmul %229, %230, %cst_85 {dimension_numbers = #tpu.dot_dimension_numbers<[1], [0], [0], [1], [0, 0, 1, 1], [], []>} : vector<16x32xbf16>, vector<32x32xbf16>, vector<16x32xf32> -> vector<16x32xf32>
    %232 = arith.addf %210, %231 : vector<16x32xf32>
    %c0_86 = arith.constant 0 : index
    %c0_87 = arith.constant 0 : index
    %233 = vector.load %arg18[%c0_86, %c0_87] : memref<1x32xf32, #tpu.memory_space<vmem>>, vector<1x32xf32>
    %234 = vector.broadcast %233 : vector<1x32xf32> to vector<16x32xf32>
    %235 = arith.addf %232, %234 : vector<16x32xf32>
    %236 = vector.shape_cast %235 : vector<16x32xf32> to vector<2x8x32xf32>
    %cst_88 = arith.constant dense<0.000000e+00> : vector<2x32xf32>
    %237 = vector.multi_reduction <add>, %185, %cst_88 [1] : vector<2x8x32xf32> to vector<2x32xf32>
    %cst_89 = arith.constant 8.000000e+00 : f32
    %238 = vector.broadcast %cst_89 : f32 to vector<2x32xf32>
    %239 = arith.divf %237, %238 : vector<2x32xf32>
    %cst_90 = arith.constant dense<0.000000e+00> : vector<2x32xf32>
    %240 = vector.multi_reduction <add>, %236, %cst_90 [1] : vector<2x8x32xf32> to vector<2x32xf32>
    %cst_91 = arith.constant 8.000000e+00 : f32
    %241 = vector.broadcast %cst_91 : f32 to vector<2x32xf32>
    %242 = arith.divf %240, %241 : vector<2x32xf32>
    %243 = arith.addf %239, %242 : vector<2x32xf32>
    %cst_92 = arith.constant 0.000000e+00 : f32
    %244 = vector.broadcast %cst_92 : f32 to vector<2x32xf32>
    %245 = arith.maximumf %243, %244 : vector<2x32xf32>
    %246 = arith.truncf %245 : vector<2x32xf32> to vector<2x32xbf16>
    %c0_93 = arith.constant 0 : index
    %c0_94 = arith.constant 0 : index
    %247 = vector.load %arg19[%c0_93, %c0_94] : memref<32x32xbf16, #tpu.memory_space<vmem>>, vector<32x32xbf16>
    %cst_95 = arith.constant dense<0.000000e+00> : vector<2x32xf32>
    %248 = tpu.matmul %246, %247, %cst_95 {dimension_numbers = #tpu.dot_dimension_numbers<[1], [0], [0], [1], [0, 0, 1, 1], [], []>} : vector<2x32xbf16>, vector<32x32xbf16>, vector<2x32xf32> -> vector<2x32xf32>
    %cst_96 = arith.constant 0.000000e+00 : f32
    %249 = vector.broadcast %cst_96 : f32 to vector<2x32xf32>
    %250 = arith.subf %249, %248 : vector<2x32xf32>
    %251 = math.exp %250 : vector<2x32xf32>
    %cst_97 = arith.constant 1.000000e+00 : f32
    %252 = vector.broadcast %cst_97 : f32 to vector<2x32xf32>
    %253 = arith.addf %252, %251 : vector<2x32xf32>
    %254 = tpu.reciprocal %253 {approx = true} : vector<2x32xf32> -> vector<2x32xf32>
    %255 = arith.addf %185, %236 : vector<2x8x32xf32>
    %256 = vector.shape_cast %254 : vector<2x32xf32> to vector<2x1x32xf32>
    %257 = vector.broadcast %256 : vector<2x1x32xf32> to vector<2x8x32xf32>
    %258 = arith.mulf %255, %257 : vector<2x8x32xf32>
    %c0_98 = arith.constant 0 : index
    %c0_99 = arith.constant 0 : index
    %259 = vector.load %arg20[%c0_98, %c0_99] : memref<1x32xf32, #tpu.memory_space<vmem>>, vector<1x32xf32>
    %c0_100 = arith.constant 0 : index
    %c0_101 = arith.constant 0 : index
    %260 = vector.load %arg21[%c0_100, %c0_101] : memref<1x32xf32, #tpu.memory_space<vmem>>, vector<1x32xf32>
    %cst_102 = arith.constant dense<0.000000e+00> : vector<2x8xf32>
    %261 = vector.multi_reduction <add>, %258, %cst_102 [2] : vector<2x8x32xf32> to vector<2x8xf32>
    %262 = vector.shape_cast %261 : vector<2x8xf32> to vector<2x8x1xf32>
    %cst_103 = arith.constant 3.200000e+01 : f32
    %263 = vector.broadcast %cst_103 : f32 to vector<2x8x1xf32>
    %264 = arith.divf %262, %263 : vector<2x8x1xf32>
    %265 = vector.broadcast %264 : vector<2x8x1xf32> to vector<2x8x32xf32>
    %266 = arith.subf %258, %265 : vector<2x8x32xf32>
    %267 = arith.mulf %266, %266 : vector<2x8x32xf32>
    %cst_104 = arith.constant dense<0.000000e+00> : vector<2x8xf32>
    %268 = vector.multi_reduction <add>, %267, %cst_104 [2] : vector<2x8x32xf32> to vector<2x8xf32>
    %269 = vector.shape_cast %268 : vector<2x8xf32> to vector<2x8x1xf32>
    %cst_105 = arith.constant 3.200000e+01 : f32
    %270 = vector.broadcast %cst_105 : f32 to vector<2x8x1xf32>
    %271 = arith.divf %269, %270 : vector<2x8x1xf32>
    %272 = vector.broadcast %264 : vector<2x8x1xf32> to vector<2x8x32xf32>
    %273 = arith.subf %258, %272 : vector<2x8x32xf32>
    %cst_106 = arith.constant 9.99999996E-13 : f32
    %274 = vector.broadcast %cst_106 : f32 to vector<2x8x1xf32>
    %275 = arith.addf %271, %274 : vector<2x8x1xf32>
    %276 = math.rsqrt %275 : vector<2x8x1xf32>
    %277 = vector.broadcast %276 : vector<2x8x1xf32> to vector<2x8x32xf32>
    %278 = arith.mulf %273, %277 : vector<2x8x32xf32>
    %279 = vector.shape_cast %259 : vector<1x32xf32> to vector<1x1x32xf32>
    %280 = vector.broadcast %279 : vector<1x1x32xf32> to vector<2x8x32xf32>
    %281 = arith.mulf %278, %280 : vector<2x8x32xf32>
    %282 = vector.shape_cast %260 : vector<1x32xf32> to vector<1x1x32xf32>
    %283 = vector.broadcast %282 : vector<1x1x32xf32> to vector<2x8x32xf32>
    %284 = arith.addf %281, %283 : vector<2x8x32xf32>
    %285 = arith.truncf %284 : vector<2x8x32xf32> to vector<2x8x32xbf16>
    %c0_107 = arith.constant 0 : index
    %c0_108 = arith.constant 0 : index
    %c0_109 = arith.constant 0 : index
    %286 = vector.load %arg24[%c0_107, %c0_108, %c0_109] : memref<2x8x32xbf16, #tpu.memory_space<vmem>>, vector<2x8x32xbf16>
    tpu.vector_store %arg24[%c0_107, %c0_108, %c0_109], %285 {strides = array<i32>} : memref<2x8x32xbf16, #tpu.memory_space<vmem>>, vector<2x8x32xbf16>,
    return
  }
  func.func @transform_0(%arg0: i32) -> (i32, i32, i32) {
    %c0_i32 = arith.constant 0 : i32
    %c0_i32_0 = arith.constant 0 : i32
    %c0_i32_1 = arith.constant 0 : i32
    return %arg0, %c0_i32, %c0_i32_0 : i32, i32, i32
  }
  func.func @transform_1(%arg0: i32) -> (i32, i32, i32) {
    %c0_i32 = arith.constant 0 : i32
    %c0_i32_0 = arith.constant 0 : i32
    %c0_i32_1 = arith.constant 0 : i32
    return %arg0, %c0_i32, %c0_i32_0 : i32, i32, i32
  }
  func.func @transform_2(%arg0: i32) -> (i32, i32) {
    %c0_i32 = arith.constant 0 : i32
    %c0_i32_0 = arith.constant 0 : i32
    %c0_i32_1 = arith.constant 0 : i32
    return %c0_i32, %c0_i32_0 : i32, i32
  }
  func.func @transform_3(%arg0: i32) -> (i32, i32) {
    %c0_i32 = arith.constant 0 : i32
    %c0_i32_0 = arith.constant 0 : i32
    %c0_i32_1 = arith.constant 0 : i32
    return %c0_i32, %c0_i32_0 : i32, i32
  }
  func.func @transform_4(%arg0: i32) -> (i32, i32) {
    %c0_i32 = arith.constant 0 : i32
    %c0_i32_0 = arith.constant 0 : i32
    %c0_i32_1 = arith.constant 0 : i32
    return %c0_i32, %c0_i32_0 : i32, i32
  }
  func.func @transform_5(%arg0: i32) -> (i32, i32) {
    %c0_i32 = arith.constant 0 : i32
    %c0_i32_0 = arith.constant 0 : i32
    %c0_i32_1 = arith.constant 0 : i32
    return %c0_i32, %c0_i32_0 : i32, i32
  }
  func.func @transform_6(%arg0: i32) -> (i32, i32) {
    %c0_i32 = arith.constant 0 : i32
    %c0_i32_0 = arith.constant 0 : i32
    %c0_i32_1 = arith.constant 0 : i32
    return %c0_i32, %c0_i32_0 : i32, i32
  }
  func.func @transform_7(%arg0: i32) -> (i32, i32) {
    %c0_i32 = arith.constant 0 : i32
    %c0_i32_0 = arith.constant 0 : i32
    %c0_i32_1 = arith.constant 0 : i32
    return %c0_i32, %c0_i32_0 : i32, i32
  }
  func.func @transform_8(%arg0: i32) -> (i32, i32) {
    %c0_i32 = arith.constant 0 : i32
    %c0_i32_0 = arith.constant 0 : i32
    %c0_i32_1 = arith.constant 0 : i32
    return %c0_i32, %c0_i32_0 : i32, i32
  }
  func.func @transform_9(%arg0: i32) -> (i32, i32) {
    %c0_i32 = arith.constant 0 : i32
    %c0_i32_0 = arith.constant 0 : i32
    %c0_i32_1 = arith.constant 0 : i32
    return %c0_i32, %c0_i32_0 : i32, i32
  }
  func.func @transform_10(%arg0: i32) -> (i32, i32) {
    %c0_i32 = arith.constant 0 : i32
    %c0_i32_0 = arith.constant 0 : i32
    %c0_i32_1 = arith.constant 0 : i32
    return %c0_i32, %c0_i32_0 : i32, i32
  }
  func.func @transform_11(%arg0: i32) -> (i32, i32) {
    %c0_i32 = arith.constant 0 : i32
    %c0_i32_0 = arith.constant 0 : i32
    %c0_i32_1 = arith.constant 0 : i32
    return %c0_i32, %c0_i32_0 : i32, i32
  }
  func.func @transform_12(%arg0: i32) -> (i32, i32) {
    %c0_i32 = arith.constant 0 : i32
    %c0_i32_0 = arith.constant 0 : i32
    %c0_i32_1 = arith.constant 0 : i32
    return %c0_i32, %c0_i32_0 : i32, i32
  }
  func.func @transform_13(%arg0: i32) -> (i32, i32) {
    %c0_i32 = arith.constant 0 : i32
    %c0_i32_0 = arith.constant 0 : i32
    %c0_i32_1 = arith.constant 0 : i32
    return %c0_i32, %c0_i32_0 : i32, i32
  }
  func.func @transform_14(%arg0: i32) -> (i32, i32) {
    %c0_i32 = arith.constant 0 : i32
    %c0_i32_0 = arith.constant 0 : i32
    %c0_i32_1 = arith.constant 0 : i32
    return %c0_i32, %c0_i32_0 : i32, i32
  }
  func.func @transform_15(%arg0: i32) -> (i32, i32) {
    %c0_i32 = arith.constant 0 : i32
    %c0_i32_0 = arith.constant 0 : i32
    %c0_i32_1 = arith.constant 0 : i32
    return %c0_i32, %c0_i32_0 : i32, i32
  }
  func.func @transform_16(%arg0: i32) -> (i32, i32) {
    %c0_i32 = arith.constant 0 : i32
    %c0_i32_0 = arith.constant 0 : i32
    %c0_i32_1 = arith.constant 0 : i32
    return %c0_i32, %c0_i32_0 : i32, i32
  }
  func.func @transform_17(%arg0: i32) -> (i32, i32) {
    %c0_i32 = arith.constant 0 : i32
    %c0_i32_0 = arith.constant 0 : i32
    %c0_i32_1 = arith.constant 0 : i32
    return %c0_i32, %c0_i32_0 : i32, i32
  }
  func.func @transform_18(%arg0: i32) -> (i32, i32) {
    %c0_i32 = arith.constant 0 : i32
    %c0_i32_0 = arith.constant 0 : i32
    %c0_i32_1 = arith.constant 0 : i32
    return %c0_i32, %c0_i32_0 : i32, i32
  }
  func.func @transform_19(%arg0: i32) -> (i32, i32) {
    %c0_i32 = arith.constant 0 : i32
    %c0_i32_0 = arith.constant 0 : i32
    %c0_i32_1 = arith.constant 0 : i32
    return %c0_i32, %c0_i32_0 : i32, i32
  }
  func.func @transform_20(%arg0: i32) -> (i32, i32) {
    %c0_i32 = arith.constant 0 : i32
    %c0_i32_0 = arith.constant 0 : i32
    %c0_i32_1 = arith.constant 0 : i32
    return %c0_i32, %c0_i32_0 : i32, i32
  }
  func.func @transform_21(%arg0: i32) -> (i32, i32) {
    %c0_i32 = arith.constant 0 : i32
    %c0_i32_0 = arith.constant 0 : i32
    %c0_i32_1 = arith.constant 0 : i32
    return %c0_i32, %c0_i32_0 : i32, i32
  }
  func.func @transform_22(%arg0: i32) -> (i32, i32) {
    %c0_i32 = arith.constant 0 : i32
    %c0_i32_0 = arith.constant 0 : i32
    %c0_i32_1 = arith.constant 0 : i32
    return %c0_i32, %c0_i32_0 : i32, i32
  }
  func.func @transform_23(%arg0: i32) -> (i32, i32, i32) {
    %c0_i32 = arith.constant 0 : i32
    %c0_i32_0 = arith.constant 0 : i32
    %c0_i32_1 = arith.constant 0 : i32
    return %arg0, %c0_i32, %c0_i32_0 : i32, i32, i32
  }
}

</mosaic_0001>

<bundles_post_ra>
// kernel: tpu_custom_call.1
= control target key start
LH: loop header
LB: loop body
LE: loop exit
PB: predicated region body
PF: predicated region fallthrough
CT: control target
= control target key end

     0   :  { %s2492_s0 = inlined_call_operand.hbm [shape: bf16[2,8,32], index: 0, kind: input, shape index: {}]   ;;  %s2493_s1 = inlined_call_operand.hbm [shape: f32[2,1,8], index: 1, kind: input, shape index: {}]   ;;  %s2494_s2 = inlined_call_operand.hbm [shape: f32[1,32], index: 2, kind: input, shape index: {}]   ;;  %s2495_s3 = inlined_call_operand.hbm [shape: f32[1,32], index: 3, kind: input, shape index: {}]   ;;  %s2496_s4 = inlined_call_operand.vmem [shape: bf16[32,32], index: 4, kind: input, shape index: {}]   ;;  %s2497_s5 = inlined_call_operand.hbm [shape: f32[1,32], index: 5, kind: input, shape index: {}]   ;;  %s2498_s6 = inlined_call_operand.vmem [shape: bf16[32,32], index: 6, kind: input, shape index: {}]   ;;  %s2499_s7 = inlined_call_operand.hbm [shape: f32[1,32], index: 7, kind: input, shape index: {}]   ;;  %s2500_s8 = inlined_call_operand.vmem [shape: bf16[32,32], index: 8, kind: input, shape index: {}]   ;;  %s2501_s9 = inlined_call_operand.hbm [shape: f32[1,32], index: 9, kind: input, shape index: {}]   ;;  %s2502_s10 = inlined_call_operand.hbm [shape: bf16[32,32], index: 10, kind: input, shape index: {}]   ;;  %s2503_s11 = inlined_call_operand.hbm [shape: f32[1,32], index: 11, kind: input, shape index: {}]   ;;  %s2504_s12 = inlined_call_operand.hbm [shape: f32[1,32], index: 12, kind: input, shape index: {}]   ;;  %s2505_s13 = inlined_call_operand.hbm [shape: f32[1,32], index: 13, kind: input, shape index: {}]   ;;  %s2506_s14 = inlined_call_operand.hbm [shape: bf16[32,64], index: 14, kind: input, shape index: {}]   ;;  %s2507_s15 = inlined_call_operand.hbm [shape: f32[1,64], index: 15, kind: input, shape index: {}]   ;;  %s2508_s16 = inlined_call_operand.vmem [shape: bf16[64,32], index: 16, kind: input, shape index: {}]   ;;  %s2509_s17 = inlined_call_operand.hbm [shape: f32[1,32], index: 17, kind: input, shape index: {}]   ;;  %s2510_s18 = inlined_call_operand.vmem [shape: bf16[32,32], index: 18, kind: input, shape index: {}]   ;;  %s2511_s19 = inlined_call_operand.vmem [shape: f32[1,32], index: 19, kind: input, shape index: {}]   ;;  %s2512_s20 = inlined_call_operand.vmem [shape: f32[1,32], index: 20, kind: input, shape index: {}]   ;;  %s2513_s21 = inlined_call_operand.hbm [shape: bf16[32,128], index: 21, kind: input, shape index: {}]   ;;  %s2514_s22 = inlined_call_operand.vmem [shape: f32[1,128], index: 22, kind: input, shape index: {}]   ;;  %s2515_s23 = inlined_call_operand.hbm [shape: bf16[2,8,32], index: 23, kind: output, shape index: {}]  }
   0x1   :  { %2518 = sst [smem:[#allocation36_spill]] %s2492_s0 }
   0x2   :  { %2519 = sst [smem:[#allocation37_spill]] %s2493_s1 }
   0x3   :  { %2520 = sst [smem:[#allocation38_spill]] %s2494_s2 }
   0x4   :  { %2521 = sst [smem:[#allocation39_spill]] %s2495_s3 }
   0x5   :  { %2522 = sst [smem:[#allocation40_spill]] %s2496_s4 }
   0x6   :  { %2523 = sst [smem:[#allocation41_spill]] %s2497_s5 }
   0x7   :  { %2524 = sst [smem:[#allocation42_spill]] %s2498_s6 }
   0x8   :  { %2525 = sst [smem:[#allocation43_spill]] %s2499_s7 }
   0x9   :  { %2526 = sst [smem:[#allocation44_spill]] %s2512_s20 }
   0xa   :  { %2527 = sst [smem:[#allocation45_spill]] %s2515_s23 }
   0xb   :  { %28 = vsyncpa [#allocation3], 0 }
   0xc   :  { %29 = vsyncpa [#allocation6], 0 }
   0xd   :  { %30 = vsyncpa [#allocation9], 0 }
   0xe   :  { %31 = vsyncpa [#allocation12], 0 }
   0xf   :  { %32 = vsyncpa [#allocation15], 0 }
  0x10   :  { %33 = vsyncpa [#allocation18], 0 }
  0x11   :  { %34 = vsyncpa [#allocation21], 0 }
  0x12   :  { %35 = vsyncpa [#allocation24], 0  ;;  %s2528_s24 = sld [smem:[#allocation37_spill]] }
  0x18   :  { %s54_s25 = sshll.u32 %s2528_s24, 4  ;;  %s55_s25 = int_to_ptr.hbm [resolvable:$true] %s54_s25 }
  0x19   :  { %36 = vsyncpa [#allocation4], 0  ;;  %s2050_s5 = smov [#allocation5]   ;;  %s2529_s2 = sld [smem:[#allocation39_spill]] }
  0x1a   :  { %s56_s1 = sshll.u32 %s2050_s5, 4  ;;  %s2051_s27 = smov 16   ;;  %s57_s1 = int_to_ptr.vmem [resolvable:$true] %s56_s1 }
  0x1b   :  { %s2052_s7 = smov 1   ;;  %s2053_s28 = smov [#allocation8]  }
  0x1c   :  { %62 = dma.hbm_to_vmem [thread:$0]  %s55_s25, 32, %s57_s1, [#allocation6], %s2051_s27, %s2051_s27, %s2052_s7  }
  0x1d   :  { %s81_s29 = sshll.u32 %s2053_s28, 4  ;;  %s2530_s23 = sld [smem:[#allocation43_spill]]  ;;  %s82_s29 = int_to_ptr.vmem [resolvable:$true] %s81_s29 }
  0x1e   :  { %s2054_s30 = smov [#allocation11]   ;;  %s128_s22 = sshll.u32 %s2502_s10, 4  ;;  %s129_s22 = int_to_ptr.hbm [resolvable:$true] %s128_s22 }
  0x1f   :  { %s79_s6 = sshll.u32 %s2529_s2, 4  ;;  %s107_s24 = sshll.u32 %s2054_s30, 4  ;;  %s80_s6 = int_to_ptr.hbm [resolvable:$true] %s79_s6  ;;  %s108_s24 = int_to_ptr.vmem [resolvable:$true] %s107_s24 }
  0x20   :  { %84 = dma.hbm_to_vmem [thread:$0]  %s80_s6, 16, %s82_s29, [#allocation9]  }
  0x21   :  { %s2055_s25 = smov [#allocation14]   ;;  %s153_s27 = sshll.u32 %s2504_s12, 4  ;;  %s154_s27 = int_to_ptr.hbm [resolvable:$true] %s153_s27 }
  0x22   :  { %s130_s1 = sshll.u32 %s2055_s25, 4  ;;  %s2057_s7 = smov 4   ;;  %s131_s1 = int_to_ptr.vmem [resolvable:$true] %s130_s1 }
  0x23   :  { %s105_s4 = sshll.u32 %s2530_s23, 4  ;;  %s2056_s23 = smov 64   ;;  %s106_s4 = int_to_ptr.hbm [resolvable:$true] %s105_s4 }
  0x24   :  { %110 = dma.hbm_to_vmem [thread:$0]  %s106_s4, 16, %s108_s24, [#allocation12]  }
  0x25   :  { %136 = dma.hbm_to_vmem [thread:$0]  %s129_s22, 256, %s131_s1, [#allocation15], %s2056_s23, %s2056_s23, %s2057_s7  }
  0x26   :  { %s174_s10 = sshll.u32 %s2506_s14, 4  ;;  %s2058_s20 = smov [#allocation17]   ;;  %s175_s10 = int_to_ptr.hbm [resolvable:$true] %s174_s10 }
  0x27   :  { %s155_s29 = sshll.u32 %s2058_s20, 4  ;;  %s2059_s3 = smov [#allocation20]   ;;  %s156_s29 = int_to_ptr.vmem [resolvable:$true] %s155_s29 }
  0x28   :  { %158 = dma.hbm_to_vmem [thread:$0]  %s154_s27, 16, %s156_s29, [#allocation18]  }
  0x29   :  { %s176_s0 = sshll.u32 %s2059_s3, 4  ;;  %s201_s30 = sshll.u32 %s2509_s17, 4  ;;  %s177_s0 = int_to_ptr.vmem [resolvable:$true] %s176_s0  ;;  %s202_s30 = int_to_ptr.hbm [resolvable:$true] %s201_s30 }
  0x2a   :  { %182 = dma.hbm_to_vmem [thread:$0]  %s175_s10, 256, %s177_s0, [#allocation21], %s2056_s23, %s2056_s23, %s2057_s7  }
  0x2b   :  { %s2531_s14 = sld [smem:[#allocation36_spill]]  ;;  %s2060_s25 = smov [#allocation23]  }
  0x2c   :  { %s203_s1 = sshll.u32 %s2060_s25, 4  ;;  %s2061_s26 = smov [#allocation2]   ;;  %s204_s1 = int_to_ptr.vmem [resolvable:$true] %s203_s1 }
  0x2d   :  { %206 = dma.hbm_to_vmem [thread:$0]  %s202_s30, 16, %s204_s1, [#allocation24]  }
  0x2e   :  { %s43_s2 = sshll.u32 %s2061_s26, 4  ;;  %s2532_s17 = sld [smem:[#allocation38_spill]]  ;;  %s44_s2 = int_to_ptr.vmem [resolvable:$true] %s43_s2 }
  0x2f   :  { %s2533_s29 = sld [smem:[#allocation41_spill]]  ;;  %s2062_s0 = smov [#allocation7]  }
  0x30   :  { %s70_s12 = sshll.u32 %s2062_s0, 4  ;;  %s2063_s4 = smov [#allocation10]   ;;  %s71_s12 = int_to_ptr.vmem [resolvable:$true] %s70_s12 }
  0x31   :  { %s41_s22 = sshll.u32 %s2531_s14, 4  ;;  %s94_s30 = sshll.u32 %s2063_s4, 4  ;;  %s42_s22 = int_to_ptr.hbm [resolvable:$true] %s41_s22  ;;  %s95_s30 = int_to_ptr.vmem [resolvable:$true] %s94_s30 }
  0x32   :  { %49 = dma.hbm_to_vmem [thread:$0]  %s42_s22, 128, %s44_s2, [#allocation3], %s2056_s23, %s2056_s23, %s2057_s7  }
  0x33   :  { %s118_s14 = sshll.u32 %s2501_s9, 4  ;;  %s142_s1 = sshll.u32 %s2503_s11, 4  ;;  %s119_s14 = int_to_ptr.hbm [resolvable:$true] %s118_s14  ;;  %s143_s1 = int_to_ptr.hbm [resolvable:$true] %s142_s1 }
  0x34   :  { %s68_s28 = sshll.u32 %s2532_s17, 4  ;;  %s2064_s26 = smov [#allocation13]   ;;  %s69_s28 = int_to_ptr.hbm [resolvable:$true] %s68_s28 }
  0x35   :  { %s92_s3 = sshll.u32 %s2533_s29, 4  ;;  %s120_s2 = sshll.u32 %s2064_s26, 4  ;;  %s93_s3 = int_to_ptr.hbm [resolvable:$true] %s92_s3  ;;  %s121_s2 = int_to_ptr.vmem [resolvable:$true] %s120_s2 }
  0x36   :  { %73 = dma.hbm_to_vmem [thread:$0]  %s69_s28, 16, %s71_s12, [#allocation6]  }
  0x37   :  { %97 = dma.hbm_to_vmem [thread:$0]  %s93_s3, 16, %s95_s30, [#allocation9]  }
  0x38   :  { %123 = dma.hbm_to_vmem [thread:$0]  %s119_s14, 16, %s121_s2, [#allocation12]  }
  0x39   :  { %s2065_s27 = smov [#allocation16]   ;;  %s164_s10 = sshll.u32 %s2505_s13, 4  ;;  %s165_s10 = int_to_ptr.hbm [resolvable:$true] %s164_s10 }
  0x3a   :  { %s144_s6 = sshll.u32 %s2065_s27, 4  ;;  %s188_s29 = sshll.u32 %s2507_s15, 4  ;;  %s145_s6 = int_to_ptr.vmem [resolvable:$true] %s144_s6  ;;  %s189_s29 = int_to_ptr.hbm [resolvable:$true] %s188_s29 }
  0x3b   :  { %147 = dma.hbm_to_vmem [thread:$0]  %s143_s1, 16, %s145_s6, [#allocation15]  }
  0x3c   :  { %s2066_s3 = smov [#allocation19]   ;;  %s2067_s0 = smov [#allocation22]  }
  0x3d   :  { %s166_s11 = sshll.u32 %s2066_s3, 4  ;;  %s190_s12 = sshll.u32 %s2067_s0, 4  ;;  %s167_s11 = int_to_ptr.vmem [resolvable:$true] %s166_s11  ;;  %s191_s12 = int_to_ptr.vmem [resolvable:$true] %s190_s12 }
  0x3e   :  { %169 = dma.hbm_to_vmem [thread:$0]  %s165_s10, 16, %s167_s11, [#allocation18]  }
  0x3f   :  { %s217_s24 = sshll.u32 %s2513_s21, 4  ;;  %s2068_s13 = smov [#allocation25]   ;;  %s218_s24 = int_to_ptr.hbm [resolvable:$true] %s217_s24 }
  0x40   :  { %193 = dma.hbm_to_vmem [thread:$0]  %s189_s29, 16, %s191_s12, [#allocation21]  }
  0x41   :  { %s219_s5 = sshll.u32 %s2068_s13, 4  ;;  %s220_s5 = int_to_ptr.vmem [resolvable:$true] %s219_s5 }
  0x42   :  { %225 = dma.hbm_to_vmem [thread:$0]  %s218_s24, 256, %s220_s5, [#allocation24], %s2056_s23, %s2056_s23, %s2057_s7  }
  0x43   :  { %2032 = dma.done.wait [#allocation3], 128  }
  0x44   :  { %2033 = vsyncadd [#allocation3], 4294967168 }
  0x45   :  { %2034 = dma.done.wait [#allocation6], 48  }
  0x46   :  { %2035 = vsyncadd [#allocation6], 4294967248 }
  0x47   :  { %2036 = dma.done.wait [#allocation9], 32  }
  0x48   :  { %2037 = vsyncadd [#allocation9], 4294967264 }
  0x49   :  { %2038 = dma.done.wait [#allocation12], 32  }
  0x4a   :  { %2039 = vsyncadd [#allocation12], 4294967264 }
  0x4b   :  { %2040 = dma.done.wait [#allocation15], 272  }
  0x4c   :  { %2041 = vsyncadd [#allocation15], 4294967024 }
  0x4d   :  { %2042 = dma.done.wait [#allocation18], 32  }
  0x4e   :  { %2043 = vsyncadd [#allocation18], 4294967264 }
  0x4f   :  { %2044 = dma.done.wait [#allocation21], 272  }
  0x50   :  { %2045 = vsyncadd [#allocation21], 4294967024 }
  0x51   :  { %2046 = dma.done.wait [#allocation24], 272  }
  0x52   :  { %2047 = vsyncadd [#allocation24], 4294967024  ;;  %v1545_v0 = vld [vmem:[#allocation2] sm:$0xff]   ;;  %vm295_vm0 = vcmask 261120   ;;  %v2069_v5 = vmov 32.0   ;;  %s2534_s14 = sld [smem:[#allocation40_spill]] }
  0x53   :  { %v1546_v1 = vunpack.c.l.bf16 %v1545_v0  ;;  %v1547_v3 = vunpack.c.h.bf16 %v1545_v0  ;;  %1588 = vrcp.f32 %v2069_v5  ;;  %s2535_s1 = sld [smem:[#allocation42_spill]]  ;;  %v1535_v24 = vld [vmem:[%s2500_s8 + $0x8] sm:$0xff]  ;;  %v1534_v29 = vld [vmem:[%s2500_s8] sm:$0xff]  ;;  %v1577_v57 = vld [vmem:[#allocation11] ss:$0 sm:$0xff]  ;;  %vm481_vm8 = vcmask 64512  }
  0x54   :  { %455 = vmatpush.bf16.msra.mxu2 %v1535_v24  ;;  %v1574_v47 = vld [vmem:[#allocation7] ss:$0 sm:$0xff]  ;;  %v1575_v52 = vld [vmem:[#allocation8] ss:$0 sm:$0xff]  ;;  %v1576_v58 = vld [vmem:[#allocation10] ss:$0 sm:$0xff] }
  0x55   :  { %v296_v2 = vsel %vm295_vm0, %v1546_v1, 0.0  ;;  %v299_v4 = vsel %vm295_vm0, %v1547_v3, 0.0  ;;  %v1578_v0 = vld [vmem:[#allocation13] ss:$0 sm:$0xff]  ;;  %s2070_s8 = smov 120   ;;  %vm547_vm9 = vcmask 1043456  }
  0x56   :  { %297 = vadd.xlane.f32.xlu0 %v296_v2  ;;  %s2071_s20 = smov 112   ;;  %s2072_s29 = smov 104  }
  0x57   :  { %s2073_s3 = smov 96   ;;  %s2536_s26 = sld [smem:[#allocation44_spill]] }
  0x58   :  { %v1531_v22 = vld [vmem:[%s2534_s14 + $0x8] sm:$0xff]  ;;  %v1530_v26 = vld [vmem:[%s2534_s14] sm:$0xff]  ;;  %456 = vmatpush.bf16.msra.mxu2 %v1534_v29  ;;  %s2075_s2 = smov [#allocation26]   ;;  %s2537_s17 = sld [smem:[#allocation45_spill]] }
  0x59   :  { %v1589_v6 = vpop.eup %1588  ;;  %v1533_v23 = vld [vmem:[%s2535_s1 + $0x8] sm:$0xff]  ;;  %387 = vmatpush.bf16.msra.mxu0 %v1531_v22  ;;  %v1532_v27 = vld [vmem:[%s2535_s1] sm:$0xff]  ;;  %s1424_s27 = sshll.u32 %s2075_s2, 4  ;;  %s1425_s27 = int_to_ptr.vmem [resolvable:$true] %s1424_s27 }
  0x5a   :  { %v303_v7 = vmul.f32 32.0, %v1589_v6  ;;  %vm307_vm1 = vweird.f32 %v1589_v6  ;;  %421 = vmatpush.bf16.msra.mxu1 %v1533_v23 }
  0x5c   :  { %v304_v8 = vsub.f32 1.0, %v303_v7 }
  0x5d   :  { %388 = vmatpush.bf16.msra.mxu0 %v1530_v26 }
  0x5e   :  { %300 = vadd.xlane.f32.xlu0 %v299_v4  ;;  %v305_v9 = vmul.f32 %v1589_v6, %v304_v8  ;;  %422 = vmatpush.bf16.msra.mxu1 %v1532_v27  ;;  %s1426_s28 = sshll.u32 %s2537_s17, 4  ;;  %s1427_s28 = int_to_ptr.hbm [resolvable:$true] %s1426_s28 }
  0x60   :  { %v306_v10 = vadd.f32 %v1589_v6, %v305_v9 }
  0x62   :  { %v2255_v11 = vsel %vm307_vm1, %v1589_v6, %v306_v10 }
  0xc9   :  { %v298_v12 = vpop.xlane.xlu0 %297 }
  0xca   :  { %v309_v13 = vmul.f32 %v2255_v11, %v298_v12 }
  0xcc   :  { %v311_v14 = vsub.f32 %v1546_v1, %v309_v13 }
  0xce   :  { %v313_v15 = vmul.f32 %v311_v14, %v311_v14 }
  0xd0   :  { %v315_v16 = vsel %vm295_vm0, %v313_v15, 0.0 }
  0xd1   :  { %316 = vadd.xlane.f32.xlu1 %v315_v16  ;;  %v301_v17 = vpop.xlane.xlu0 %300 }
  0xd2   :  { %v310_v18 = vmul.f32 %v2255_v11, %v301_v17 }
  0xd4   :  { %v312_v19 = vsub.f32 %v1547_v3, %v310_v18 }
  0xd6   :  { %v314_v20 = vmul.f32 %v312_v19, %v312_v19 }
  0xd8   :  { %v318_v21 = vsel %vm295_vm0, %v314_v20, 0.0 }
  0xd9   :  { %319 = vadd.xlane.f32.xlu1 %v318_v21 }
 0x144   :  { %v317_v25 = vpop.xlane.xlu1 %316 }
 0x145   :  { %v321_v28 = vmul.f32 %v317_v25, %v2255_v11 }
 0x147   :  { %v323_v30 = vadd.f32 1e-12, %v321_v28 }
 0x149   :  { %1590 = vrsqrt.f32 %v323_v30  ;;  %vm331_vm3 = vweird.f32 %v323_v30 }
 0x14c   :  { %v320_v31 = vpop.xlane.xlu1 %319 }
 0x14d   :  { %v322_v32 = vmul.f32 %v320_v31, %v2255_v11 }
 0x14f   :  { %v1591_v33 = vpop.eup %1590  ;;  %v324_v34 = vadd.f32 1e-12, %v322_v32 }
 0x150   :  { %v326_v35 = vmul.f32 %v1591_v33, %v323_v30  ;;  %vm332_vm2 = vweird.f32 %v1591_v33 }
 0x151   :  { %1592 = vrsqrt.f32 %v324_v34  ;;  %vm333_vm4 = vmor %vm331_vm3, %vm332_vm2  ;;  %vm341_vm6 = vweird.f32 %v324_v34  ;;  %vm1313_vm2 = vcmask 1041409  }
 0x152   :  { %v327_v36 = vmul.f32 %v1591_v33, %v326_v35 }
 0x154   :  { %v328_v37 = vmul.f32 0.5, %v327_v36 }
 0x156   :  { %v329_v38 = vsub.f32 1.5, %v328_v37 }
 0x157   :  { %v1593_v39 = vpop.eup %1592 }
 0x158   :  { %v330_v40 = vmul.f32 %v1591_v33, %v329_v38  ;;  %v336_v41 = vmul.f32 %v1593_v39, %v324_v34  ;;  %vm342_vm5 = vweird.f32 %v1593_v39 }
 0x159   :  { %vm343_vm7 = vmor %vm341_vm6, %vm342_vm5 }
 0x15a   :  { %v337_v42 = vmul.f32 %v1593_v39, %v336_v41  ;;  %v334_v43 = vsel %vm333_vm4, %v1591_v33, %v330_v40  ;;  %v2322_v33 = vld [vmem:[#allocation5] ss:$0 sm:$0xff] }
 0x15b   :  { %v345_v46 = vmul.f32 %v334_v43, %v311_v14 }
 0x15c   :  { %v338_v44 = vmul.f32 0.5, %v337_v42 }
 0x15d   :  { %v350_v51 = vmul.f32 %v1574_v47, %v345_v46 }
 0x15e   :  { %v339_v45 = vsub.f32 1.5, %v338_v44 }
 0x15f   :  { %v2281_v54 = vadd.f32 %v1575_v52, %v350_v51  ;;  %v2331_v51 = vld [vmem:[#allocation5 + $0x1] ss:$0 sm:$0xff] }
 0x160   :  { %v340_v48 = vmul.f32 %v1593_v39, %v339_v45 }
 0x162   :  { %v344_v49 = vsel %vm343_vm7, %v1593_v39, %v340_v48 }
 0x163   :  { %v346_v50 = vmul.f32 %v344_v49, %v312_v19 }
 0x165   :  { %v351_v53 = vmul.f32 %v1574_v47, %v346_v50 }
 0x167   :  { %v2283_v55 = vadd.f32 %v1575_v52, %v351_v53 }
 0x169   :  { %v357_v56 = vpack.c.bf16 %v2283_v55, %v2281_v54 }
 0x16b   :  { %1454 = vmatmul.msk.bf16.vlgmr.msra.gmra.mxu0 %vm295_vm0, %v357_v56  ;;  %1463 = vmatmul.msk.bf16.vlgmr.msra.gmra.mxu1 %vm295_vm0, %v357_v56 }
 0x16c   :  { %1472 = vmatmul.msk.bf16.vlgmr.msra.gmra.mxu2 %vm295_vm0, %v357_v56 }
 0x1e8   :  { %v390_v59 = vpop.f32.mrf.mxu0  ;;  %v424_v60 = vpop.f32.mrf.mxu1 }
 0x1e9   :  { %v425_v61 = vadd.f32 %v1577_v57, %v424_v60  ;;  %v391_v63 = vadd.f32 %v1576_v58, %v390_v59 }
 0x1eb   :  { %v465_v62 = vpack.c.bf16 %v425_v61, %v425_v61  ;;  %v463_v5 = vpack.c.bf16 %v391_v63, %v391_v63 }
 0x1ed   :  { %v590_v1 = vunpack.c.l.b16 %v465_v62  ;;  %v486_v2 = vsel %vm481_vm8, %v465_v62, 0  ;;  %v585_v15 = vunpack.c.l.b16 %v463_v5 }
 0x1ee   :  { %495 = vmatpush.bf16.xpose.msra.mxu3 %v486_v2 }
 0x1ef   :  { %v2291_v3 = vpack.c.b16 %v590_v1, %v590_v1  ;;  %v458_v4 = vpop.f32.mrf.mxu2  ;;  %v2305_v23 = vpack.c.b16 %v585_v15, %v585_v15 }
 0x1f0   :  { %v459_v6 = vadd.f32 %v1578_v0, %v458_v4  ;;  %v392_v7 = vpop.f32.mrf.mxu0  ;;  %v426_v8 = vpop.f32.mrf.mxu1 }
 0x1f1   :  { %v393_v9 = vadd.f32 %v1576_v58, %v392_v7  ;;  %v427_v10 = vadd.f32 %v1577_v57, %v426_v8  ;;  %592 = vrot.lane.b32.xlu2 %v2291_v3, %s2070_s8 }
 0x1f2   :  { %v2295_v12 = vpack.c.bf16 %v459_v6, %v459_v6 }
 0x1f3   :  { %v464_v13 = vpack.c.bf16 %v393_v9, %v393_v9  ;;  %v466_v14 = vpack.c.bf16 %v427_v10, %v427_v10 }
 0x1f4   :  { %v549_v16 = vsel %vm547_vm9, %v2295_v12, 0  ;;  %v667_v61 = vunpack.c.l.b16 %v2295_v12 }
 0x1f5   :  { %v614_v17 = vunpack.c.l.b16 %v464_v13  ;;  %v619_v18 = vunpack.c.l.b16 %v466_v14  ;;  %558 = vmatpush.bf16.msrb.mxu1 %v549_v16  ;;  %1473 = vmatmul.msk.bf16.vlgmr.msra.gmra.mxu3 %vm481_vm8, %v463_v5  ;;  %v505_v19 = vsel %vm481_vm8, %v466_v14, 0 }
 0x1f6   :  { %514 = vmatpush.bf16.xpose.msrb.mxu0 %v505_v19  ;;  %v2341_v63 = vpack.c.b16 %v667_v61, %v667_v61 }
 0x1f7   :  { %v2301_v20 = vpack.c.b16 %v614_v17, %v614_v17  ;;  %v2303_v21 = vpack.c.b16 %v619_v18, %v619_v18  ;;  %v460_v22 = vpop.f32.mrf.mxu2 }
 0x1f8   :  { %v461_v24 = vadd.f32 %v1578_v0, %v460_v22 }
 0x1f9   :  { %621 = vrot.lane.b32.xlu0 %v2303_v21, %s2070_s8  ;;  %616 = vrot.lane.b32.xlu1 %v2301_v20, %s2070_s8 }
 0x1fa   :  { %v2311_v25 = vpack.c.bf16 %v461_v24, %v461_v24  ;;  %587 = vrot.lane.b32.xlu2 %v2305_v23, %s2070_s8 }
 0x1fc   :  { %v568_v26 = vsel %vm547_vm9, %v2311_v25, 0 }
 0x1fd   :  { %577 = vmatpush.bf16.msrb.mxu2 %v568_v26  ;;  %1474 = vmatmul.msk.bf16.vlgmr.msrb.gmra.mxu0 %vm481_vm8, %v464_v13  ;;  %v691_v13 = vunpack.c.l.b16 %v2311_v25 }
 0x1ff   :  { %v2350_v14 = vpack.c.b16 %v691_v13, %v691_v13 }
 0x24b   :  { %v593_v27 = vpop.permute.xlu2 %592 }
 0x24c   :  { %v598_v28 = vsel %vm481_vm8, %v593_v27, 0 }
 0x24d   :  { %607 = vmatpush.bf16.xpose.msrb.mxu3 %v598_v28 }
 0x254   :  { %v588_v29 = vpop.permute.xlu2 %587 }
 0x255   :  { %1477 = vmatmul.msk.bf16.vlgmr.msrb.gmra.mxu3 %vm481_vm8, %v588_v29 }
 0x26b   :  { %v622_v30 = vpop.permute.xlu0 %621  ;;  %v617_v32 = vpop.permute.xlu1 %616 }
 0x26c   :  { %v627_v31 = vsel %vm481_vm8, %v622_v30, 0 }
 0x26d   :  { %636 = vmatpush.bf16.xpose.msra.mxu0 %v627_v31 }
 0x274   :  { %1478 = vmatmul.msk.bf16.vlgmr.msra.gmra.mxu0 %vm481_vm8, %v617_v32 }
 0x278   :  { %v497_v34 = vpop.f32.mrf.mxu3 }
 0x279   :  { %v498_v35 = vadd.f32 %v2322_v33, %v497_v34 }
 0x27a   :  { %v516_v36 = vpop.f32.mrf.mxu0 }
 0x27b   :  { %v520_v37 = vsel %vm481_vm8, %v498_v35, -inf  ;;  %v517_v8 = vadd.f32 %v2331_v51, %v516_v36 }
 0x27c   :  { %521 = vmax.xlane.f32.xlu2 %v520_v37 }
 0x27d   :  { %v523_v9 = vsel %vm481_vm8, %v517_v8, -inf }
 0x280   :  { %v499_v38 = vpop.f32.mrf.mxu3 }
 0x282   :  { %v518_v39 = vpop.f32.mrf.mxu0 }
 0x2d8   :  { %v609_v40 = vpop.f32.mrf.mxu3 }
 0x2d9   :  { %v610_v41 = vadd.f32 %v2322_v33, %v609_v40 }
 0x2db   :  { %v642_v42 = vsel %vm481_vm8, %v610_v41, -inf }
 0x2dc   :  { %643 = vmax.xlane.f32.xlu0 %v642_v42 }
 0x2e0   :  { %v611_v43 = vpop.f32.mrf.mxu3 }
 0x2ef   :  { %v522_v44 = vpop.xlane.xlu2 %521 }
 0x2f0   :  { %757 = vrot.lane.b32.xlu0 %v2291_v3, %s2071_s20  ;;  %v526_v45 = vsub.f32 %v498_v35, %v522_v44 }
 0x2f1   :  { %v638_v46 = vpop.f32.mrf.mxu0 }
 0x2f2   :  { %v528_v47 = vmul.f32 1.442695, %v526_v45  ;;  %v639_v52 = vadd.f32 %v2331_v51, %v638_v46 }
 0x2f4   :  { %1594 = vpow2.f32 %v528_v47  ;;  %v645_v53 = vsel %vm481_vm8, %v639_v52, -inf }
 0x2f9   :  { %v640_v48 = vpop.f32.mrf.mxu0 }
 0x2fa   :  { %v1595_v49 = vpop.eup %1594 }
 0x2fb   :  { %v532_v50 = vsel %vm481_vm8, %v1595_v49, 0.0 }
 0x2fc   :  { %533 = vadd.xlane.f32.xlu1 %v532_v50 }
 0x315   :  { %755 = vrot.lane.b32.xlu1 %v2305_v23, %s2071_s20 }
 0x31a   :  { %646 = vmax.xlane.f32.xlu0 %v645_v53 }
 0x32e   :  { %780 = vrot.lane.b32.xlu0 %v2303_v21, %s2071_s20 }
 0x34f   :  { %v644_v56 = vpop.xlane.xlu0 %643 }
 0x350   :  { %v648_v57 = vsub.f32 %v610_v41, %v644_v56 }
 0x352   :  { %v650_v58 = vmul.f32 1.442695, %v648_v57 }
 0x354   :  { %1596 = vpow2.f32 %v650_v58 }
 0x35a   :  { %v1597_v59 = vpop.eup %1596 }
 0x35b   :  { %v654_v60 = vsel %vm481_vm8, %v1597_v59, 0.0 }
 0x35c   :  { %655 = vadd.xlane.f32.xlu2 %v654_v60 }
 0x362   :  { %v758_v4 = vpop.permute.xlu0 %757 }
 0x363   :  { %v763_v22 = vsel %vm481_vm8, %v758_v4, 0 }
 0x36f   :  { %v534_v62 = vpop.xlane.xlu1 %533 }
 0x370   :  { %1598 = vrcp.f32 %v534_v62 }
 0x374   :  { %669 = vrot.lane.b32.xlu2 %v2341_v63, %s2070_s8 }
 0x376   :  { %v1599_v0 = vpop.eup %1598 }
 0x377   :  { %v540_v1 = vmul.f32 %v1599_v0, %v1595_v49 }
 0x379   :  { %v542_v2 = vpack.c.bf16 %v540_v1, %v540_v1 }
 0x37b   :  { %1475 = vmatmul.msk.bf16.vlgmr.msrb.gmra.mxu1 %vm481_vm8, %v542_v2  ;;  %v471_v2 = vld [vmem:[#allocation14] sm:$0xf] }
 0x37c   :  { %v739_v4 = vsel %vm547_vm9, %v471_v2, 0 }
 0x37d   :  { %748 = vmatpush.bf16.msrb.mxu0 %v739_v4 }
 0x387   :  { %v756_v25 = vpop.permute.xlu1 %755 }
 0x38d   :  { %v647_v5 = vpop.xlane.xlu0 %646 }
 0x38e   :  { %v649_v6 = vsub.f32 %v639_v52, %v647_v5 }
 0x390   :  { %v652_v7 = vmul.f32 1.442695, %v649_v6 }
 0x392   :  { %1600 = vpow2.f32 %v652_v7 }
 0x398   :  { %v1601_v10 = vpop.eup %1600 }
 0x399   :  { %v657_v12 = vsel %vm481_vm8, %v1601_v10, 0.0 }
 0x39d   :  { %524 = vmax.xlane.f32.xlu2 %v523_v9 }
 0x3a0   :  { %v781_v45 = vpop.permute.xlu0 %780 }
 0x3a1   :  { %v786_v47 = vsel %vm481_vm8, %v781_v45, 0 }
 0x3a5   :  { %658 = vadd.xlane.f32.xlu2 %v657_v12 }
 0x3bd   :  { %693 = vrot.lane.b32.xlu2 %v2350_v14, %s2070_s8 }
 0x3cf   :  { %v656_v15 = vpop.xlane.xlu2 %655 }
 0x3d0   :  { %1602 = vrcp.f32 %v656_v15 }
 0x3d6   :  { %v1603_v16 = vpop.eup %1602 }
 0x3d7   :  { %v662_v17 = vmul.f32 %v1603_v16, %v1597_v59  ;;  %v670_v18 = vpop.permute.xlu2 %669 }
 0x3d8   :  { %v675_v19 = vsel %vm547_vm9, %v670_v18, 0 }
 0x3d9   :  { %v664_v24 = vpack.c.bf16 %v662_v17, %v662_v17  ;;  %684 = vmatpush.bf16.msra.mxu1 %v675_v19 }
 0x3dc   :  { %1479 = vmatmul.msk.bf16.vlgmr.msra.gmra.mxu1 %vm481_vm8, %v664_v24 }
 0x3dd   :  { %772 = vmatpush.bf16.xpose.msrb.mxu1 %v763_v22 }
 0x3ec   :  { %1483 = vmatmul.msk.bf16.vlgmr.msrb.gmra.mxu1 %vm481_vm8, %v756_v25 }
 0x3f8   :  { %v2358_v26 = vpop.f32.mrf.mxu1 }
 0x400   :  { %v562_v27 = vpop.f32.mrf.mxu1 }
 0x410   :  { %v525_v28 = vpop.xlane.xlu2 %524 }
 0x411   :  { %v527_v29 = vsub.f32 %v517_v8, %v525_v28 }
 0x413   :  { %v530_v30 = vmul.f32 1.442695, %v527_v29 }
 0x415   :  { %1604 = vpow2.f32 %v530_v30 }
 0x418   :  { %v659_v31 = vpop.xlane.xlu2 %658 }
 0x41b   :  { %v1605_v32 = vpop.eup %1604 }
 0x41c   :  { %v535_v34 = vsel %vm481_vm8, %v1605_v32, 0.0 }
 0x41d   :  { %536 = vadd.xlane.f32.xlu1 %v535_v34 }
 0x420   :  { %v694_v35 = vpop.permute.xlu2 %693 }
 0x421   :  { %v699_v36 = vsel %vm547_vm9, %v694_v35, 0 }
 0x422   :  { %708 = vmatpush.bf16.msra.mxu2 %v699_v36 }
 0x436   :  { %778 = vrot.lane.b32.xlu1 %v2301_v20, %s2071_s20 }
 0x43e   :  { %825 = vrot.lane.b32.xlu1 %v2341_v63, %s2071_s20 }
 0x446   :  { %892 = vrot.lane.b32.xlu1 %v2291_v3, %s2072_s29  ;;  %v472_v3 = vld [vmem:[#allocation14 + $0x4] sm:$0xf] }
 0x44e   :  { %915 = vrot.lane.b32.xlu1 %v2303_v21, %s2072_s29  ;;  %v719_v21 = vsel %vm547_vm9, %v472_v3, 0 }
 0x44f   :  { %728 = vmatpush.bf16.msra.mxu3 %v719_v21 }
 0x456   :  { %890 = vrot.lane.b32.xlu1 %v2305_v23, %s2072_s29 }
 0x459   :  { %v686_v37 = vpop.f32.mrf.mxu1 }
 0x461   :  { %v688_v38 = vpop.f32.mrf.mxu1 }
 0x469   :  { %v774_v39 = vpop.f32.mrf.mxu1 }
 0x46a   :  { %v775_v40 = vadd.f32 %v2322_v33, %v774_v39 }
 0x46c   :  { %v801_v41 = vsel %vm481_vm8, %v775_v40, -inf }
 0x46d   :  { %802 = vmax.xlane.f32.xlu0 %v801_v41 }
 0x471   :  { %v776_v42 = vpop.f32.mrf.mxu1 }
 0x481   :  { %913 = vrot.lane.b32.xlu0 %v2301_v20, %s2072_s29 }
 0x490   :  { %v537_v43 = vpop.xlane.xlu1 %536 }
 0x491   :  { %1606 = vrcp.f32 %v537_v43 }
 0x492   :  { %1608 = vrcp.f32 %v659_v31 }
 0x497   :  { %v1607_v44 = vpop.eup %1606 }
 0x498   :  { %v541_v23 = vmul.f32 %v1607_v44, %v1605_v32  ;;  %v1609_v48 = vpop.eup %1608 }
 0x499   :  { %v663_v49 = vmul.f32 %v1609_v48, %v1601_v10 }
 0x49a   :  { %v543_v46 = vpack.c.bf16 %v541_v23, %v541_v23 }
 0x49b   :  { %v665_v20 = vpack.c.bf16 %v663_v49, %v663_v49 }
 0x49c   :  { %1476 = vmatmul.msk.bf16.vlgmr.msrb.gmra.mxu2 %vm481_vm8, %v543_v46 }
 0x49d   :  { %795 = vmatpush.bf16.xpose.msrb.mxu2 %v786_v47 }
 0x4a8   :  { %v779_v50 = vpop.permute.xlu1 %778 }
 0x4ac   :  { %1480 = vmatmul.msk.bf16.vlgmr.msra.gmra.mxu2 %vm481_vm8, %v665_v20 }
 0x4b0   :  { %v826_v52 = vpop.permute.xlu1 %825 }
 0x4b1   :  { %v831_v53 = vsel %vm547_vm9, %v826_v52, 0 }
 0x4b2   :  { %840 = vmatpush.bf16.msrb.mxu3 %v831_v53 }
 0x4b8   :  { %v893_v56 = vpop.permute.xlu1 %892 }
 0x4b9   :  { %v898_v57 = vsel %vm481_vm8, %v893_v56, 0 }
 0x4ba   :  { %907 = vmatpush.bf16.xpose.msra.mxu2 %v898_v57 }
 0x4bc   :  { %1484 = vmatmul.msk.bf16.vlgmr.msrb.gmra.mxu2 %vm481_vm8, %v779_v50 }
 0x4c0   :  { %v916_v58 = vpop.permute.xlu1 %915 }
 0x4c1   :  { %v921_v10 = vsel %vm481_vm8, %v916_v58, 0 }
 0x4c8   :  { %v891_v59 = vpop.permute.xlu1 %890 }
 0x4cc   :  { %1488 = vmatmul.msk.bf16.vlgmr.msra.gmra.mxu2 %vm481_vm8, %v891_v59 }
 0x4e0   :  { %v803_v60 = vpop.xlane.xlu0 %802 }
 0x4e1   :  { %v807_v61 = vsub.f32 %v775_v40, %v803_v60 }
 0x4e3   :  { %v809_v62 = vmul.f32 1.442695, %v807_v61 }
 0x4e5   :  { %1610 = vpow2.f32 %v809_v62 }
 0x4eb   :  { %v1611_v0 = vpop.eup %1610 }
 0x4ec   :  { %v813_v1 = vsel %vm481_vm8, %v1611_v0, 0.0 }
 0x4ed   :  { %814 = vadd.xlane.f32.xlu2 %v813_v1  ;;  %v473_v1 = vld [vmem:[#allocation14 + $0x8] sm:$0xf] }
 0x4ee   :  { %v872_v2 = vsel %vm547_vm9, %v473_v1, 0 }
 0x4ef   :  { %881 = vmatpush.bf16.msra.mxu1 %v872_v2 }
 0x4f3   :  { %v914_v29 = vpop.permute.xlu0 %913 }
 0x51f   :  { %v579_v5 = vpop.f32.mrf.mxu2 }
 0x520   :  { %v583_v6 = vpack.c.bf16 %v579_v5, %v2358_v26 }
 0x522   :  { %1482 = vmatmul.msk.bf16.vlgmr.msrb.gmra.mxu0 %vm481_vm8, %v583_v6 }
 0x527   :  { %v581_v7 = vpop.f32.mrf.mxu2 }
 0x52f   :  { %v710_v8 = vpop.f32.mrf.mxu2 }
 0x530   :  { %v714_v9 = vpack.c.bf16 %v710_v8, %v686_v37 }
 0x532   :  { %1481 = vmatmul.msk.bf16.vlgmr.msra.gmra.mxu3 %vm481_vm8, %v714_v9 }
 0x533   :  { %930 = vmatpush.bf16.xpose.msra.mxu3 %v921_v10 }
 0x537   :  { %v712_v12 = vpop.f32.mrf.mxu2 }
 0x53f   :  { %v797_v13 = vpop.f32.mrf.mxu2 }
 0x540   :  { %v798_v15 = vadd.f32 %v2331_v51, %v797_v13 }
 0x542   :  { %v804_v16 = vsel %vm481_vm8, %v798_v15, -inf }
 0x543   :  { %805 = vmax.xlane.f32.xlu2 %v804_v16 }
 0x547   :  { %v799_v17 = vpop.f32.mrf.mxu2 }
 0x54f   :  { %v909_v18 = vpop.f32.mrf.mxu2 }
 0x550   :  { %v910_v19 = vadd.f32 %v2322_v33, %v909_v18 }
 0x552   :  { %v936_v22 = vsel %vm481_vm8, %v910_v19, -inf }
 0x553   :  { %937 = vmax.xlane.f32.xlu0 %v936_v22 }
 0x557   :  { %v911_v24 = vpop.f32.mrf.mxu2 }
 0x55b   :  { %846 = vrot.lane.b32.xlu2 %v2350_v14, %s2071_s20 }
 0x560   :  { %v815_v25 = vpop.xlane.xlu2 %814 }
 0x561   :  { %1612 = vrcp.f32 %v815_v25 }
 0x567   :  { %v1613_v26 = vpop.eup %1612  ;;  %960 = vrot.lane.b32.xlu0 %v2341_v63, %s2072_s29 }
 0x568   :  { %v821_v27 = vmul.f32 %v1613_v26, %v1611_v0 }
 0x56a   :  { %v823_v28 = vpack.c.bf16 %v821_v27, %v821_v27 }
 0x56c   :  { %1485 = vmatmul.msk.bf16.vlgmr.msrb.gmra.mxu3 %vm481_vm8, %v823_v28  ;;  %v1581_v28 = vld [vmem:[#allocation16] ss:$0 sm:$0xff] }
 0x57c   :  { %1489 = vmatmul.msk.bf16.vlgmr.msra.gmra.mxu3 %vm481_vm8, %v914_v29 }
 0x59f   :  { %v750_v33 = vpop.f32.mrf.mxu0 }
 0x5a7   :  { %v752_v4 = vpop.f32.mrf.mxu0 }
 0x5b5   :  { %v730_v30 = vpop.f32.mrf.mxu3 }
 0x5b6   :  { %v2400_v31 = vadd.f32 %v750_v33, %v730_v30  ;;  %v806_v32 = vpop.xlane.xlu2 %805 }
 0x5b7   :  { %v808_v34 = vsub.f32 %v798_v15, %v806_v32 }
 0x5b9   :  { %v811_v35 = vmul.f32 1.442695, %v808_v34 }
 0x5bb   :  { %1614 = vpow2.f32 %v811_v35 }
 0x5bd   :  { %v732_v44 = vpop.f32.mrf.mxu3 }
 0x5be   :  { %v847_v36 = vpop.permute.xlu2 %846  ;;  %v753_v32 = vadd.f32 %v752_v4, %v732_v44 }
 0x5bf   :  { %v852_v37 = vsel %vm547_vm9, %v847_v36, 0 }
 0x5c0   :  { %861 = vmatpush.bf16.msra.mxu0 %v852_v37 }
 0x5c1   :  { %v1615_v63 = vpop.eup %1614 }
 0x5c2   :  { %v816_v38 = vsel %vm481_vm8, %v1615_v63, 0.0 }
 0x5c3   :  { %817 = vadd.xlane.f32.xlu1 %v816_v38 }
 0x5c6   :  { %v938_v39 = vpop.xlane.xlu0 %937 }
 0x5c7   :  { %v942_v40 = vsub.f32 %v910_v19, %v938_v39  ;;  %v474_v19 = vld [vmem:[#allocation14 + $0xc] sm:$0xf] }
 0x5c8   :  { %v1007_v22 = vsel %vm547_vm9, %v474_v19, 0  ;;  %v1541_v19 = vld [vmem:[%s2508_s16 + $0x18] sm:$0xff] }
 0x5c9   :  { %v944_v41 = vmul.f32 1.442695, %v942_v40  ;;  %1016 = vmatpush.bf16.msrb.mxu2 %v1007_v22  ;;  %v1537_v40 = vld [vmem:[#allocation20 + $0x8] sm:$0xff] }
 0x5ca   :  { %1119 = vmatpush.bf16.msrb.mxu3 %v1537_v40 }
 0x5cb   :  { %1616 = vpow2.f32 %v944_v41 }
 0x5d1   :  { %v1617_v42 = vpop.eup %1616 }
 0x5d2   :  { %v948_v43 = vsel %vm481_vm8, %v1617_v42, 0.0 }
 0x5d3   :  { %949 = vadd.xlane.f32.xlu1 %v948_v43 }
 0x5d9   :  { %v961_v3 = vpop.permute.xlu0 %960 }
 0x5da   :  { %v966_v21 = vsel %vm547_vm9, %v961_v3, 0 }
 0x5db   :  { %975 = vmatpush.bf16.msrb.mxu0 %v966_v21 }
 0x5ef   :  { %v842_v23 = vpop.f32.mrf.mxu3 }
 0x5f7   :  { %v844_v45 = vpop.f32.mrf.mxu3 }
 0x5ff   :  { %v932_v46 = vpop.f32.mrf.mxu3 }
 0x600   :  { %v933_v47 = vadd.f32 %v2331_v51, %v932_v46 }
 0x602   :  { %v939_v48 = vsel %vm481_vm8, %v933_v47, -inf }
 0x603   :  { %940 = vmax.xlane.f32.xlu2 %v939_v48 }
 0x607   :  { %v934_v49 = vpop.f32.mrf.mxu3 }
 0x636   :  { %v818_v50 = vpop.xlane.xlu1 %817 }
 0x637   :  { %1618 = vrcp.f32 %v818_v50 }
 0x63d   :  { %v1619_v20 = vpop.eup %1618 }
 0x63e   :  { %v822_v52 = vmul.f32 %v1619_v20, %v1615_v63 }
 0x640   :  { %v824_v53 = vpack.c.bf16 %v822_v52, %v822_v52 }
 0x642   :  { %1486 = vmatmul.msk.bf16.vlgmr.msra.gmra.mxu0 %vm481_vm8, %v824_v53  ;;  %v2430_v53 = vld [vmem:[#allocation22] ss:$0 sm:$0xff] }
 0x646   :  { %v950_v56 = vpop.xlane.xlu1 %949 }
 0x647   :  { %1620 = vrcp.f32 %v950_v56 }
 0x64d   :  { %v1621_v57 = vpop.eup %1620 }
 0x64e   :  { %v956_v58 = vmul.f32 %v1621_v57, %v1617_v42  ;;  %v1536_v42 = vld [vmem:[#allocation20] sm:$0xff] }
 0x64f   :  { %1120 = vmatpush.bf16.msrb.mxu3 %v1536_v42 }
 0x650   :  { %v958_v59 = vpack.c.bf16 %v956_v58, %v956_v58 }
 0x652   :  { %1490 = vmatmul.msk.bf16.vlgmr.msrb.gmra.mxu0 %vm481_vm8, %v958_v59 }
 0x676   :  { %v941_v60 = vpop.xlane.xlu2 %940 }
 0x677   :  { %v943_v51 = vsub.f32 %v933_v47, %v941_v60 }
 0x679   :  { %v946_v61 = vmul.f32 1.442695, %v943_v51 }
 0x67b   :  { %1622 = vpow2.f32 %v946_v61 }
 0x681   :  { %v1623_v62 = vpop.eup %1622 }
 0x682   :  { %v951_v0 = vsel %vm481_vm8, %v1623_v62, 0.0 }
 0x683   :  { %952 = vadd.xlane.f32.xlu1 %v951_v0 }
 0x69c   :  { %981 = vrot.lane.b32.xlu1 %v2350_v14, %s2072_s29 }
 0x6bf   :  { %v863_v5 = vpop.f32.mrf.mxu0 }
 0x6c0   :  { %v867_v6 = vpack.c.bf16 %v863_v5, %v842_v23 }
 0x6c2   :  { %1487 = vmatmul.msk.bf16.vlgmr.msra.gmra.mxu1 %vm481_vm8, %v867_v6 }
 0x6c7   :  { %v865_v7 = vpop.f32.mrf.mxu0 }
 0x6c8   :  { %v1582_v7 = vld [vmem:[#allocation17] ss:$0 sm:$0xff] }
 0x6cf   :  { %v977_v8 = vpop.f32.mrf.mxu0 }
 0x6d7   :  { %v979_v9 = vpop.f32.mrf.mxu0 }
 0x6f6   :  { %v953_v10 = vpop.xlane.xlu1 %952 }
 0x6f7   :  { %1624 = vrcp.f32 %v953_v10 }
 0x6fd   :  { %v1625_v12 = vpop.eup %1624 }
 0x6fe   :  { %v957_v13 = vmul.f32 %v1625_v12, %v1623_v62  ;;  %v1583_v12 = vld [vmem:[#allocation19] ss:$0 sm:$0xff] }
 0x700   :  { %v959_v14 = vpack.c.bf16 %v957_v13, %v957_v13 }
 0x70e   :  { %v982_v15 = vpop.permute.xlu1 %981 }
 0x70f   :  { %v987_v16 = vsel %vm547_vm9, %v982_v15, 0 }
 0x710   :  { %996 = vmatpush.bf16.msrb.mxu1 %v987_v16 }
 0x713   :  { %1491 = vmatmul.msk.bf16.vlgmr.msrb.gmra.mxu1 %vm481_vm8, %v959_v14 }
 0x714   :  { %1217 = vmatpush.bf16.msra.mxu1 %v1541_v19 }
 0x73f   :  { %v883_v17 = vpop.f32.mrf.mxu1 }
 0x740   :  { %v888_v18 = vadd.f32 %v883_v17, %v2400_v31 }
 0x747   :  { %v885_v24 = vpop.f32.mrf.mxu1 }
 0x748   :  { %v889_v35 = vadd.f32 %v885_v24, %v753_v32  ;;  %v1540_v24 = vld [vmem:[%s2508_s16 + $0x10] sm:$0xff] }
 0x749   :  { %1218 = vmatpush.bf16.msra.mxu1 %v1540_v24 }
 0x790   :  { %v998_v25 = vpop.f32.mrf.mxu1 }
 0x791   :  { %v1002_v26 = vpack.c.bf16 %v998_v25, %v977_v8 }
 0x793   :  { %1492 = vmatmul.msk.bf16.vlgmr.msrb.gmra.mxu2 %vm481_vm8, %v1002_v26  ;;  %v1539_v26 = vld [vmem:[%s2508_s16 + $0x8] sm:$0xff]  ;;  %vm1417_vm8 = vcmask 257024  }
 0x794   :  { %1246 = vmatpush.bf16.msra.mxu2 %v1539_v26 }
 0x798   :  { %v1000_v27 = vpop.f32.mrf.mxu1 }
 0x816   :  { %v1018_v29 = vpop.f32.mrf.mxu2 }
 0x817   :  { %v1023_v33 = vadd.f32 %v1018_v29, %v888_v18 }
 0x819   :  { %v1029_v30 = vadd.f32 %v1581_v28, %v1023_v33 }
 0x81b   :  { %v1031_v34 = vadd.f32 %v1029_v30, %v2281_v54 }
 0x81d   :  { %v1035_v31 = vsel %vm295_vm0, %v1031_v34, 0.0 }
 0x81e   :  { %1036 = vadd.xlane.f32.xlu2 %v1035_v31  ;;  %v1020_v36 = vpop.f32.mrf.mxu2 }
 0x81f   :  { %v1024_v37 = vadd.f32 %v1020_v36, %v889_v35 }
 0x821   :  { %v1030_v63 = vadd.f32 %v1581_v28, %v1024_v37  ;;  %v1538_v28 = vld [vmem:[%s2508_s16] sm:$0xff] }
 0x822   :  { %1247 = vmatpush.bf16.msra.mxu2 %v1538_v28 }
 0x823   :  { %v1032_v38 = vadd.f32 %v1030_v63, %v2283_v55 }
 0x825   :  { %v1038_v39 = vsel %vm295_vm0, %v1032_v38, 0.0 }
 0x826   :  { %1039 = vadd.xlane.f32.xlu0 %v1038_v39 }
 0x891   :  { %v1037_v41 = vpop.xlane.xlu2 %1036 }
 0x892   :  { %v1041_v43 = vmul.f32 %v1037_v41, %v2255_v11 }
 0x894   :  { %v1043_v54 = vsub.f32 %v1031_v34, %v1041_v43 }
 0x896   :  { %v1045_v3 = vmul.f32 %v1043_v54, %v1043_v54 }
 0x898   :  { %v1047_v21 = vsel %vm295_vm0, %v1045_v3, 0.0 }
 0x899   :  { %1048 = vadd.xlane.f32.xlu2 %v1047_v21  ;;  %v1040_v44 = vpop.xlane.xlu0 %1039 }
 0x89a   :  { %v1042_v23 = vmul.f32 %v1040_v44, %v2255_v11 }
 0x89c   :  { %v1044_v45 = vsub.f32 %v1032_v38, %v1042_v23 }
 0x89e   :  { %v1046_v55 = vmul.f32 %v1044_v45, %v1044_v45 }
 0x8a0   :  { %v1050_v46 = vsel %vm295_vm0, %v1046_v55, 0.0 }
 0x8a1   :  { %1051 = vadd.xlane.f32.xlu1 %v1050_v46 }
 0x8b1   :  { %1152 = vrot.lane.b32.xlu2 %v1537_v40, %s2073_s3 }
 0x8b9   :  { %1150 = vrot.lane.b32.xlu2 %v1536_v42, %s2073_s3 }
 0x8c1   :  { %1156 = vrot.lane.b32.xlu2 %v2430_v53, %s2073_s3 }
 0x90c   :  { %v1049_v47 = vpop.xlane.xlu2 %1048 }
 0x90d   :  { %v1053_v48 = vmul.f32 %v1049_v47, %v2255_v11 }
 0x90f   :  { %v1055_v49 = vadd.f32 1e-12, %v1053_v48 }
 0x911   :  { %1626 = vrsqrt.f32 %v1055_v49  ;;  %vm1063_vm11 = vweird.f32 %v1055_v49 }
 0x914   :  { %v1052_v50 = vpop.xlane.xlu1 %1051  ;;  %v1153_v20 = vpop.permute.xlu2 %1152 }
 0x915   :  { %v1054_v52 = vmul.f32 %v1052_v50, %v2255_v11  ;;  %1165 = vmatpush.bf16.msra.mxu0 %v1153_v20 }
 0x917   :  { %v1627_v56 = vpop.eup %1626  ;;  %v1056_v57 = vadd.f32 1e-12, %v1054_v52 }
 0x918   :  { %v1058_v58 = vmul.f32 %v1627_v56, %v1055_v49  ;;  %vm1064_vm10 = vweird.f32 %v1627_v56 }
 0x919   :  { %1628 = vrsqrt.f32 %v1056_v57  ;;  %vm1065_vm12 = vmor %vm1063_vm11, %vm1064_vm10  ;;  %vm1073_vm14 = vweird.f32 %v1056_v57 }
 0x91a   :  { %v1059_v59 = vmul.f32 %v1627_v56, %v1058_v58 }
 0x91c   :  { %v1060_v60 = vmul.f32 0.5, %v1059_v59  ;;  %v1151_v51 = vpop.permute.xlu2 %1150 }
 0x91d   :  { %1166 = vmatpush.bf16.msra.mxu0 %v1151_v51 }
 0x91e   :  { %v1061_v61 = vsub.f32 1.5, %v1060_v60 }
 0x91f   :  { %v1629_v62 = vpop.eup %1628 }
 0x920   :  { %v1062_v0 = vmul.f32 %v1627_v56, %v1061_v61  ;;  %v1068_v1 = vmul.f32 %v1629_v62, %v1056_v57  ;;  %vm1074_vm13 = vweird.f32 %v1629_v62 }
 0x921   :  { %vm1075_vm15 = vmor %vm1073_vm14, %vm1074_vm13 }
 0x922   :  { %v1069_v2 = vmul.f32 %v1629_v62, %v1068_v1  ;;  %v1066_v4 = vsel %vm1065_vm12, %v1627_v56, %v1062_v0 }
 0x923   :  { %v1077_v8 = vmul.f32 %v1066_v4, %v1043_v54 }
 0x924   :  { %v1070_v5 = vmul.f32 0.5, %v1069_v2  ;;  %v1157_v22 = vpop.permute.xlu2 %1156 }
 0x925   :  { %v1082_v13 = vmul.f32 %v1582_v7, %v1077_v8 }
 0x926   :  { %v1071_v6 = vsub.f32 1.5, %v1070_v5 }
 0x927   :  { %v2433_v14 = vadd.f32 %v1583_v12, %v1082_v13  ;;  %v1585_v13 = vld [vmem:[#allocation23] ss:$0 sm:$0xff] }
 0x928   :  { %v1072_v9 = vmul.f32 %v1629_v62, %v1071_v6  ;;  %v2074_v6 = vmov 8.0  }
 0x92a   :  { %v1076_v10 = vsel %vm1075_vm15, %v1629_v62, %v1072_v9 }
 0x92b   :  { %v1078_v15 = vmul.f32 %v1076_v10, %v1044_v45 }
 0x92d   :  { %v1083_v16 = vmul.f32 %v1582_v7, %v1078_v15  ;;  %v1260_v7 = vsel %vm295_vm0, %v2433_v14, 0.0  ;;  %v1543_v15 = vld [vmem:[%s2510_s18 + $0x8] sm:$0xff] }
 0x92e   :  { %v1261_v8 = vrot.slane %v1260_v7, 4  ;;  %1337 = vmatpush.bf16.msra.mxu3 %v1543_v15 }
 0x92f   :  { %v2435_v17 = vadd.f32 %v1583_v12, %v1083_v16 }
 0x930   :  { %v1262_v16 = vadd.f32 %v1261_v8, %v1260_v7 }
 0x931   :  { %v1089_v18 = vpack.c.bf16 %v2435_v17, %v2433_v14  ;;  %v1267_v12 = vsel %vm295_vm0, %v2435_v17, 0.0 }
 0x932   :  { %v1268_v24 = vrot.slane %v1267_v12, 4 }
 0x933   :  { %1501 = vmatmul.msk.bf16.vlgmr.msrb.gmra.mxu3 %vm295_vm0, %v1089_v18  ;;  %1502 = vmatmul.msk.bf16.vlgmr.msra.gmra.mxu0 %vm295_vm0, %v1089_v18 }
 0x9b0   :  { %v1168_v25 = vpop.f32.mrf.mxu0 }
 0x9b1   :  { %v1169_v27 = vadd.f32 %v1168_v25, %v1157_v22  ;;  %v1542_v25 = vld [vmem:[%s2510_s18] sm:$0xff] }
 0x9b2   :  { %1338 = vmatpush.bf16.msra.mxu3 %v1542_v25 }
 0x9b3   :  { %v1175_v29 = vmul.f32 0.044715, %v1169_v27  ;;  %v1173_v52 = vmul.f32 0.5, %v1169_v27 }
 0x9b5   :  { %v1177_v33 = vmul.f32 %v1175_v29, %v1169_v27 }
 0x9b6   :  { %v1122_v30 = vpop.f32.mrf.mxu3 }
 0x9b7   :  { %v1179_v32 = vmul.f32 %v1177_v33, %v1169_v27  ;;  %v1123_v34 = vadd.f32 %v2430_v53, %v1122_v30  ;;  %v1269_v33 = vadd.f32 %v1268_v24, %v1267_v12 }
 0x9b8   :  { %v1170_v35 = vpop.f32.mrf.mxu0 }
 0x9b9   :  { %v1181_v31 = vadd.f32 %v1179_v32, %v1169_v27  ;;  %v1129_v36 = vmul.f32 0.044715, %v1123_v34  ;;  %v1171_v37 = vadd.f32 %v1170_v35, %v1157_v22  ;;  %v1127_v62 = vmul.f32 0.5, %v1123_v34 }
 0x9ba   :  { %v1263_v27 = vrot.slane %v1262_v16, 2 }
 0x9bb   :  { %v1131_v63 = vmul.f32 %v1129_v36, %v1123_v34  ;;  %v1176_v38 = vmul.f32 0.044715, %v1171_v37  ;;  %v1183_v39 = vmul.f32 0.7978846, %v1181_v31  ;;  %v1174_v56 = vmul.f32 0.5, %v1171_v37 }
 0x9bd   :  { %v1133_v40 = vmul.f32 %v1131_v63, %v1123_v34  ;;  %v1178_v41 = vmul.f32 %v1176_v38, %v1171_v37  ;;  %1630 = vtanh.f32 %v1183_v39  ;;  %v1270_v63 = vrot.slane %v1269_v33, 2 }
 0x9be   :  { %v1124_v42 = vpop.f32.mrf.mxu3 }
 0x9bf   :  { %v1135_v43 = vadd.f32 %v1133_v40, %v1123_v34  ;;  %v1180_v54 = vmul.f32 %v1178_v41, %v1171_v37  ;;  %v1125_v3 = vadd.f32 %v2430_v53, %v1124_v42  ;;  %v1264_v34 = vadd.f32 %v1263_v27, %v1262_v16 }
 0x9c1   :  { %v1182_v21 = vadd.f32 %v1180_v54, %v1171_v37  ;;  %v1130_v44 = vmul.f32 0.044715, %v1125_v3  ;;  %v1137_v23 = vmul.f32 0.7978846, %v1135_v43  ;;  %v1128_v0 = vmul.f32 0.5, %v1125_v3 }
 0x9c2   :  { %v1265_v40 = vrot.slane %v1264_v34, 1 }
 0x9c3   :  { %v1184_v45 = vmul.f32 0.7978846, %v1182_v21  ;;  %v1132_v55 = vmul.f32 %v1130_v44, %v1125_v3  ;;  %v1631_v47 = vpop.eup %1630 }
 0x9c4   :  { %v1187_v50 = vadd.f32 1.0, %v1631_v47  ;;  %v1266_v44 = vadd.f32 %v1265_v40, %v1264_v34 }
 0x9c5   :  { %1632 = vtanh.f32 %v1184_v45  ;;  %v1134_v46 = vmul.f32 %v1132_v55, %v1125_v3 }
 0x9c6   :  { %1634 = vtanh.f32 %v1137_v23  ;;  %v1189_v53 = vmul.f32 %v1187_v50, %v1173_v52 }
 0x9c7   :  { %v1136_v48 = vadd.f32 %v1134_v46, %v1125_v3  ;;  %v1271_v3 = vadd.f32 %v1270_v63, %v1269_v33 }
 0x9c9   :  { %v1138_v49 = vmul.f32 0.7978846, %v1136_v48  ;;  %v1272_v47 = vrot.slane %v1271_v3, 1 }
 0x9cb   :  { %v1633_v20 = vpop.eup %1632  ;;  %1636 = vtanh.f32 %v1138_v49  ;;  %v1273_v52 = vadd.f32 %v1272_v47, %v1271_v3 }
 0x9cc   :  { %v1188_v57 = vadd.f32 1.0, %v1633_v20  ;;  %v1635_v58 = vpop.eup %1634  ;;  %1638 = vrcp.f32 %v2074_v6 }
 0x9cd   :  { %v1141_v60 = vadd.f32 1.0, %v1635_v58 }
 0x9ce   :  { %v1190_v59 = vmul.f32 %v1188_v57, %v1174_v56 }
 0x9cf   :  { %v1143_v2 = vmul.f32 %v1141_v60, %v1127_v62 }
 0x9d0   :  { %v1191_v51 = vpack.c.bf16 %v1190_v59, %v1189_v53 }
 0x9d1   :  { %v1637_v61 = vpop.eup %1636 }
 0x9d2   :  { %v1142_v1 = vadd.f32 1.0, %v1637_v61  ;;  %1511 = vmatmul.msk.bf16.vlgmr.msra.gmra.mxu1 %vm295_vm0, %v1191_v51  ;;  %v1639_v9 = vpop.eup %1638 }
 0x9d3   :  { %v1275_v22 = vmul.f32 8.0, %v1639_v9  ;;  %vm1279_vm1 = vweird.f32 %v1639_v9 }
 0x9d4   :  { %v1144_v4 = vmul.f32 %v1142_v1, %v1128_v0 }
 0x9d5   :  { %v1276_v28 = vsub.f32 1.0, %v1275_v22 }
 0x9d6   :  { %v1145_v5 = vpack.c.bf16 %v1144_v4, %v1143_v2 }
 0x9d7   :  { %v1277_v36 = vmul.f32 %v1639_v9, %v1276_v28 }
 0x9d8   :  { %1520 = vmatmul.msk.bf16.vlgmr.msra.gmra.mxu2 %vm295_vm0, %v1145_v5 }
 0x9d9   :  { %v1278_v42 = vadd.f32 %v1639_v9, %v1277_v36 }
 0x9db   :  { %v1280_v55 = vsel %vm1279_vm1, %v1639_v9, %v1278_v42 }
 0x9dc   :  { %v1281_v49 = vmul.f32 %v1280_v55, %v1266_v44  ;;  %v1282_v53 = vmul.f32 %v1280_v55, %v1273_v52 }
 0xa4f   :  { %v1220_v10 = vpop.f32.mrf.mxu1 }
 0xa57   :  { %v1222_v32 = vpop.f32.mrf.mxu1 }
 0xa5b   :  { %v1249_v18 = vpop.f32.mrf.mxu2 }
 0xa5c   :  { %v1250_v19 = vadd.f32 %v1249_v18, %v1220_v10 }
 0xa5e   :  { %v1258_v26 = vadd.f32 %v1585_v13, %v1250_v19 }
 0xa60   :  { %v1283_v29 = vsel %vm295_vm0, %v1258_v26, 0.0 }
 0xa61   :  { %v1284_v30 = vrot.slane %v1283_v29, 4 }
 0xa63   :  { %v1285_v35 = vadd.f32 %v1284_v30, %v1283_v29  ;;  %v1251_v31 = vpop.f32.mrf.mxu2 }
 0xa64   :  { %v1252_v37 = vadd.f32 %v1251_v31, %v1222_v32 }
 0xa65   :  { %v1286_v38 = vrot.slane %v1285_v35, 2 }
 0xa66   :  { %v1259_v39 = vadd.f32 %v1585_v13, %v1252_v37  ;;  %v1349_v13 = vadd.f32 %v1258_v26, %v2433_v14 }
 0xa67   :  { %v1287_v41 = vadd.f32 %v1286_v38, %v1285_v35 }
 0xa68   :  { %v1290_v43 = vsel %vm295_vm0, %v1259_v39, 0.0  ;;  %v1350_v19 = vadd.f32 %v1259_v39, %v2435_v17 }
 0xa69   :  { %v1288_v54 = vrot.slane %v1287_v41, 1  ;;  %v1291_v21 = vrot.slane %v1290_v43, 4 }
 0xa6b   :  { %v1289_v23 = vadd.f32 %v1288_v54, %v1287_v41  ;;  %v1292_v45 = vadd.f32 %v1291_v21, %v1290_v43 }
 0xa6d   :  { %v1297_v46 = vmul.f32 %v1289_v23, %v1280_v55  ;;  %v1293_v48 = vrot.slane %v1292_v45, 2 }
 0xa6f   :  { %v1294_v50 = vadd.f32 %v1293_v48, %v1292_v45  ;;  %v1299_v20 = vadd.f32 %v1297_v46, %v1281_v49  ;;  %v1587_v49 = vld [vmem:[%s2536_s26] ss:$0 sm:$0xff] }
 0xa71   :  { %v1295_v56 = vrot.slane %v1294_v50, 1  ;;  %v1301_v58 = vmax.f32 %v1299_v20, 0.0 }
 0xa73   :  { %v1296_v57 = vadd.f32 %v1295_v56, %v1294_v50  ;;  %v1303_v51 = vpack.c.bf16 %v1301_v58, %v1301_v58 }
 0xa75   :  { %v1298_v59 = vmul.f32 %v1296_v57, %v1280_v55  ;;  %v1311_v0 = vunpack.c.l.b16 %v1303_v51 }
 0xa77   :  { %v1300_v60 = vadd.f32 %v1298_v59, %v1282_v53 }
 0xa79   :  { %v1302_v61 = vmax.f32 %v1300_v60, 0.0 }
 0xa7b   :  { %v1304_v62 = vpack.c.bf16 %v1302_v61, %v1302_v61 }
 0xa7d   :  { %v1312_v1 = vunpack.c.l.b16 %v1304_v62 }
 0xa7f   :  { %v1314_v2 = vsel %vm1313_vm2, %v1312_v1, %v1311_v0 }
 0xa80   :  { %v1315_v4 = vpack.c.b16 %v1314_v2, %v1314_v2 }
 0xa82   :  { %1529 = vmatmul.msk.bf16.vlgmr.msra.gmra.mxu3 %vm295_vm0, %v1315_v4 }
 0xb05   :  { %v1340_v5 = vpop.f32.mrf.mxu3 }
 0xb06   :  { %v1344_v6 = vsub.f32 0.0, %v1340_v5 }
 0xb08   :  { %v1345_v7 = vmul.f32 1.442695, %v1344_v6 }
 0xb0a   :  { %1640 = vpow2.f32 %v1345_v7 }
 0xb0d   :  { %v1342_v8 = vpop.f32.mrf.mxu3 }
 0xb10   :  { %v1641_v9 = vpop.eup %1640 }
 0xb11   :  { %v1347_v10 = vadd.f32 1.0, %v1641_v9 }
 0xb13   :  { %1642 = vrcp.f32 %v1347_v10 }
 0xb19   :  { %v1643_v12 = vpop.eup %1642 }
 0xb1a   :  { %v1353_v15 = vperm.slane %v1643_v12, 0  ;;  %v1352_v16 = vrot.slane %v1643_v12, 1 }
 0xb1c   :  { %v1357_v18 = vmul.f32 %v1353_v15, %v1349_v13  ;;  %v1354_v22 = vperm.slane %v1352_v16, 0 }
 0xb1e   :  { %v1361_v24 = vsel %vm295_vm0, %v1357_v18, 0.0  ;;  %v1358_v25 = vmul.f32 %v1354_v22, %v1350_v19 }
 0xb1f   :  { %1362 = vadd.xlane.f32.xlu0 %v1361_v24 }
 0xb20   :  { %v1364_v27 = vsel %vm295_vm0, %v1358_v25, 0.0 }
 0xb21   :  { %1365 = vadd.xlane.f32.xlu1 %v1364_v27 }
 0xb92   :  { %v1363_v28 = vpop.xlane.xlu0 %1362 }
 0xb93   :  { %v1367_v29 = vmul.f32 %v1363_v28, %v2255_v11 }
 0xb94   :  { %v1366_v33 = vpop.xlane.xlu1 %1365 }
 0xb95   :  { %v1369_v30 = vsub.f32 %v1357_v18, %v1367_v29  ;;  %v1368_v14 = vmul.f32 %v1366_v33, %v2255_v11 }
 0xb97   :  { %v1370_v26 = vsub.f32 %v1358_v25, %v1368_v14  ;;  %v1371_v32 = vmul.f32 %v1369_v30, %v1369_v30 }
 0xb99   :  { %v1373_v34 = vsel %vm295_vm0, %v1371_v32, 0.0  ;;  %v1372_v17 = vmul.f32 %v1370_v26, %v1370_v26 }
 0xb9a   :  { %1374 = vadd.xlane.f32.xlu2 %v1373_v34 }
 0xb9b   :  { %v1376_v35 = vsel %vm295_vm0, %v1372_v17, 0.0 }
 0xb9c   :  { %1377 = vadd.xlane.f32.xlu0 %v1376_v35 }
 0xc0d   :  { %v1375_v31 = vpop.xlane.xlu2 %1374 }
 0xc0e   :  { %v1379_v36 = vmul.f32 %v1375_v31, %v2255_v11 }
 0xc0f   :  { %v1378_v37 = vpop.xlane.xlu0 %1377 }
 0xc10   :  { %v1381_v63 = vadd.f32 1e-12, %v1379_v36  ;;  %v1380_v38 = vmul.f32 %v1378_v37, %v2255_v11  ;;  %v1586_v11 = vld [vmem:[%s2511_s19] ss:$0 sm:$0xff] }
 0xc12   :  { %1644 = vrsqrt.f32 %v1381_v63  ;;  %v1382_v39 = vadd.f32 1e-12, %v1380_v38  ;;  %vm1389_vm3 = vweird.f32 %v1381_v63 }
 0xc14   :  { %1646 = vrsqrt.f32 %v1382_v39  ;;  %vm1399_vm6 = vweird.f32 %v1382_v39 }
 0xc18   :  { %v1645_v40 = vpop.eup %1644 }
 0xc19   :  { %v1384_v41 = vmul.f32 %v1645_v40, %v1381_v63  ;;  %vm1390_vm0 = vweird.f32 %v1645_v40 }
 0xc1a   :  { %v1647_v42 = vpop.eup %1646  ;;  %vm1391_vm5 = vmor %vm1389_vm3, %vm1390_vm0 }
 0xc1b   :  { %v1385_v43 = vmul.f32 %v1645_v40, %v1384_v41  ;;  %v1394_v54 = vmul.f32 %v1647_v42, %v1382_v39  ;;  %vm1400_vm4 = vweird.f32 %v1647_v42 }
 0xc1c   :  { %vm1401_vm7 = vmor %vm1399_vm6, %vm1400_vm4 }
 0xc1d   :  { %v1386_v3 = vmul.f32 0.5, %v1385_v43  ;;  %v1395_v21 = vmul.f32 %v1647_v42, %v1394_v54 }
 0xc1f   :  { %v1387_v44 = vsub.f32 1.5, %v1386_v3  ;;  %v1396_v23 = vmul.f32 0.5, %v1395_v21 }
 0xc21   :  { %v1388_v45 = vmul.f32 %v1645_v40, %v1387_v44  ;;  %v1397_v55 = vsub.f32 1.5, %v1396_v23 }
 0xc23   :  { %v1392_v46 = vsel %vm1391_vm5, %v1645_v40, %v1388_v45  ;;  %v1398_v47 = vmul.f32 %v1647_v42, %v1397_v55 }
 0xc24   :  { %v1403_v48 = vmul.f32 %v1392_v46, %v1369_v30 }
 0xc25   :  { %v1402_v50 = vsel %vm1401_vm7, %v1647_v42, %v1398_v47 }
 0xc26   :  { %v1408_v20 = vmul.f32 %v1586_v11, %v1403_v48  ;;  %v1404_v52 = vmul.f32 %v1402_v50, %v1370_v26 }
 0xc28   :  { %v1409_v56 = vmul.f32 %v1586_v11, %v1404_v52  ;;  %v1413_v57 = vadd.f32 %v1587_v49, %v1408_v20 }
 0xc2a   :  { %v1414_v58 = vadd.f32 %v1587_v49, %v1409_v56  ;;  %v1415_v53 = vpack.c.bf16 %v1413_v57, %v1413_v57 }
 0xc2c   :  { %v1416_v59 = vpack.c.bf16 %v1414_v58, %v1414_v58  ;;  %1418 = vst.msk [vmem:[#allocation26] sm:$0xf] %vm1417_vm8, %v1415_v53 }
 0xc2e   :  { %1419 = vst.msk [vmem:[#allocation26 + $0x4] sm:$0xf] %vm1417_vm8, %v1416_v59 }
 0xc2f   :  { %1432 = dma.vmem_to_hbm [thread:$0]  %s1425_s27, 128, %s1427_s28, [#allocation4], %s2056_s23, %s2056_s23, %s2057_s7  }
 0xc30   :  { %2048 = dma.done.wait [#allocation4], 128  }
 0xc31   :  { %2049 = vsyncadd [#allocation4], 4294967168 }
 0xc32   :  { %1437 = vsyncpa [#allocation3], 1 }
 0xc33   :  { %1438 = vsyncpa [#allocation6], 1 }
 0xc34   :  { %1439 = vsyncpa [#allocation9], 1 }
 0xc35   :  { %1440 = vsyncpa [#allocation12], 1 }
 0xc36   :  { %1441 = vsyncpa [#allocation15], 1 }
 0xc37   :  { %1442 = vsyncpa [#allocation18], 1 }
 0xc38   :  { %1443 = vsyncpa [#allocation21], 1 }
 0xc39   :  { %1444 = vsyncpa [#allocation24], 1 }
 0xc3a   :  { %1445 = vsyncpa [#allocation4], 1 }

// kernel: tpu_custom_call.1
= control target key start
LH: loop header
LB: loop body
LE: loop exit
PB: predicated region body
PF: predicated region fallthrough
CT: control target
= control target key end

     0   :  { %s2492_s0 = inlined_call_operand.hbm [shape: bf16[2,8,32], index: 0, kind: input, shape index: {}]   ;;  %s2493_s1 = inlined_call_operand.hbm [shape: f32[2,1,8], index: 1, kind: input, shape index: {}]   ;;  %s2494_s2 = inlined_call_operand.hbm [shape: f32[1,32], index: 2, kind: input, shape index: {}]   ;;  %s2495_s3 = inlined_call_operand.hbm [shape: f32[1,32], index: 3, kind: input, shape index: {}]   ;;  %s2496_s4 = inlined_call_operand.vmem [shape: bf16[32,32], index: 4, kind: input, shape index: {}]   ;;  %s2497_s5 = inlined_call_operand.hbm [shape: f32[1,32], index: 5, kind: input, shape index: {}]   ;;  %s2498_s6 = inlined_call_operand.vmem [shape: bf16[32,32], index: 6, kind: input, shape index: {}]   ;;  %s2499_s7 = inlined_call_operand.hbm [shape: f32[1,32], index: 7, kind: input, shape index: {}]   ;;  %s2500_s8 = inlined_call_operand.vmem [shape: bf16[32,32], index: 8, kind: input, shape index: {}]   ;;  %s2501_s9 = inlined_call_operand.hbm [shape: f32[1,32], index: 9, kind: input, shape index: {}]   ;;  %s2502_s10 = inlined_call_operand.hbm [shape: bf16[32,32], index: 10, kind: input, shape index: {}]   ;;  %s2503_s11 = inlined_call_operand.hbm [shape: f32[1,32], index: 11, kind: input, shape index: {}]   ;;  %s2504_s12 = inlined_call_operand.hbm [shape: f32[1,32], index: 12, kind: input, shape index: {}]   ;;  %s2505_s13 = inlined_call_operand.hbm [shape: f32[1,32], index: 13, kind: input, shape index: {}]   ;;  %s2506_s14 = inlined_call_operand.hbm [shape: bf16[32,64], index: 14, kind: input, shape index: {}]   ;;  %s2507_s15 = inlined_call_operand.hbm [shape: f32[1,64], index: 15, kind: input, shape index: {}]   ;;  %s2508_s16 = inlined_call_operand.vmem [shape: bf16[64,32], index: 16, kind: input, shape index: {}]   ;;  %s2509_s17 = inlined_call_operand.hbm [shape: f32[1,32], index: 17, kind: input, shape index: {}]   ;;  %s2510_s18 = inlined_call_operand.vmem [shape: bf16[32,32], index: 18, kind: input, shape index: {}]   ;;  %s2511_s19 = inlined_call_operand.vmem [shape: f32[1,32], index: 19, kind: input, shape index: {}]   ;;  %s2512_s20 = inlined_call_operand.vmem [shape: f32[1,32], index: 20, kind: input, shape index: {}]   ;;  %s2513_s21 = inlined_call_operand.hbm [shape: bf16[32,128], index: 21, kind: input, shape index: {}]   ;;  %s2514_s22 = inlined_call_operand.vmem [shape: f32[1,128], index: 22, kind: input, shape index: {}]   ;;  %s2515_s23 = inlined_call_operand.hbm [shape: bf16[2,8,32], index: 23, kind: output, shape index: {}]  }
   0x1   :  { %2518 = sst [smem:[#allocation36_spill]] %s2492_s0 }
   0x2   :  { %2519 = sst [smem:[#allocation37_spill]] %s2493_s1 }
   0x3   :  { %2520 = sst [smem:[#allocation38_spill]] %s2494_s2 }
   0x4   :  { %2521 = sst [smem:[#allocation39_spill]] %s2495_s3 }
   0x5   :  { %2522 = sst [smem:[#allocation40_spill]] %s2496_s4 }
   0x6   :  { %2523 = sst [smem:[#allocation41_spill]] %s2497_s5 }
   0x7   :  { %2524 = sst [smem:[#allocation42_spill]] %s2498_s6 }
   0x8   :  { %2525 = sst [smem:[#allocation43_spill]] %s2499_s7 }
   0x9   :  { %2526 = sst [smem:[#allocation44_spill]] %s2512_s20 }
   0xa   :  { %2527 = sst [smem:[#allocation45_spill]] %s2515_s23 }
   0xb   :  { %28 = vsyncpa [#allocation3], 0 }
   0xc   :  { %29 = vsyncpa [#allocation6], 0 }
   0xd   :  { %30 = vsyncpa [#allocation9], 0 }
   0xe   :  { %31 = vsyncpa [#allocation12], 0 }
   0xf   :  { %32 = vsyncpa [#allocation15], 0 }
  0x10   :  { %33 = vsyncpa [#allocation18], 0 }
  0x11   :  { %34 = vsyncpa [#allocation21], 0 }
  0x12   :  { %35 = vsyncpa [#allocation24], 0  ;;  %s2528_s24 = sld [smem:[#allocation37_spill]] }
  0x18   :  { %s54_s25 = sshll.u32 %s2528_s24, 4  ;;  %s55_s25 = int_to_ptr.hbm [resolvable:$true] %s54_s25 }
  0x19   :  { %36 = vsyncpa [#allocation4], 0  ;;  %s2050_s5 = smov [#allocation5]   ;;  %s2529_s2 = sld [smem:[#allocation39_spill]] }
  0x1a   :  { %s56_s1 = sshll.u32 %s2050_s5, 4  ;;  %s2051_s27 = smov 16   ;;  %s57_s1 = int_to_ptr.vmem [resolvable:$true] %s56_s1 }
  0x1b   :  { %s2052_s7 = smov 1   ;;  %s2053_s28 = smov [#allocation8]  }
  0x1c   :  { %62 = dma.hbm_to_vmem [thread:$0]  %s55_s25, 32, %s57_s1, [#allocation6], %s2051_s27, %s2051_s27, %s2052_s7  }
  0x1d   :  { %s81_s29 = sshll.u32 %s2053_s28, 4  ;;  %s2530_s23 = sld [smem:[#allocation43_spill]]  ;;  %s82_s29 = int_to_ptr.vmem [resolvable:$true] %s81_s29 }
  0x1e   :  { %s2054_s30 = smov [#allocation11]   ;;  %s128_s22 = sshll.u32 %s2502_s10, 4  ;;  %s129_s22 = int_to_ptr.hbm [resolvable:$true] %s128_s22 }
  0x1f   :  { %s79_s6 = sshll.u32 %s2529_s2, 4  ;;  %s107_s24 = sshll.u32 %s2054_s30, 4  ;;  %s80_s6 = int_to_ptr.hbm [resolvable:$true] %s79_s6  ;;  %s108_s24 = int_to_ptr.vmem [resolvable:$true] %s107_s24 }
  0x20   :  { %84 = dma.hbm_to_vmem [thread:$0]  %s80_s6, 16, %s82_s29, [#allocation9]  }
  0x21   :  { %s2055_s25 = smov [#allocation14]   ;;  %s153_s27 = sshll.u32 %s2504_s12, 4  ;;  %s154_s27 = int_to_ptr.hbm [resolvable:$true] %s153_s27 }
  0x22   :  { %s130_s1 = sshll.u32 %s2055_s25, 4  ;;  %s2057_s7 = smov 4   ;;  %s131_s1 = int_to_ptr.vmem [resolvable:$true] %s130_s1 }
  0x23   :  { %s105_s4 = sshll.u32 %s2530_s23, 4  ;;  %s2056_s23 = smov 64   ;;  %s106_s4 = int_to_ptr.hbm [resolvable:$true] %s105_s4 }
  0x24   :  { %110 = dma.hbm_to_vmem [thread:$0]  %s106_s4, 16, %s108_s24, [#allocation12]  }
  0x25   :  { %136 = dma.hbm_to_vmem [thread:$0]  %s129_s22, 256, %s131_s1, [#allocation15], %s2056_s23, %s2056_s23, %s2057_s7  }
  0x26   :  { %s174_s10 = sshll.u32 %s2506_s14, 4  ;;  %s2058_s20 = smov [#allocation17]   ;;  %s175_s10 = int_to_ptr.hbm [resolvable:$true] %s174_s10 }
  0x27   :  { %s155_s29 = sshll.u32 %s2058_s20, 4  ;;  %s2059_s3 = smov [#allocation20]   ;;  %s156_s29 = int_to_ptr.vmem [resolvable:$true] %s155_s29 }
  0x28   :  { %158 = dma.hbm_to_vmem [thread:$0]  %s154_s27, 16, %s156_s29, [#allocation18]  }
  0x29   :  { %s176_s0 = sshll.u32 %s2059_s3, 4  ;;  %s201_s30 = sshll.u32 %s2509_s17, 4  ;;  %s177_s0 = int_to_ptr.vmem [resolvable:$true] %s176_s0  ;;  %s202_s30 = int_to_ptr.hbm [resolvable:$true] %s201_s30 }
  0x2a   :  { %182 = dma.hbm_to_vmem [thread:$0]  %s175_s10, 256, %s177_s0, [#allocation21], %s2056_s23, %s2056_s23, %s2057_s7  }
  0x2b   :  { %s2531_s14 = sld [smem:[#allocation36_spill]]  ;;  %s2060_s25 = smov [#allocation23]  }
  0x2c   :  { %s203_s1 = sshll.u32 %s2060_s25, 4  ;;  %s2061_s26 = smov [#allocation2]   ;;  %s204_s1 = int_to_ptr.vmem [resolvable:$true] %s203_s1 }
  0x2d   :  { %206 = dma.hbm_to_vmem [thread:$0]  %s202_s30, 16, %s204_s1, [#allocation24]  }
  0x2e   :  { %s43_s2 = sshll.u32 %s2061_s26, 4  ;;  %s2532_s17 = sld [smem:[#allocation38_spill]]  ;;  %s44_s2 = int_to_ptr.vmem [resolvable:$true] %s43_s2 }
  0x2f   :  { %s2533_s29 = sld [smem:[#allocation41_spill]]  ;;  %s2062_s0 = smov [#allocation7]  }
  0x30   :  { %s70_s12 = sshll.u32 %s2062_s0, 4  ;;  %s2063_s4 = smov [#allocation10]   ;;  %s71_s12 = int_to_ptr.vmem [resolvable:$true] %s70_s12 }
  0x31   :  { %s41_s22 = sshll.u32 %s2531_s14, 4  ;;  %s94_s30 = sshll.u32 %s2063_s4, 4  ;;  %s42_s22 = int_to_ptr.hbm [resolvable:$true] %s41_s22  ;;  %s95_s30 = int_to_ptr.vmem [resolvable:$true] %s94_s30 }
  0x32   :  { %49 = dma.hbm_to_vmem [thread:$0]  %s42_s22, 128, %s44_s2, [#allocation3], %s2056_s23, %s2056_s23, %s2057_s7  }
  0x33   :  { %s118_s14 = sshll.u32 %s2501_s9, 4  ;;  %s142_s1 = sshll.u32 %s2503_s11, 4  ;;  %s119_s14 = int_to_ptr.hbm [resolvable:$true] %s118_s14  ;;  %s143_s1 = int_to_ptr.hbm [resolvable:$true] %s142_s1 }
  0x34   :  { %s68_s28 = sshll.u32 %s2532_s17, 4  ;;  %s2064_s26 = smov [#allocation13]   ;;  %s69_s28 = int_to_ptr.hbm [resolvable:$true] %s68_s28 }
  0x35   :  { %s92_s3 = sshll.u32 %s2533_s29, 4  ;;  %s120_s2 = sshll.u32 %s2064_s26, 4  ;;  %s93_s3 = int_to_ptr.hbm [resolvable:$true] %s92_s3  ;;  %s121_s2 = int_to_ptr.vmem [resolvable:$true] %s120_s2 }
  0x36   :  { %73 = dma.hbm_to_vmem [thread:$0]  %s69_s28, 16, %s71_s12, [#allocation6]  }
  0x37   :  { %97 = dma.hbm_to_vmem [thread:$0]  %s93_s3, 16, %s95_s30, [#allocation9]  }
  0x38   :  { %123 = dma.hbm_to_vmem [thread:$0]  %s119_s14, 16, %s121_s2, [#allocation12]  }
  0x39   :  { %s2065_s27 = smov [#allocation16]   ;;  %s164_s10 = sshll.u32 %s2505_s13, 4  ;;  %s165_s10 = int_to_ptr.hbm [resolvable:$true] %s164_s10 }
  0x3a   :  { %s144_s6 = sshll.u32 %s2065_s27, 4  ;;  %s188_s29 = sshll.u32 %s2507_s15, 4  ;;  %s145_s6 = int_to_ptr.vmem [resolvable:$true] %s144_s6  ;;  %s189_s29 = int_to_ptr.hbm [resolvable:$true] %s188_s29 }
  0x3b   :  { %147 = dma.hbm_to_vmem [thread:$0]  %s143_s1, 16, %s145_s6, [#allocation15]  }
  0x3c   :  { %s2066_s3 = smov [#allocation19]   ;;  %s2067_s0 = smov [#allocation22]  }
  0x3d   :  { %s166_s11 = sshll.u32 %s2066_s3, 4  ;;  %s190_s12 = sshll.u32 %s2067_s0, 4  ;;  %s167_s11 = int_to_ptr.vmem [resolvable:$true] %s166_s11  ;;  %s191_s12 = int_to_ptr.vmem [resolvable:$true] %s190_s12 }
  0x3e   :  { %169 = dma.hbm_to_vmem [thread:$0]  %s165_s10, 16, %s167_s11, [#allocation18]  }
  0x3f   :  { %s217_s24 = sshll.u32 %s2513_s21, 4  ;;  %s2068_s13 = smov [#allocation25]   ;;  %s218_s24 = int_to_ptr.hbm [resolvable:$true] %s217_s24 }
  0x40   :  { %193 = dma.hbm_to_vmem [thread:$0]  %s189_s29, 16, %s191_s12, [#allocation21]  }
  0x41   :  { %s219_s5 = sshll.u32 %s2068_s13, 4  ;;  %s220_s5 = int_to_ptr.vmem [resolvable:$true] %s219_s5 }
  0x42   :  { %225 = dma.hbm_to_vmem [thread:$0]  %s218_s24, 256, %s220_s5, [#allocation24], %s2056_s23, %s2056_s23, %s2057_s7  }
  0x43   :  { %2032 = dma.done.wait [#allocation3], 128  }
  0x44   :  { %2033 = vsyncadd [#allocation3], 4294967168 }
  0x45   :  { %2034 = dma.done.wait [#allocation6], 48  }
  0x46   :  { %2035 = vsyncadd [#allocation6], 4294967248 }
  0x47   :  { %2036 = dma.done.wait [#allocation9], 32  }
  0x48   :  { %2037 = vsyncadd [#allocation9], 4294967264 }
  0x49   :  { %2038 = dma.done.wait [#allocation12], 32  }
  0x4a   :  { %2039 = vsyncadd [#allocation12], 4294967264 }
  0x4b   :  { %2040 = dma.done.wait [#allocation15], 272  }
  0x4c   :  { %2041 = vsyncadd [#allocation15], 4294967024 }
  0x4d   :  { %2042 = dma.done.wait [#allocation18], 32  }
  0x4e   :  { %2043 = vsyncadd [#allocation18], 4294967264 }
  0x4f   :  { %2044 = dma.done.wait [#allocation21], 272  }
  0x50   :  { %2045 = vsyncadd [#allocation21], 4294967024 }
  0x51   :  { %2046 = dma.done.wait [#allocation24], 272  }
  0x52   :  { %2047 = vsyncadd [#allocation24], 4294967024  ;;  %v1545_v0 = vld [vmem:[#allocation2] sm:$0xff]   ;;  %vm295_vm0 = vcmask 261120   ;;  %v2069_v5 = vmov 32.0   ;;  %s2534_s14 = sld [smem:[#allocation40_spill]] }
  0x53   :  { %v1546_v1 = vunpack.c.l.bf16 %v1545_v0  ;;  %v1547_v3 = vunpack.c.h.bf16 %v1545_v0  ;;  %1588 = vrcp.f32 %v2069_v5  ;;  %s2535_s1 = sld [smem:[#allocation42_spill]]  ;;  %v1535_v24 = vld [vmem:[%s2500_s8 + $0x8] sm:$0xff]  ;;  %v1534_v29 = vld [vmem:[%s2500_s8] sm:$0xff]  ;;  %v1577_v57 = vld [vmem:[#allocation11] ss:$0 sm:$0xff]  ;;  %vm481_vm8 = vcmask 64512  }
  0x54   :  { %455 = vmatpush.bf16.msra.mxu2 %v1535_v24  ;;  %v1574_v47 = vld [vmem:[#allocation7] ss:$0 sm:$0xff]  ;;  %v1575_v52 = vld [vmem:[#allocation8] ss:$0 sm:$0xff]  ;;  %v1576_v58 = vld [vmem:[#allocation10] ss:$0 sm:$0xff] }
  0x55   :  { %v296_v2 = vsel %vm295_vm0, %v1546_v1, 0.0  ;;  %v299_v4 = vsel %vm295_vm0, %v1547_v3, 0.0  ;;  %v1578_v0 = vld [vmem:[#allocation13] ss:$0 sm:$0xff]  ;;  %s2070_s8 = smov 120   ;;  %vm547_vm9 = vcmask 1043456  }
  0x56   :  { %297 = vadd.xlane.f32.xlu0 %v296_v2  ;;  %s2071_s20 = smov 112   ;;  %s2072_s29 = smov 104  }
  0x57   :  { %s2073_s3 = smov 96   ;;  %s2536_s26 = sld [smem:[#allocation44_spill]] }
  0x58   :  { %v1531_v22 = vld [vmem:[%s2534_s14 + $0x8] sm:$0xff]  ;;  %v1530_v26 = vld [vmem:[%s2534_s14] sm:$0xff]  ;;  %456 = vmatpush.bf16.msra.mxu2 %v1534_v29  ;;  %s2075_s2 = smov [#allocation26]   ;;  %s2537_s17 = sld [smem:[#allocation45_spill]] }
  0x59   :  { %v1589_v6 = vpop.eup %1588  ;;  %v1533_v23 = vld [vmem:[%s2535_s1 + $0x8] sm:$0xff]  ;;  %387 = vmatpush.bf16.msra.mxu0 %v1531_v22  ;;  %v1532_v27 = vld [vmem:[%s2535_s1] sm:$0xff]  ;;  %s1424_s27 = sshll.u32 %s2075_s2, 4  ;;  %s1425_s27 = int_to_ptr.vmem [resolvable:$true] %s1424_s27 }
  0x5a   :  { %v303_v7 = vmul.f32 32.0, %v1589_v6  ;;  %vm307_vm1 = vweird.f32 %v1589_v6  ;;  %421 = vmatpush.bf16.msra.mxu1 %v1533_v23 }
  0x5c   :  { %v304_v8 = vsub.f32 1.0, %v303_v7 }
  0x5d   :  { %388 = vmatpush.bf16.msra.mxu0 %v1530_v26 }
  0x5e   :  { %300 = vadd.xlane.f32.xlu0 %v299_v4  ;;  %v305_v9 = vmul.f32 %v1589_v6, %v304_v8  ;;  %422 = vmatpush.bf16.msra.mxu1 %v1532_v27  ;;  %s1426_s28 = sshll.u32 %s2537_s17, 4  ;;  %s1427_s28 = int_to_ptr.hbm [resolvable:$true] %s1426_s28 }
  0x60   :  { %v306_v10 = vadd.f32 %v1589_v6, %v305_v9 }
  0x62   :  { %v2255_v11 = vsel %vm307_vm1, %v1589_v6, %v306_v10 }
  0xc9   :  { %v298_v12 = vpop.xlane.xlu0 %297 }
  0xca   :  { %v309_v13 = vmul.f32 %v2255_v11, %v298_v12 }
  0xcc   :  { %v311_v14 = vsub.f32 %v1546_v1, %v309_v13 }
  0xce   :  { %v313_v15 = vmul.f32 %v311_v14, %v311_v14 }
  0xd0   :  { %v315_v16 = vsel %vm295_vm0, %v313_v15, 0.0 }
  0xd1   :  { %316 = vadd.xlane.f32.xlu1 %v315_v16  ;;  %v301_v17 = vpop.xlane.xlu0 %300 }
  0xd2   :  { %v310_v18 = vmul.f32 %v2255_v11, %v301_v17 }
  0xd4   :  { %v312_v19 = vsub.f32 %v1547_v3, %v310_v18 }
  0xd6   :  { %v314_v20 = vmul.f32 %v312_v19, %v312_v19 }
  0xd8   :  { %v318_v21 = vsel %vm295_vm0, %v314_v20, 0.0 }
  0xd9   :  { %319 = vadd.xlane.f32.xlu1 %v318_v21 }
 0x144   :  { %v317_v25 = vpop.xlane.xlu1 %316 }
 0x145   :  { %v321_v28 = vmul.f32 %v317_v25, %v2255_v11 }
 0x147   :  { %v323_v30 = vadd.f32 1e-12, %v321_v28 }
 0x149   :  { %1590 = vrsqrt.f32 %v323_v30  ;;  %vm331_vm3 = vweird.f32 %v323_v30 }
 0x14c   :  { %v320_v31 = vpop.xlane.xlu1 %319 }
 0x14d   :  { %v322_v32 = vmul.f32 %v320_v31, %v2255_v11 }
 0x14f   :  { %v1591_v33 = vpop.eup %1590  ;;  %v324_v34 = vadd.f32 1e-12, %v322_v32 }
 0x150   :  { %v326_v35 = vmul.f32 %v1591_v33, %v323_v30  ;;  %vm332_vm2 = vweird.f32 %v1591_v33 }
 0x151   :  { %1592 = vrsqrt.f32 %v324_v34  ;;  %vm333_vm4 = vmor %vm331_vm3, %vm332_vm2  ;;  %vm341_vm6 = vweird.f32 %v324_v34  ;;  %vm1313_vm2 = vcmask 1041409  }
 0x152   :  { %v327_v36 = vmul.f32 %v1591_v33, %v326_v35 }
 0x154   :  { %v328_v37 = vmul.f32 0.5, %v327_v36 }
 0x156   :  { %v329_v38 = vsub.f32 1.5, %v328_v37 }
 0x157   :  { %v1593_v39 = vpop.eup %1592 }
 0x158   :  { %v330_v40 = vmul.f32 %v1591_v33, %v329_v38  ;;  %v336_v41 = vmul.f32 %v1593_v39, %v324_v34  ;;  %vm342_vm5 = vweird.f32 %v1593_v39 }
 0x159   :  { %vm343_vm7 = vmor %vm341_vm6, %vm342_vm5 }
 0x15a   :  { %v337_v42 = vmul.f32 %v1593_v39, %v336_v41  ;;  %v334_v43 = vsel %vm333_vm4, %v1591_v33, %v330_v40  ;;  %v2322_v33 = vld [vmem:[#allocation5] ss:$0 sm:$0xff] }
 0x15b   :  { %v345_v46 = vmul.f32 %v334_v43, %v311_v14 }
 0x15c   :  { %v338_v44 = vmul.f32 0.5, %v337_v42 }
 0x15d   :  { %v350_v51 = vmul.f32 %v1574_v47, %v345_v46 }
 0x15e   :  { %v339_v45 = vsub.f32 1.5, %v338_v44 }
 0x15f   :  { %v2281_v54 = vadd.f32 %v1575_v52, %v350_v51  ;;  %v2331_v51 = vld [vmem:[#allocation5 + $0x1] ss:$0 sm:$0xff] }
 0x160   :  { %v340_v48 = vmul.f32 %v1593_v39, %v339_v45 }
 0x162   :  { %v344_v49 = vsel %vm343_vm7, %v1593_v39, %v340_v48 }
 0x163   :  { %v346_v50 = vmul.f32 %v344_v49, %v312_v19 }
 0x165   :  { %v351_v53 = vmul.f32 %v1574_v47, %v346_v50 }
 0x167   :  { %v2283_v55 = vadd.f32 %v1575_v52, %v351_v53 }
 0x169   :  { %v357_v56 = vpack.c.bf16 %v2283_v55, %v2281_v54 }
 0x16b   :  { %1454 = vmatmul.msk.bf16.vlgmr.msra.gmra.mxu0 %vm295_vm0, %v357_v56  ;;  %1463 = vmatmul.msk.bf16.vlgmr.msra.gmra.mxu1 %vm295_vm0, %v357_v56 }
 0x16c   :  { %1472 = vmatmul.msk.bf16.vlgmr.msra.gmra.mxu2 %vm295_vm0, %v357_v56 }
 0x1e8   :  { %v390_v59 = vpop.f32.mrf.mxu0  ;;  %v424_v60 = vpop.f32.mrf.mxu1 }
 0x1e9   :  { %v425_v61 = vadd.f32 %v1577_v57, %v424_v60  ;;  %v391_v63 = vadd.f32 %v1576_v58, %v390_v59 }
 0x1eb   :  { %v465_v62 = vpack.c.bf16 %v425_v61, %v425_v61  ;;  %v463_v5 = vpack.c.bf16 %v391_v63, %v391_v63 }
 0x1ed   :  { %v590_v1 = vunpack.c.l.b16 %v465_v62  ;;  %v486_v2 = vsel %vm481_vm8, %v465_v62, 0  ;;  %v585_v15 = vunpack.c.l.b16 %v463_v5 }
 0x1ee   :  { %495 = vmatpush.bf16.xpose.msra.mxu3 %v486_v2 }
 0x1ef   :  { %v2291_v3 = vpack.c.b16 %v590_v1, %v590_v1  ;;  %v458_v4 = vpop.f32.mrf.mxu2  ;;  %v2305_v23 = vpack.c.b16 %v585_v15, %v585_v15 }
 0x1f0   :  { %v459_v6 = vadd.f32 %v1578_v0, %v458_v4  ;;  %v392_v7 = vpop.f32.mrf.mxu0  ;;  %v426_v8 = vpop.f32.mrf.mxu1 }
 0x1f1   :  { %v393_v9 = vadd.f32 %v1576_v58, %v392_v7  ;;  %v427_v10 = vadd.f32 %v1577_v57, %v426_v8  ;;  %592 = vrot.lane.b32.xlu2 %v2291_v3, %s2070_s8 }
 0x1f2   :  { %v2295_v12 = vpack.c.bf16 %v459_v6, %v459_v6 }
 0x1f3   :  { %v464_v13 = vpack.c.bf16 %v393_v9, %v393_v9  ;;  %v466_v14 = vpack.c.bf16 %v427_v10, %v427_v10 }
 0x1f4   :  { %v549_v16 = vsel %vm547_vm9, %v2295_v12, 0  ;;  %v667_v61 = vunpack.c.l.b16 %v2295_v12 }
 0x1f5   :  { %v614_v17 = vunpack.c.l.b16 %v464_v13  ;;  %v619_v18 = vunpack.c.l.b16 %v466_v14  ;;  %558 = vmatpush.bf16.msrb.mxu1 %v549_v16  ;;  %1473 = vmatmul.msk.bf16.vlgmr.msra.gmra.mxu3 %vm481_vm8, %v463_v5  ;;  %v505_v19 = vsel %vm481_vm8, %v466_v14, 0 }
 0x1f6   :  { %514 = vmatpush.bf16.xpose.msrb.mxu0 %v505_v19  ;;  %v2341_v63 = vpack.c.b16 %v667_v61, %v667_v61 }
 0x1f7   :  { %v2301_v20 = vpack.c.b16 %v614_v17, %v614_v17  ;;  %v2303_v21 = vpack.c.b16 %v619_v18, %v619_v18  ;;  %v460_v22 = vpop.f32.mrf.mxu2 }
 0x1f8   :  { %v461_v24 = vadd.f32 %v1578_v0, %v460_v22 }
 0x1f9   :  { %621 = vrot.lane.b32.xlu0 %v2303_v21, %s2070_s8  ;;  %616 = vrot.lane.b32.xlu1 %v2301_v20, %s2070_s8 }
 0x1fa   :  { %v2311_v25 = vpack.c.bf16 %v461_v24, %v461_v24  ;;  %587 = vrot.lane.b32.xlu2 %v2305_v23, %s2070_s8 }
 0x1fc   :  { %v568_v26 = vsel %vm547_vm9, %v2311_v25, 0 }
 0x1fd   :  { %577 = vmatpush.bf16.msrb.mxu2 %v568_v26  ;;  %1474 = vmatmul.msk.bf16.vlgmr.msrb.gmra.mxu0 %vm481_vm8, %v464_v13  ;;  %v691_v13 = vunpack.c.l.b16 %v2311_v25 }
 0x1ff   :  { %v2350_v14 = vpack.c.b16 %v691_v13, %v691_v13 }
 0x24b   :  { %v593_v27 = vpop.permute.xlu2 %592 }
 0x24c   :  { %v598_v28 = vsel %vm481_vm8, %v593_v27, 0 }
 0x24d   :  { %607 = vmatpush.bf16.xpose.msrb.mxu3 %v598_v28 }
 0x254   :  { %v588_v29 = vpop.permute.xlu2 %587 }
 0x255   :  { %1477 = vmatmul.msk.bf16.vlgmr.msrb.gmra.mxu3 %vm481_vm8, %v588_v29 }
 0x26b   :  { %v622_v30 = vpop.permute.xlu0 %621  ;;  %v617_v32 = vpop.permute.xlu1 %616 }
 0x26c   :  { %v627_v31 = vsel %vm481_vm8, %v622_v30, 0 }
 0x26d   :  { %636 = vmatpush.bf16.xpose.msra.mxu0 %v627_v31 }
 0x274   :  { %1478 = vmatmul.msk.bf16.vlgmr.msra.gmra.mxu0 %vm481_vm8, %v617_v32 }
 0x278   :  { %v497_v34 = vpop.f32.mrf.mxu3 }
 0x279   :  { %v498_v35 = vadd.f32 %v2322_v33, %v497_v34 }
 0x27a   :  { %v516_v36 = vpop.f32.mrf.mxu0 }
 0x27b   :  { %v520_v37 = vsel %vm481_vm8, %v498_v35, -inf  ;;  %v517_v8 = vadd.f32 %v2331_v51, %v516_v36 }
 0x27c   :  { %521 = vmax.xlane.f32.xlu2 %v520_v37 }
 0x27d   :  { %v523_v9 = vsel %vm481_vm8, %v517_v8, -inf }
 0x280   :  { %v499_v38 = vpop.f32.mrf.mxu3 }
 0x282   :  { %v518_v39 = vpop.f32.mrf.mxu0 }
 0x2d8   :  { %v609_v40 = vpop.f32.mrf.mxu3 }
 0x2d9   :  { %v610_v41 = vadd.f32 %v2322_v33, %v609_v40 }
 0x2db   :  { %v642_v42 = vsel %vm481_vm8, %v610_v41, -inf }
 0x2dc   :  { %643 = vmax.xlane.f32.xlu0 %v642_v42 }
 0x2e0   :  { %v611_v43 = vpop.f32.mrf.mxu3 }
 0x2ef   :  { %v522_v44 = vpop.xlane.xlu2 %521 }
 0x2f0   :  { %757 = vrot.lane.b32.xlu0 %v2291_v3, %s2071_s20  ;;  %v526_v45 = vsub.f32 %v498_v35, %v522_v44 }
 0x2f1   :  { %v638_v46 = vpop.f32.mrf.mxu0 }
 0x2f2   :  { %v528_v47 = vmul.f32 1.442695, %v526_v45  ;;  %v639_v52 = vadd.f32 %v2331_v51, %v638_v46 }
 0x2f4   :  { %1594 = vpow2.f32 %v528_v47  ;;  %v645_v53 = vsel %vm481_vm8, %v639_v52, -inf }
 0x2f9   :  { %v640_v48 = vpop.f32.mrf.mxu0 }
 0x2fa   :  { %v1595_v49 = vpop.eup %1594 }
 0x2fb   :  { %v532_v50 = vsel %vm481_vm8, %v1595_v49, 0.0 }
 0x2fc   :  { %533 = vadd.xlane.f32.xlu1 %v532_v50 }
 0x315   :  { %755 = vrot.lane.b32.xlu1 %v2305_v23, %s2071_s20 }
 0x31a   :  { %646 = vmax.xlane.f32.xlu0 %v645_v53 }
 0x32e   :  { %780 = vrot.lane.b32.xlu0 %v2303_v21, %s2071_s20 }
 0x34f   :  { %v644_v56 = vpop.xlane.xlu0 %643 }
 0x350   :  { %v648_v57 = vsub.f32 %v610_v41, %v644_v56 }
 0x352   :  { %v650_v58 = vmul.f32 1.442695, %v648_v57 }
 0x354   :  { %1596 = vpow2.f32 %v650_v58 }
 0x35a   :  { %v1597_v59 = vpop.eup %1596 }
 0x35b   :  { %v654_v60 = vsel %vm481_vm8, %v1597_v59, 0.0 }
 0x35c   :  { %655 = vadd.xlane.f32.xlu2 %v654_v60 }
 0x362   :  { %v758_v4 = vpop.permute.xlu0 %757 }
 0x363   :  { %v763_v22 = vsel %vm481_vm8, %v758_v4, 0 }
 0x36f   :  { %v534_v62 = vpop.xlane.xlu1 %533 }
 0x370   :  { %1598 = vrcp.f32 %v534_v62 }
 0x374   :  { %669 = vrot.lane.b32.xlu2 %v2341_v63, %s2070_s8 }
 0x376   :  { %v1599_v0 = vpop.eup %1598 }
 0x377   :  { %v540_v1 = vmul.f32 %v1599_v0, %v1595_v49 }
 0x379   :  { %v542_v2 = vpack.c.bf16 %v540_v1, %v540_v1 }
 0x37b   :  { %1475 = vmatmul.msk.bf16.vlgmr.msrb.gmra.mxu1 %vm481_vm8, %v542_v2  ;;  %v471_v2 = vld [vmem:[#allocation14] sm:$0xf] }
 0x37c   :  { %v739_v4 = vsel %vm547_vm9, %v471_v2, 0 }
 0x37d   :  { %748 = vmatpush.bf16.msrb.mxu0 %v739_v4 }
 0x387   :  { %v756_v25 = vpop.permute.xlu1 %755 }
 0x38d   :  { %v647_v5 = vpop.xlane.xlu0 %646 }
 0x38e   :  { %v649_v6 = vsub.f32 %v639_v52, %v647_v5 }
 0x390   :  { %v652_v7 = vmul.f32 1.442695, %v649_v6 }
 0x392   :  { %1600 = vpow2.f32 %v652_v7 }
 0x398   :  { %v1601_v10 = vpop.eup %1600 }
 0x399   :  { %v657_v12 = vsel %vm481_vm8, %v1601_v10, 0.0 }
 0x39d   :  { %524 = vmax.xlane.f32.xlu2 %v523_v9 }
 0x3a0   :  { %v781_v45 = vpop.permute.xlu0 %780 }
 0x3a1   :  { %v786_v47 = vsel %vm481_vm8, %v781_v45, 0 }
 0x3a5   :  { %658 = vadd.xlane.f32.xlu2 %v657_v12 }
 0x3bd   :  { %693 = vrot.lane.b32.xlu2 %v2350_v14, %s2070_s8 }
 0x3cf   :  { %v656_v15 = vpop.xlane.xlu2 %655 }
 0x3d0   :  { %1602 = vrcp.f32 %v656_v15 }
 0x3d6   :  { %v1603_v16 = vpop.eup %1602 }
 0x3d7   :  { %v662_v17 = vmul.f32 %v1603_v16, %v1597_v59  ;;  %v670_v18 = vpop.permute.xlu2 %669 }
 0x3d8   :  { %v675_v19 = vsel %vm547_vm9, %v670_v18, 0 }
 0x3d9   :  { %v664_v24 = vpack.c.bf16 %v662_v17, %v662_v17  ;;  %684 = vmatpush.bf16.msra.mxu1 %v675_v19 }
 0x3dc   :  { %1479 = vmatmul.msk.bf16.vlgmr.msra.gmra.mxu1 %vm481_vm8, %v664_v24 }
 0x3dd   :  { %772 = vmatpush.bf16.xpose.msrb.mxu1 %v763_v22 }
 0x3ec   :  { %1483 = vmatmul.msk.bf16.vlgmr.msrb.gmra.mxu1 %vm481_vm8, %v756_v25 }
 0x3f8   :  { %v2358_v26 = vpop.f32.mrf.mxu1 }
 0x400   :  { %v562_v27 = vpop.f32.mrf.mxu1 }
 0x410   :  { %v525_v28 = vpop.xlane.xlu2 %524 }
 0x411   :  { %v527_v29 = vsub.f32 %v517_v8, %v525_v28 }
 0x413   :  { %v530_v30 = vmul.f32 1.442695, %v527_v29 }
 0x415   :  { %1604 = vpow2.f32 %v530_v30 }
 0x418   :  { %v659_v31 = vpop.xlane.xlu2 %658 }
 0x41b   :  { %v1605_v32 = vpop.eup %1604 }
 0x41c   :  { %v535_v34 = vsel %vm481_vm8, %v1605_v32, 0.0 }
 0x41d   :  { %536 = vadd.xlane.f32.xlu1 %v535_v34 }
 0x420   :  { %v694_v35 = vpop.permute.xlu2 %693 }
 0x421   :  { %v699_v36 = vsel %vm547_vm9, %v694_v35, 0 }
 0x422   :  { %708 = vmatpush.bf16.msra.mxu2 %v699_v36 }
 0x436   :  { %778 = vrot.lane.b32.xlu1 %v2301_v20, %s2071_s20 }
 0x43e   :  { %825 = vrot.lane.b32.xlu1 %v2341_v63, %s2071_s20 }
 0x446   :  { %892 = vrot.lane.b32.xlu1 %v2291_v3, %s2072_s29  ;;  %v472_v3 = vld [vmem:[#allocation14 + $0x4] sm:$0xf] }
 0x44e   :  { %915 = vrot.lane.b32.xlu1 %v2303_v21, %s2072_s29  ;;  %v719_v21 = vsel %vm547_vm9, %v472_v3, 0 }
 0x44f   :  { %728 = vmatpush.bf16.msra.mxu3 %v719_v21 }
 0x456   :  { %890 = vrot.lane.b32.xlu1 %v2305_v23, %s2072_s29 }
 0x459   :  { %v686_v37 = vpop.f32.mrf.mxu1 }
 0x461   :  { %v688_v38 = vpop.f32.mrf.mxu1 }
 0x469   :  { %v774_v39 = vpop.f32.mrf.mxu1 }
 0x46a   :  { %v775_v40 = vadd.f32 %v2322_v33, %v774_v39 }
 0x46c   :  { %v801_v41 = vsel %vm481_vm8, %v775_v40, -inf }
 0x46d   :  { %802 = vmax.xlane.f32.xlu0 %v801_v41 }
 0x471   :  { %v776_v42 = vpop.f32.mrf.mxu1 }
 0x481   :  { %913 = vrot.lane.b32.xlu0 %v2301_v20, %s2072_s29 }
 0x490   :  { %v537_v43 = vpop.xlane.xlu1 %536 }
 0x491   :  { %1606 = vrcp.f32 %v537_v43 }
 0x492   :  { %1608 = vrcp.f32 %v659_v31 }
 0x497   :  { %v1607_v44 = vpop.eup %1606 }
 0x498   :  { %v541_v23 = vmul.f32 %v1607_v44, %v1605_v32  ;;  %v1609_v48 = vpop.eup %1608 }
 0x499   :  { %v663_v49 = vmul.f32 %v1609_v48, %v1601_v10 }
 0x49a   :  { %v543_v46 = vpack.c.bf16 %v541_v23, %v541_v23 }
 0x49b   :  { %v665_v20 = vpack.c.bf16 %v663_v49, %v663_v49 }
 0x49c   :  { %1476 = vmatmul.msk.bf16.vlgmr.msrb.gmra.mxu2 %vm481_vm8, %v543_v46 }
 0x49d   :  { %795 = vmatpush.bf16.xpose.msrb.mxu2 %v786_v47 }
 0x4a8   :  { %v779_v50 = vpop.permute.xlu1 %778 }
 0x4ac   :  { %1480 = vmatmul.msk.bf16.vlgmr.msra.gmra.mxu2 %vm481_vm8, %v665_v20 }
 0x4b0   :  { %v826_v52 = vpop.permute.xlu1 %825 }
 0x4b1   :  { %v831_v53 = vsel %vm547_vm9, %v826_v52, 0 }
 0x4b2   :  { %840 = vmatpush.bf16.msrb.mxu3 %v831_v53 }
 0x4b8   :  { %v893_v56 = vpop.permute.xlu1 %892 }
 0x4b9   :  { %v898_v57 = vsel %vm481_vm8, %v893_v56, 0 }
 0x4ba   :  { %907 = vmatpush.bf16.xpose.msra.mxu2 %v898_v57 }
 0x4bc   :  { %1484 = vmatmul.msk.bf16.vlgmr.msrb.gmra.mxu2 %vm481_vm8, %v779_v50 }
 0x4c0   :  { %v916_v58 = vpop.permute.xlu1 %915 }
 0x4c1   :  { %v921_v10 = vsel %vm481_vm8, %v916_v58, 0 }
 0x4c8   :  { %v891_v59 = vpop.permute.xlu1 %890 }
 0x4cc   :  { %1488 = vmatmul.msk.bf16.vlgmr.msra.gmra.mxu2 %vm481_vm8, %v891_v59 }
 0x4e0   :  { %v803_v60 = vpop.xlane.xlu0 %802 }
 0x4e1   :  { %v807_v61 = vsub.f32 %v775_v40, %v803_v60 }
 0x4e3   :  { %v809_v62 = vmul.f32 1.442695, %v807_v61 }
 0x4e5   :  { %1610 = vpow2.f32 %v809_v62 }
 0x4eb   :  { %v1611_v0 = vpop.eup %1610 }
 0x4ec   :  { %v813_v1 = vsel %vm481_vm8, %v1611_v0, 0.0 }
 0x4ed   :  { %814 = vadd.xlane.f32.xlu2 %v813_v1  ;;  %v473_v1 = vld [vmem:[#allocation14 + $0x8] sm:$0xf] }
 0x4ee   :  { %v872_v2 = vsel %vm547_vm9, %v473_v1, 0 }
 0x4ef   :  { %881 = vmatpush.bf16.msra.mxu1 %v872_v2 }
 0x4f3   :  { %v914_v29 = vpop.permute.xlu0 %913 }
 0x51f   :  { %v579_v5 = vpop.f32.mrf.mxu2 }
 0x520   :  { %v583_v6 = vpack.c.bf16 %v579_v5, %v2358_v26 }
 0x522   :  { %1482 = vmatmul.msk.bf16.vlgmr.msrb.gmra.mxu0 %vm481_vm8, %v583_v6 }
 0x527   :  { %v581_v7 = vpop.f32.mrf.mxu2 }
 0x52f   :  { %v710_v8 = vpop.f32.mrf.mxu2 }
 0x530   :  { %v714_v9 = vpack.c.bf16 %v710_v8, %v686_v37 }
 0x532   :  { %1481 = vmatmul.msk.bf16.vlgmr.msra.gmra.mxu3 %vm481_vm8, %v714_v9 }
 0x533   :  { %930 = vmatpush.bf16.xpose.msra.mxu3 %v921_v10 }
 0x537   :  { %v712_v12 = vpop.f32.mrf.mxu2 }
 0x53f   :  { %v797_v13 = vpop.f32.mrf.mxu2 }
 0x540   :  { %v798_v15 = vadd.f32 %v2331_v51, %v797_v13 }
 0x542   :  { %v804_v16 = vsel %vm481_vm8, %v798_v15, -inf }
 0x543   :  { %805 = vmax.xlane.f32.xlu2 %v804_v16 }
 0x547   :  { %v799_v17 = vpop.f32.mrf.mxu2 }
 0x54f   :  { %v909_v18 = vpop.f32.mrf.mxu2 }
 0x550   :  { %v910_v19 = vadd.f32 %v2322_v33, %v909_v18 }
 0x552   :  { %v936_v22 = vsel %vm481_vm8, %v910_v19, -inf }
 0x553   :  { %937 = vmax.xlane.f32.xlu0 %v936_v22 }
 0x557   :  { %v911_v24 = vpop.f32.mrf.mxu2 }
 0x55b   :  { %846 = vrot.lane.b32.xlu2 %v2350_v14, %s2071_s20 }
 0x560   :  { %v815_v25 = vpop.xlane.xlu2 %814 }
 0x561   :  { %1612 = vrcp.f32 %v815_v25 }
 0x567   :  { %v1613_v26 = vpop.eup %1612  ;;  %960 = vrot.lane.b32.xlu0 %v2341_v63, %s2072_s29 }
 0x568   :  { %v821_v27 = vmul.f32 %v1613_v26, %v1611_v0 }
 0x56a   :  { %v823_v28 = vpack.c.bf16 %v821_v27, %v821_v27 }
 0x56c   :  { %1485 = vmatmul.msk.bf16.vlgmr.msrb.gmra.mxu3 %vm481_vm8, %v823_v28  ;;  %v1581_v28 = vld [vmem:[#allocation16] ss:$0 sm:$0xff] }
 0x57c   :  { %1489 = vmatmul.msk.bf16.vlgmr.msra.gmra.mxu3 %vm481_vm8, %v914_v29 }
 0x59f   :  { %v750_v33 = vpop.f32.mrf.mxu0 }
 0x5a7   :  { %v752_v4 = vpop.f32.mrf.mxu0 }
 0x5b5   :  { %v730_v30 = vpop.f32.mrf.mxu3 }
 0x5b6   :  { %v2400_v31 = vadd.f32 %v750_v33, %v730_v30  ;;  %v806_v32 = vpop.xlane.xlu2 %805 }
 0x5b7   :  { %v808_v34 = vsub.f32 %v798_v15, %v806_v32 }
 0x5b9   :  { %v811_v35 = vmul.f32 1.442695, %v808_v34 }
 0x5bb   :  { %1614 = vpow2.f32 %v811_v35 }
 0x5bd   :  { %v732_v44 = vpop.f32.mrf.mxu3 }
 0x5be   :  { %v847_v36 = vpop.permute.xlu2 %846  ;;  %v753_v32 = vadd.f32 %v752_v4, %v732_v44 }
 0x5bf   :  { %v852_v37 = vsel %vm547_vm9, %v847_v36, 0 }
 0x5c0   :  { %861 = vmatpush.bf16.msra.mxu0 %v852_v37 }
 0x5c1   :  { %v1615_v63 = vpop.eup %1614 }
 0x5c2   :  { %v816_v38 = vsel %vm481_vm8, %v1615_v63, 0.0 }
 0x5c3   :  { %817 = vadd.xlane.f32.xlu1 %v816_v38 }
 0x5c6   :  { %v938_v39 = vpop.xlane.xlu0 %937 }
 0x5c7   :  { %v942_v40 = vsub.f32 %v910_v19, %v938_v39  ;;  %v474_v19 = vld [vmem:[#allocation14 + $0xc] sm:$0xf] }
 0x5c8   :  { %v1007_v22 = vsel %vm547_vm9, %v474_v19, 0  ;;  %v1541_v19 = vld [vmem:[%s2508_s16 + $0x18] sm:$0xff] }
 0x5c9   :  { %v944_v41 = vmul.f32 1.442695, %v942_v40  ;;  %1016 = vmatpush.bf16.msrb.mxu2 %v1007_v22  ;;  %v1537_v40 = vld [vmem:[#allocation20 + $0x8] sm:$0xff] }
 0x5ca   :  { %1119 = vmatpush.bf16.msrb.mxu3 %v1537_v40 }
 0x5cb   :  { %1616 = vpow2.f32 %v944_v41 }
 0x5d1   :  { %v1617_v42 = vpop.eup %1616 }
 0x5d2   :  { %v948_v43 = vsel %vm481_vm8, %v1617_v42, 0.0 }
 0x5d3   :  { %949 = vadd.xlane.f32.xlu1 %v948_v43 }
 0x5d9   :  { %v961_v3 = vpop.permute.xlu0 %960 }
 0x5da   :  { %v966_v21 = vsel %vm547_vm9, %v961_v3, 0 }
 0x5db   :  { %975 = vmatpush.bf16.msrb.mxu0 %v966_v21 }
 0x5ef   :  { %v842_v23 = vpop.f32.mrf.mxu3 }
 0x5f7   :  { %v844_v45 = vpop.f32.mrf.mxu3 }
 0x5ff   :  { %v932_v46 = vpop.f32.mrf.mxu3 }
 0x600   :  { %v933_v47 = vadd.f32 %v2331_v51, %v932_v46 }
 0x602   :  { %v939_v48 = vsel %vm481_vm8, %v933_v47, -inf }
 0x603   :  { %940 = vmax.xlane.f32.xlu2 %v939_v48 }
 0x607   :  { %v934_v49 = vpop.f32.mrf.mxu3 }
 0x636   :  { %v818_v50 = vpop.xlane.xlu1 %817 }
 0x637   :  { %1618 = vrcp.f32 %v818_v50 }
 0x63d   :  { %v1619_v20 = vpop.eup %1618 }
 0x63e   :  { %v822_v52 = vmul.f32 %v1619_v20, %v1615_v63 }
 0x640   :  { %v824_v53 = vpack.c.bf16 %v822_v52, %v822_v52 }
 0x642   :  { %1486 = vmatmul.msk.bf16.vlgmr.msra.gmra.mxu0 %vm481_vm8, %v824_v53  ;;  %v2430_v53 = vld [vmem:[#allocation22] ss:$0 sm:$0xff] }
 0x646   :  { %v950_v56 = vpop.xlane.xlu1 %949 }
 0x647   :  { %1620 = vrcp.f32 %v950_v56 }
 0x64d   :  { %v1621_v57 = vpop.eup %1620 }
 0x64e   :  { %v956_v58 = vmul.f32 %v1621_v57, %v1617_v42  ;;  %v1536_v42 = vld [vmem:[#allocation20] sm:$0xff] }
 0x64f   :  { %1120 = vmatpush.bf16.msrb.mxu3 %v1536_v42 }
 0x650   :  { %v958_v59 = vpack.c.bf16 %v956_v58, %v956_v58 }
 0x652   :  { %1490 = vmatmul.msk.bf16.vlgmr.msrb.gmra.mxu0 %vm481_vm8, %v958_v59 }
 0x676   :  { %v941_v60 = vpop.xlane.xlu2 %940 }
 0x677   :  { %v943_v51 = vsub.f32 %v933_v47, %v941_v60 }
 0x679   :  { %v946_v61 = vmul.f32 1.442695, %v943_v51 }
 0x67b   :  { %1622 = vpow2.f32 %v946_v61 }
 0x681   :  { %v1623_v62 = vpop.eup %1622 }
 0x682   :  { %v951_v0 = vsel %vm481_vm8, %v1623_v62, 0.0 }
 0x683   :  { %952 = vadd.xlane.f32.xlu1 %v951_v0 }
 0x69c   :  { %981 = vrot.lane.b32.xlu1 %v2350_v14, %s2072_s29 }
 0x6bf   :  { %v863_v5 = vpop.f32.mrf.mxu0 }
 0x6c0   :  { %v867_v6 = vpack.c.bf16 %v863_v5, %v842_v23 }
 0x6c2   :  { %1487 = vmatmul.msk.bf16.vlgmr.msra.gmra.mxu1 %vm481_vm8, %v867_v6 }
 0x6c7   :  { %v865_v7 = vpop.f32.mrf.mxu0 }
 0x6c8   :  { %v1582_v7 = vld [vmem:[#allocation17] ss:$0 sm:$0xff] }
 0x6cf   :  { %v977_v8 = vpop.f32.mrf.mxu0 }
 0x6d7   :  { %v979_v9 = vpop.f32.mrf.mxu0 }
 0x6f6   :  { %v953_v10 = vpop.xlane.xlu1 %952 }
 0x6f7   :  { %1624 = vrcp.f32 %v953_v10 }
 0x6fd   :  { %v1625_v12 = vpop.eup %1624 }
 0x6fe   :  { %v957_v13 = vmul.f32 %v1625_v12, %v1623_v62  ;;  %v1583_v12 = vld [vmem:[#allocation19] ss:$0 sm:$0xff] }
 0x700   :  { %v959_v14 = vpack.c.bf16 %v957_v13, %v957_v13 }
 0x70e   :  { %v982_v15 = vpop.permute.xlu1 %981 }
 0x70f   :  { %v987_v16 = vsel %vm547_vm9, %v982_v15, 0 }
 0x710   :  { %996 = vmatpush.bf16.msrb.mxu1 %v987_v16 }
 0x713   :  { %1491 = vmatmul.msk.bf16.vlgmr.msrb.gmra.mxu1 %vm481_vm8, %v959_v14 }
 0x714   :  { %1217 = vmatpush.bf16.msra.mxu1 %v1541_v19 }
 0x73f   :  { %v883_v17 = vpop.f32.mrf.mxu1 }
 0x740   :  { %v888_v18 = vadd.f32 %v883_v17, %v2400_v31 }
 0x747   :  { %v885_v24 = vpop.f32.mrf.mxu1 }
 0x748   :  { %v889_v35 = vadd.f32 %v885_v24, %v753_v32  ;;  %v1540_v24 = vld [vmem:[%s2508_s16 + $0x10] sm:$0xff] }
 0x749   :  { %1218 = vmatpush.bf16.msra.mxu1 %v1540_v24 }
 0x790   :  { %v998_v25 = vpop.f32.mrf.mxu1 }
 0x791   :  { %v1002_v26 = vpack.c.bf16 %v998_v25, %v977_v8 }
 0x793   :  { %1492 = vmatmul.msk.bf16.vlgmr.msrb.gmra.mxu2 %vm481_vm8, %v1002_v26  ;;  %v1539_v26 = vld [vmem:[%s2508_s16 + $0x8] sm:$0xff]  ;;  %vm1417_vm8 = vcmask 257024  }
 0x794   :  { %1246 = vmatpush.bf16.msra.mxu2 %v1539_v26 }
 0x798   :  { %v1000_v27 = vpop.f32.mrf.mxu1 }
 0x816   :  { %v1018_v29 = vpop.f32.mrf.mxu2 }
 0x817   :  { %v1023_v33 = vadd.f32 %v1018_v29, %v888_v18 }
 0x819   :  { %v1029_v30 = vadd.f32 %v1581_v28, %v1023_v33 }
 0x81b   :  { %v1031_v34 = vadd.f32 %v1029_v30, %v2281_v54 }
 0x81d   :  { %v1035_v31 = vsel %vm295_vm0, %v1031_v34, 0.0 }
 0x81e   :  { %1036 = vadd.xlane.f32.xlu2 %v1035_v31  ;;  %v1020_v36 = vpop.f32.mrf.mxu2 }
 0x81f   :  { %v1024_v37 = vadd.f32 %v1020_v36, %v889_v35 }
 0x821   :  { %v1030_v63 = vadd.f32 %v1581_v28, %v1024_v37  ;;  %v1538_v28 = vld [vmem:[%s2508_s16] sm:$0xff] }
 0x822   :  { %1247 = vmatpush.bf16.msra.mxu2 %v1538_v28 }
 0x823   :  { %v1032_v38 = vadd.f32 %v1030_v63, %v2283_v55 }
 0x825   :  { %v1038_v39 = vsel %vm295_vm0, %v1032_v38, 0.0 }
 0x826   :  { %1039 = vadd.xlane.f32.xlu0 %v1038_v39 }
 0x891   :  { %v1037_v41 = vpop.xlane.xlu2 %1036 }
 0x892   :  { %v1041_v43 = vmul.f32 %v1037_v41, %v2255_v11 }
 0x894   :  { %v1043_v54 = vsub.f32 %v1031_v34, %v1041_v43 }
 0x896   :  { %v1045_v3 = vmul.f32 %v1043_v54, %v1043_v54 }
 0x898   :  { %v1047_v21 = vsel %vm295_vm0, %v1045_v3, 0.0 }
 0x899   :  { %1048 = vadd.xlane.f32.xlu2 %v1047_v21  ;;  %v1040_v44 = vpop.xlane.xlu0 %1039 }
 0x89a   :  { %v1042_v23 = vmul.f32 %v1040_v44, %v2255_v11 }
 0x89c   :  { %v1044_v45 = vsub.f32 %v1032_v38, %v1042_v23 }
 0x89e   :  { %v1046_v55 = vmul.f32 %v1044_v45, %v1044_v45 }
 0x8a0   :  { %v1050_v46 = vsel %vm295_vm0, %v1046_v55, 0.0 }
 0x8a1   :  { %1051 = vadd.xlane.f32.xlu1 %v1050_v46 }
 0x8b1   :  { %1152 = vrot.lane.b32.xlu2 %v1537_v40, %s2073_s3 }
 0x8b9   :  { %1150 = vrot.lane.b32.xlu2 %v1536_v42, %s2073_s3 }
 0x8c1   :  { %1156 = vrot.lane.b32.xlu2 %v2430_v53, %s2073_s3 }
 0x90c   :  { %v1049_v47 = vpop.xlane.xlu2 %1048 }
 0x90d   :  { %v1053_v48 = vmul.f32 %v1049_v47, %v2255_v11 }
 0x90f   :  { %v1055_v49 = vadd.f32 1e-12, %v1053_v48 }
 0x911   :  { %1626 = vrsqrt.f32 %v1055_v49  ;;  %vm1063_vm11 = vweird.f32 %v1055_v49 }
 0x914   :  { %v1052_v50 = vpop.xlane.xlu1 %1051  ;;  %v1153_v20 = vpop.permute.xlu2 %1152 }
 0x915   :  { %v1054_v52 = vmul.f32 %v1052_v50, %v2255_v11  ;;  %1165 = vmatpush.bf16.msra.mxu0 %v1153_v20 }
 0x917   :  { %v1627_v56 = vpop.eup %1626  ;;  %v1056_v57 = vadd.f32 1e-12, %v1054_v52 }
 0x918   :  { %v1058_v58 = vmul.f32 %v1627_v56, %v1055_v49  ;;  %vm1064_vm10 = vweird.f32 %v1627_v56 }
 0x919   :  { %1628 = vrsqrt.f32 %v1056_v57  ;;  %vm1065_vm12 = vmor %vm1063_vm11, %vm1064_vm10  ;;  %vm1073_vm14 = vweird.f32 %v1056_v57 }
 0x91a   :  { %v1059_v59 = vmul.f32 %v1627_v56, %v1058_v58 }
 0x91c   :  { %v1060_v60 = vmul.f32 0.5, %v1059_v59  ;;  %v1151_v51 = vpop.permute.xlu2 %1150 }
 0x91d   :  { %1166 = vmatpush.bf16.msra.mxu0 %v1151_v51 }
 0x91e   :  { %v1061_v61 = vsub.f32 1.5, %v1060_v60 }
 0x91f   :  { %v1629_v62 = vpop.eup %1628 }
 0x920   :  { %v1062_v0 = vmul.f32 %v1627_v56, %v1061_v61  ;;  %v1068_v1 = vmul.f32 %v1629_v62, %v1056_v57  ;;  %vm1074_vm13 = vweird.f32 %v1629_v62 }
 0x921   :  { %vm1075_vm15 = vmor %vm1073_vm14, %vm1074_vm13 }
 0x922   :  { %v1069_v2 = vmul.f32 %v1629_v62, %v1068_v1  ;;  %v1066_v4 = vsel %vm1065_vm12, %v1627_v56, %v1062_v0 }
 0x923   :  { %v1077_v8 = vmul.f32 %v1066_v4, %v1043_v54 }
 0x924   :  { %v1070_v5 = vmul.f32 0.5, %v1069_v2  ;;  %v1157_v22 = vpop.permute.xlu2 %1156 }
 0x925   :  { %v1082_v13 = vmul.f32 %v1582_v7, %v1077_v8 }
 0x926   :  { %v1071_v6 = vsub.f32 1.5, %v1070_v5 }
 0x927   :  { %v2433_v14 = vadd.f32 %v1583_v12, %v1082_v13  ;;  %v1585_v13 = vld [vmem:[#allocation23] ss:$0 sm:$0xff] }
 0x928   :  { %v1072_v9 = vmul.f32 %v1629_v62, %v1071_v6  ;;  %v2074_v6 = vmov 8.0  }
 0x92a   :  { %v1076_v10 = vsel %vm1075_vm15, %v1629_v62, %v1072_v9 }
 0x92b   :  { %v1078_v15 = vmul.f32 %v1076_v10, %v1044_v45 }
 0x92d   :  { %v1083_v16 = vmul.f32 %v1582_v7, %v1078_v15  ;;  %v1260_v7 = vsel %vm295_vm0, %v2433_v14, 0.0  ;;  %v1543_v15 = vld [vmem:[%s2510_s18 + $0x8] sm:$0xff] }
 0x92e   :  { %v1261_v8 = vrot.slane %v1260_v7, 4  ;;  %1337 = vmatpush.bf16.msra.mxu3 %v1543_v15 }
 0x92f   :  { %v2435_v17 = vadd.f32 %v1583_v12, %v1083_v16 }
 0x930   :  { %v1262_v16 = vadd.f32 %v1261_v8, %v1260_v7 }
 0x931   :  { %v1089_v18 = vpack.c.bf16 %v2435_v17, %v2433_v14  ;;  %v1267_v12 = vsel %vm295_vm0, %v2435_v17, 0.0 }
 0x932   :  { %v1268_v24 = vrot.slane %v1267_v12, 4 }
 0x933   :  { %1501 = vmatmul.msk.bf16.vlgmr.msrb.gmra.mxu3 %vm295_vm0, %v1089_v18  ;;  %1502 = vmatmul.msk.bf16.vlgmr.msra.gmra.mxu0 %vm295_vm0, %v1089_v18 }
 0x9b0   :  { %v1168_v25 = vpop.f32.mrf.mxu0 }
 0x9b1   :  { %v1169_v27 = vadd.f32 %v1168_v25, %v1157_v22  ;;  %v1542_v25 = vld [vmem:[%s2510_s18] sm:$0xff] }
 0x9b2   :  { %1338 = vmatpush.bf16.msra.mxu3 %v1542_v25 }
 0x9b3   :  { %v1175_v29 = vmul.f32 0.044715, %v1169_v27  ;;  %v1173_v52 = vmul.f32 0.5, %v1169_v27 }
 0x9b5   :  { %v1177_v33 = vmul.f32 %v1175_v29, %v1169_v27 }
 0x9b6   :  { %v1122_v30 = vpop.f32.mrf.mxu3 }
 0x9b7   :  { %v1179_v32 = vmul.f32 %v1177_v33, %v1169_v27  ;;  %v1123_v34 = vadd.f32 %v2430_v53, %v1122_v30  ;;  %v1269_v33 = vadd.f32 %v1268_v24, %v1267_v12 }
 0x9b8   :  { %v1170_v35 = vpop.f32.mrf.mxu0 }
 0x9b9   :  { %v1181_v31 = vadd.f32 %v1179_v32, %v1169_v27  ;;  %v1129_v36 = vmul.f32 0.044715, %v1123_v34  ;;  %v1171_v37 = vadd.f32 %v1170_v35, %v1157_v22  ;;  %v1127_v62 = vmul.f32 0.5, %v1123_v34 }
 0x9ba   :  { %v1263_v27 = vrot.slane %v1262_v16, 2 }
 0x9bb   :  { %v1131_v63 = vmul.f32 %v1129_v36, %v1123_v34  ;;  %v1176_v38 = vmul.f32 0.044715, %v1171_v37  ;;  %v1183_v39 = vmul.f32 0.7978846, %v1181_v31  ;;  %v1174_v56 = vmul.f32 0.5, %v1171_v37 }
 0x9bd   :  { %v1133_v40 = vmul.f32 %v1131_v63, %v1123_v34  ;;  %v1178_v41 = vmul.f32 %v1176_v38, %v1171_v37  ;;  %1630 = vtanh.f32 %v1183_v39  ;;  %v1270_v63 = vrot.slane %v1269_v33, 2 }
 0x9be   :  { %v1124_v42 = vpop.f32.mrf.mxu3 }
 0x9bf   :  { %v1135_v43 = vadd.f32 %v1133_v40, %v1123_v34  ;;  %v1180_v54 = vmul.f32 %v1178_v41, %v1171_v37  ;;  %v1125_v3 = vadd.f32 %v2430_v53, %v1124_v42  ;;  %v1264_v34 = vadd.f32 %v1263_v27, %v1262_v16 }
 0x9c1   :  { %v1182_v21 = vadd.f32 %v1180_v54, %v1171_v37  ;;  %v1130_v44 = vmul.f32 0.044715, %v1125_v3  ;;  %v1137_v23 = vmul.f32 0.7978846, %v1135_v43  ;;  %v1128_v0 = vmul.f32 0.5, %v1125_v3 }
 0x9c2   :  { %v1265_v40 = vrot.slane %v1264_v34, 1 }
 0x9c3   :  { %v1184_v45 = vmul.f32 0.7978846, %v1182_v21  ;;  %v1132_v55 = vmul.f32 %v1130_v44, %v1125_v3  ;;  %v1631_v47 = vpop.eup %1630 }
 0x9c4   :  { %v1187_v50 = vadd.f32 1.0, %v1631_v47  ;;  %v1266_v44 = vadd.f32 %v1265_v40, %v1264_v34 }
 0x9c5   :  { %1632 = vtanh.f32 %v1184_v45  ;;  %v1134_v46 = vmul.f32 %v1132_v55, %v1125_v3 }
 0x9c6   :  { %1634 = vtanh.f32 %v1137_v23  ;;  %v1189_v53 = vmul.f32 %v1187_v50, %v1173_v52 }
 0x9c7   :  { %v1136_v48 = vadd.f32 %v1134_v46, %v1125_v3  ;;  %v1271_v3 = vadd.f32 %v1270_v63, %v1269_v33 }
 0x9c9   :  { %v1138_v49 = vmul.f32 0.7978846, %v1136_v48  ;;  %v1272_v47 = vrot.slane %v1271_v3, 1 }
 0x9cb   :  { %v1633_v20 = vpop.eup %1632  ;;  %1636 = vtanh.f32 %v1138_v49  ;;  %v1273_v52 = vadd.f32 %v1272_v47, %v1271_v3 }
 0x9cc   :  { %v1188_v57 = vadd.f32 1.0, %v1633_v20  ;;  %v1635_v58 = vpop.eup %1634  ;;  %1638 = vrcp.f32 %v2074_v6 }
 0x9cd   :  { %v1141_v60 = vadd.f32 1.0, %v1635_v58 }
 0x9ce   :  { %v1190_v59 = vmul.f32 %v1188_v57, %v1174_v56 }
 0x9cf   :  { %v1143_v2 = vmul.f32 %v1141_v60, %v1127_v62 }
 0x9d0   :  { %v1191_v51 = vpack.c.bf16 %v1190_v59, %v1189_v53 }
 0x9d1   :  { %v1637_v61 = vpop.eup %1636 }
 0x9d2   :  { %v1142_v1 = vadd.f32 1.0, %v1637_v61  ;;  %1511 = vmatmul.msk.bf16.vlgmr.msra.gmra.mxu1 %vm295_vm0, %v1191_v51  ;;  %v1639_v9 = vpop.eup %1638 }
 0x9d3   :  { %v1275_v22 = vmul.f32 8.0, %v1639_v9  ;;  %vm1279_vm1 = vweird.f32 %v1639_v9 }
 0x9d4   :  { %v1144_v4 = vmul.f32 %v1142_v1, %v1128_v0 }
 0x9d5   :  { %v1276_v28 = vsub.f32 1.0, %v1275_v22 }
 0x9d6   :  { %v1145_v5 = vpack.c.bf16 %v1144_v4, %v1143_v2 }
 0x9d7   :  { %v1277_v36 = vmul.f32 %v1639_v9, %v1276_v28 }
 0x9d8   :  { %1520 = vmatmul.msk.bf16.vlgmr.msra.gmra.mxu2 %vm295_vm0, %v1145_v5 }
 0x9d9   :  { %v1278_v42 = vadd.f32 %v1639_v9, %v1277_v36 }
 0x9db   :  { %v1280_v55 = vsel %vm1279_vm1, %v1639_v9, %v1278_v42 }
 0x9dc   :  { %v1281_v49 = vmul.f32 %v1280_v55, %v1266_v44  ;;  %v1282_v53 = vmul.f32 %v1280_v55, %v1273_v52 }
 0xa4f   :  { %v1220_v10 = vpop.f32.mrf.mxu1 }
 0xa57   :  { %v1222_v32 = vpop.f32.mrf.mxu1 }
 0xa5b   :  { %v1249_v18 = vpop.f32.mrf.mxu2 }
 0xa5c   :  { %v1250_v19 = vadd.f32 %v1249_v18, %v1220_v10 }
 0xa5e   :  { %v1258_v26 = vadd.f32 %v1585_v13, %v1250_v19 }
 0xa60   :  { %v1283_v29 = vsel %vm295_vm0, %v1258_v26, 0.0 }
 0xa61   :  { %v1284_v30 = vrot.slane %v1283_v29, 4 }
 0xa63   :  { %v1285_v35 = vadd.f32 %v1284_v30, %v1283_v29  ;;  %v1251_v31 = vpop.f32.mrf.mxu2 }
 0xa64   :  { %v1252_v37 = vadd.f32 %v1251_v31, %v1222_v32 }
 0xa65   :  { %v1286_v38 = vrot.slane %v1285_v35, 2 }
 0xa66   :  { %v1259_v39 = vadd.f32 %v1585_v13, %v1252_v37  ;;  %v1349_v13 = vadd.f32 %v1258_v26, %v2433_v14 }
 0xa67   :  { %v1287_v41 = vadd.f32 %v1286_v38, %v1285_v35 }
 0xa68   :  { %v1290_v43 = vsel %vm295_vm0, %v1259_v39, 0.0  ;;  %v1350_v19 = vadd.f32 %v1259_v39, %v2435_v17 }
 0xa69   :  { %v1288_v54 = vrot.slane %v1287_v41, 1  ;;  %v1291_v21 = vrot.slane %v1290_v43, 4 }
 0xa6b   :  { %v1289_v23 = vadd.f32 %v1288_v54, %v1287_v41  ;;  %v1292_v45 = vadd.f32 %v1291_v21, %v1290_v43 }
 0xa6d   :  { %v1297_v46 = vmul.f32 %v1289_v23, %v1280_v55  ;;  %v1293_v48 = vrot.slane %v1292_v45, 2 }
 0xa6f   :  { %v1294_v50 = vadd.f32 %v1293_v48, %v1292_v45  ;;  %v1299_v20 = vadd.f32 %v1297_v46, %v1281_v49  ;;  %v1587_v49 = vld [vmem:[%s2536_s26] ss:$0 sm:$0xff] }
 0xa71   :  { %v1295_v56 = vrot.slane %v1294_v50, 1  ;;  %v1301_v58 = vmax.f32 %v1299_v20, 0.0 }
 0xa73   :  { %v1296_v57 = vadd.f32 %v1295_v56, %v1294_v50  ;;  %v1303_v51 = vpack.c.bf16 %v1301_v58, %v1301_v58 }
 0xa75   :  { %v1298_v59 = vmul.f32 %v1296_v57, %v1280_v55  ;;  %v1311_v0 = vunpack.c.l.b16 %v1303_v51 }
 0xa77   :  { %v1300_v60 = vadd.f32 %v1298_v59, %v1282_v53 }
 0xa79   :  { %v1302_v61 = vmax.f32 %v1300_v60, 0.0 }
 0xa7b   :  { %v1304_v62 = vpack.c.bf16 %v1302_v61, %v1302_v61 }
 0xa7d   :  { %v1312_v1 = vunpack.c.l.b16 %v1304_v62 }
 0xa7f   :  { %v1314_v2 = vsel %vm1313_vm2, %v1312_v1, %v1311_v0 }
 0xa80   :  { %v1315_v4 = vpack.c.b16 %v1314_v2, %v1314_v2 }
 0xa82   :  { %1529 = vmatmul.msk.bf16.vlgmr.msra.gmra.mxu3 %vm295_vm0, %v1315_v4 }
 0xb05   :  { %v1340_v5 = vpop.f32.mrf.mxu3 }
 0xb06   :  { %v1344_v6 = vsub.f32 0.0, %v1340_v5 }
 0xb08   :  { %v1345_v7 = vmul.f32 1.442695, %v1344_v6 }
 0xb0a   :  { %1640 = vpow2.f32 %v1345_v7 }
 0xb0d   :  { %v1342_v8 = vpop.f32.mrf.mxu3 }
 0xb10   :  { %v1641_v9 = vpop.eup %1640 }
 0xb11   :  { %v1347_v10 = vadd.f32 1.0, %v1641_v9 }
 0xb13   :  { %1642 = vrcp.f32 %v1347_v10 }
 0xb19   :  { %v1643_v12 = vpop.eup %1642 }
 0xb1a   :  { %v1353_v15 = vperm.slane %v1643_v12, 0  ;;  %v1352_v16 = vrot.slane %v1643_v12, 1 }
 0xb1c   :  { %v1357_v18 = vmul.f32 %v1353_v15, %v1349_v13  ;;  %v1354_v22 = vperm.slane %v1352_v16, 0 }
 0xb1e   :  { %v1361_v24 = vsel %vm295_vm0, %v1357_v18, 0.0  ;;  %v1358_v25 = vmul.f32 %v1354_v22, %v1350_v19 }
 0xb1f   :  { %1362 = vadd.xlane.f32.xlu0 %v1361_v24 }
 0xb20   :  { %v1364_v27 = vsel %vm295_vm0, %v1358_v25, 0.0 }
 0xb21   :  { %1365 = vadd.xlane.f32.xlu1 %v1364_v27 }
 0xb92   :  { %v1363_v28 = vpop.xlane.xlu0 %1362 }
 0xb93   :  { %v1367_v29 = vmul.f32 %v1363_v28, %v2255_v11 }
 0xb94   :  { %v1366_v33 = vpop.xlane.xlu1 %1365 }
 0xb95   :  { %v1369_v30 = vsub.f32 %v1357_v18, %v1367_v29  ;;  %v1368_v14 = vmul.f32 %v1366_v33, %v2255_v11 }
 0xb97   :  { %v1370_v26 = vsub.f32 %v1358_v25, %v1368_v14  ;;  %v1371_v32 = vmul.f32 %v1369_v30, %v1369_v30 }
 0xb99   :  { %v1373_v34 = vsel %vm295_vm0, %v1371_v32, 0.0  ;;  %v1372_v17 = vmul.f32 %v1370_v26, %v1370_v26 }
 0xb9a   :  { %1374 = vadd.xlane.f32.xlu2 %v1373_v34 }
 0xb9b   :  { %v1376_v35 = vsel %vm295_vm0, %v1372_v17, 0.0 }
 0xb9c   :  { %1377 = vadd.xlane.f32.xlu0 %v1376_v35 }
 0xc0d   :  { %v1375_v31 = vpop.xlane.xlu2 %1374 }
 0xc0e   :  { %v1379_v36 = vmul.f32 %v1375_v31, %v2255_v11 }
 0xc0f   :  { %v1378_v37 = vpop.xlane.xlu0 %1377 }
 0xc10   :  { %v1381_v63 = vadd.f32 1e-12, %v1379_v36  ;;  %v1380_v38 = vmul.f32 %v1378_v37, %v2255_v11  ;;  %v1586_v11 = vld [vmem:[%s2511_s19] ss:$0 sm:$0xff] }
 0xc12   :  { %1644 = vrsqrt.f32 %v1381_v63  ;;  %v1382_v39 = vadd.f32 1e-12, %v1380_v38  ;;  %vm1389_vm3 = vweird.f32 %v1381_v63 }
 0xc14   :  { %1646 = vrsqrt.f32 %v1382_v39  ;;  %vm1399_vm6 = vweird.f32 %v1382_v39 }
 0xc18   :  { %v1645_v40 = vpop.eup %1644 }
 0xc19   :  { %v1384_v41 = vmul.f32 %v1645_v40, %v1381_v63  ;;  %vm1390_vm0 = vweird.f32 %v1645_v40 }
 0xc1a   :  { %v1647_v42 = vpop.eup %1646  ;;  %vm1391_vm5 = vmor %vm1389_vm3, %vm1390_vm0 }
 0xc1b   :  { %v1385_v43 = vmul.f32 %v1645_v40, %v1384_v41  ;;  %v1394_v54 = vmul.f32 %v1647_v42, %v1382_v39  ;;  %vm1400_vm4 = vweird.f32 %v1647_v42 }
 0xc1c   :  { %vm1401_vm7 = vmor %vm1399_vm6, %vm1400_vm4 }
 0xc1d   :  { %v1386_v3 = vmul.f32 0.5, %v1385_v43  ;;  %v1395_v21 = vmul.f32 %v1647_v42, %v1394_v54 }
 0xc1f   :  { %v1387_v44 = vsub.f32 1.5, %v1386_v3  ;;  %v1396_v23 = vmul.f32 0.5, %v1395_v21 }
 0xc21   :  { %v1388_v45 = vmul.f32 %v1645_v40, %v1387_v44  ;;  %v1397_v55 = vsub.f32 1.5, %v1396_v23 }
 0xc23   :  { %v1392_v46 = vsel %vm1391_vm5, %v1645_v40, %v1388_v45  ;;  %v1398_v47 = vmul.f32 %v1647_v42, %v1397_v55 }
 0xc24   :  { %v1403_v48 = vmul.f32 %v1392_v46, %v1369_v30 }
 0xc25   :  { %v1402_v50 = vsel %vm1401_vm7, %v1647_v42, %v1398_v47 }
 0xc26   :  { %v1408_v20 = vmul.f32 %v1586_v11, %v1403_v48  ;;  %v1404_v52 = vmul.f32 %v1402_v50, %v1370_v26 }
 0xc28   :  { %v1409_v56 = vmul.f32 %v1586_v11, %v1404_v52  ;;  %v1413_v57 = vadd.f32 %v1587_v49, %v1408_v20 }
 0xc2a   :  { %v1414_v58 = vadd.f32 %v1587_v49, %v1409_v56  ;;  %v1415_v53 = vpack.c.bf16 %v1413_v57, %v1413_v57 }
 0xc2c   :  { %v1416_v59 = vpack.c.bf16 %v1414_v58, %v1414_v58  ;;  %1418 = vst.msk [vmem:[#allocation26] sm:$0xf] %vm1417_vm8, %v1415_v53 }
 0xc2e   :  { %1419 = vst.msk [vmem:[#allocation26 + $0x4] sm:$0xf] %vm1417_vm8, %v1416_v59 }
 0xc2f   :  { %1432 = dma.vmem_to_hbm [thread:$0]  %s1425_s27, 128, %s1427_s28, [#allocation4], %s2056_s23, %s2056_s23, %s2057_s7  }
 0xc30   :  { %2048 = dma.done.wait [#allocation4], 128  }
 0xc31   :  { %2049 = vsyncadd [#allocation4], 4294967168 }
 0xc32   :  { %1437 = vsyncpa [#allocation3], 1 }
 0xc33   :  { %1438 = vsyncpa [#allocation6], 1 }
 0xc34   :  { %1439 = vsyncpa [#allocation9], 1 }
 0xc35   :  { %1440 = vsyncpa [#allocation12], 1 }
 0xc36   :  { %1441 = vsyncpa [#allocation15], 1 }
 0xc37   :  { %1442 = vsyncpa [#allocation18], 1 }
 0xc38   :  { %1443 = vsyncpa [#allocation21], 1 }
 0xc39   :  { %1444 = vsyncpa [#allocation24], 1 }
 0xc3a   :  { %1445 = vsyncpa [#allocation4], 1 }

</bundles_post_ra>
